<compile_context>
chip_gen: v7x
topology: tpu7x:2x2x1
jax: 0.10.0
libtpu: 0.0.40
codegen_flags: <defaults>
</compile_context>

<pallas_src>
import jax
import jax.numpy as jnp
from jax.experimental import pallas as pl
from jax.experimental.pallas import tpu as pltpu


def _round_up(v, m):
    return ((v + m - 1) // m) * m


def rcab_kernel(x_ref, w1_ref, b1_ref, w2_ref, b2_ref,
                wd_ref, bd_ref, wu_ref, bu_ref,
                out_ref, slab_ref, h1_ref):
    # x_ref   : (1, H, W, C)      input image (NHWC)
    # w1_ref  : (KSLAB, C)        conv1 weights, dense im2col rows + zero pad
    # w2_ref  : (KSLAB, C)        conv2 weights
    # b1_ref, b2_ref, bu_ref : (1, C);  wd_ref, wu_ref : (Cr, C);  bd_ref : (Cr, 1)
    # out_ref : (1, H, W, C)
    # slab_ref: (H, W, KSLAB)     dense im2col scratch, shared by both convs
    # h1_ref  : (H, W, C)         VMEM staging for the conv1 activation
    _, H, W, C = x_ref.shape
    HW = H * W
    KSLAB = slab_ref.shape[-1]

    # Zero the (3x smaller) slab once per grid step.  This realizes (a) the
    # "SAME" zero halo for both convs and (b) zeros in the K-pad lanes
    # [9*C, KSLAB) so garbage VMEM never reaches the MXU.  Both conv fills
    # write exactly the same valid regions, so one zeroing serves both.
    # Done every step (not pid-gated): with ("parallel",) semantics each
    # TensorCore owns its own scratch.
    slab_ref[...] = jnp.zeros(slab_ref.shape, jnp.float32)

    def fill_slab(read_src):
        # read_src(r0, r1, c0, c1) -> (r1-r0, c1-c0, C) slice of the conv
        # input.  Tap t lands densely at lanes [t*C, (t+1)*C).
        for ky in range(3):
            for kx in range(3):
                t = ky * 3 + kx
                dy, dx = ky - 1, kx - 1
                r0, r1 = max(0, -dy), min(H, H - dy)
                c0, c1 = max(0, -dx), min(W, W - dx)
                slab_ref[r0:r1, c0:c1, t * C:(t + 1) * C] = (
                    read_src(r0 + dy, r1 + dy, c0 + dx, c1 + dx))

    def conv_matmul(w_ref, b_ref):
        slab = slab_ref[...].reshape(HW, KSLAB)
        return jnp.dot(slab, w_ref[...],
                       preferred_element_type=jnp.float32) + b_ref[...]

    # ---- conv1 (3x3, pad=1) + bias + ReLU : one MXU matmul, staged to VMEM ----
    fill_slab(lambda a, b, c, d: x_ref[0, a:b, c:d, :])
    h1 = jnp.maximum(conv_matmul(w1_ref, b1_ref), 0.0)            # (HW, C)
    h1_ref[...] = h1.reshape(H, W, C)

    # ---- conv2 (3x3, pad=1) + bias : one MXU matmul, fed by strided loads ----
    fill_slab(lambda a, b, c, d: h1_ref[a:b, c:d, :])
    h2 = conv_matmul(w2_ref, b2_ref)                              # (HW, C)

    # ---- CALayer (squeeze/excite) on VPU/XLU, no tiny MXU matmuls ----
    y = jnp.sum(h2, axis=0, keepdims=True) * (1.0 / HW)           # (1, C)
    z = jnp.sum(wd_ref[...] * y, axis=1, keepdims=True) + bd_ref[...]   # (Cr, 1)
    z = jnp.maximum(z, 0.0)
    s = jnp.sum(wu_ref[...] * z, axis=0, keepdims=True) + bu_ref[...]   # (1, C)
    gate = jax.nn.sigmoid(s)                                      # (1, C)

    # ---- scale + residual ----
    x_in = x_ref[0, :, :, :].reshape(HW, C)
    res = h2 * gate + x_in
    out_ref[0] = res.reshape(H, W, C)


def _pack_conv_weight(w, C, KSLAB):
    # (3, 3, Cin, Cout) HWIO -> (KSLAB, Cout): the 9 taps stacked densely
    # along K (tap t -> rows [t*C, (t+1)*C)), then zero-padded to KSLAB so
    # the slab's last dim stays a multiple of 128 (keeps the (H,W,K)->(HW,K)
    # reshape a free relayout).  The zero rows pair with the zeroed pad lanes.
    w9 = w.reshape(9 * C, C)
    return jnp.pad(w9, ((0, KSLAB - 9 * C), (0, 0)))


@jax.jit
def rcab_pallas(x, w1, b1, w2, b2, wd, bd, wu, bu):
    """RCAB forward. x: (N, H, W, C) float32 NHWC; conv weights HWIO."""
    N, H, W, C = x.shape
    Cr = wd.shape[1]
    KSLAB = _round_up(9 * C, 128)

    w1p = _pack_conv_weight(w1, C, KSLAB)
    w2p = _pack_conv_weight(w2, C, KSLAB)
    b1r, b2r, bur = b1.reshape(1, C), b2.reshape(1, C), bu.reshape(1, C)
    wdt = wd.T                       # (Cr, C)  row-reduce layout for the VPU
    bdr = bd.reshape(Cr, 1)

    grid_spec = pltpu.PrefetchScalarGridSpec(
        num_scalar_prefetch=0,
        grid=(N,),
        in_specs=[
            pl.BlockSpec((1, H, W, C), lambda n: (n, 0, 0, 0)),
            pl.BlockSpec((KSLAB, C), lambda n: (0, 0)),
            pl.BlockSpec((1, C), lambda n: (0, 0)),
            pl.BlockSpec((KSLAB, C), lambda n: (0, 0)),
            pl.BlockSpec((1, C), lambda n: (0, 0)),
            pl.BlockSpec((Cr, C), lambda n: (0, 0)),
            pl.BlockSpec((Cr, 1), lambda n: (0, 0)),
            pl.BlockSpec((Cr, C), lambda n: (0, 0)),
            pl.BlockSpec((1, C), lambda n: (0, 0)),
        ],
        out_specs=pl.BlockSpec((1, H, W, C), lambda n: (n, 0, 0, 0)),
        scratch_shapes=[pltpu.VMEM((H, W, KSLAB), jnp.float32),
                        pltpu.VMEM((H, W, C), jnp.float32)],
    )

    # Advisory cost hint (lets XLA schedule neighbours around this small,
    # latency-dominated kernel).
    flops = N * (2 * 2 * H * W * (9 * C) * C        # two im2col matmuls
                 + 2 * 2 * C * Cr                   # squeeze/excite
                 + 10 * H * W * C)                  # relu/gate/residual-ish
    cost = pl.CostEstimate(
        flops=int(flops),
        transcendentals=int(N * C),                 # sigmoid gate
        bytes_accessed=int(4 * (2 * N * H * W * C   # x in + out
                                + 2 * KSLAB * C     # packed conv weights
                                + 2 * Cr * C + 3 * C + Cr)))

    return pl.pallas_call(
        rcab_kernel,
        out_shape=jax.ShapeDtypeStruct((N, H, W, C), jnp.float32),
        grid_spec=grid_spec,
        compiler_params=pltpu.CompilerParams(
            dimension_semantics=("parallel",)),
        cost_estimate=cost,
    )(x, w1p, b1r, w2p, b2r, wdt, bdr, wu, bur)


def rcab_reference(x, w1, b1, w2, b2, wd, bd, wu, bu):
    dn = ("NHWC", "HWIO", "NHWC")
    h1 = jax.lax.conv_general_dilated(x, w1, (1, 1), "SAME",
                                      dimension_numbers=dn) + b1[None, None, None, :]
    h1 = jnp.maximum(h1, 0.0)
    h2 = jax.lax.conv_general_dilated(h1, w2, (1, 1), "SAME",
                                      dimension_numbers=dn) + b2[None, None, None, :]
    y = h2.mean(axis=(1, 2))                                   # (N, C)
    y = jnp.maximum(y @ wd + bd[None, :], 0.0)
    y = jax.nn.sigmoid(y @ wu + bu[None, :])
    return h2 * y[:, None, None, :] + x


if __name__ == "__main__":
    # RCAB(n_feat=32, reduction=16) -> mid channels = 2
    N, H, W, C = 2, 16, 16, 32
    RED = 16
    Cr = C // RED

    key = jax.random.PRNGKey(0)
    ks = jax.random.split(key, 9)
    x  = jax.random.normal(ks[0], (N, H, W, C), jnp.float32)
    w1 = jax.random.normal(ks[1], (3, 3, C, C), jnp.float32) * 0.05
    b1 = jax.random.normal(ks[2], (C,), jnp.float32) * 0.05
    w2 = jax.random.normal(ks[3], (3, 3, C, C), jnp.float32) * 0.05
    b2 = jax.random.normal(ks[4], (C,), jnp.float32) * 0.05
    wd = jax.random.normal(ks[5], (C, Cr), jnp.float32) * 0.1
    bd = jax.random.normal(ks[6], (Cr,), jnp.float32) * 0.05
    wu = jax.random.normal(ks[7], (Cr, C), jnp.float32) * 0.1
    bu = jax.random.normal(ks[8], (C,), jnp.float32) * 0.05

    out = rcab_pallas(x, w1, b1, w2, b2, wd, bd, wu, bu)
    out = jax.block_until_ready(out)

    ref = rcab_reference(x, w1, b1, w2, b2, wd, bd, wu, bu)
    assert jnp.allclose(out, ref, atol=1e-4, rtol=1e-4), \
        f"max err {jnp.max(jnp.abs(out - ref))}"

    print("KERNEL_OK")
</pallas_src>

<mosaic_0001>
module attributes {stable_mosaic.version = 11 : i64} {
  func.func @rcab_kernel(%arg0: i32, %arg1: memref<1x16x16x32xf32, #tpu.memory_space<vmem>>, %arg2: memref<384x32xf32, #tpu.memory_space<vmem>>, %arg3: memref<1x32xf32, #tpu.memory_space<vmem>>, %arg4: memref<384x32xf32, #tpu.memory_space<vmem>>, %arg5: memref<1x32xf32, #tpu.memory_space<vmem>>, %arg6: memref<2x32xf32, #tpu.memory_space<vmem>>, %arg7: memref<2x1xf32, #tpu.memory_space<vmem>>, %arg8: memref<2x32xf32, #tpu.memory_space<vmem>>, %arg9: memref<1x32xf32, #tpu.memory_space<vmem>>, %arg10: memref<1x16x16x32xf32, #tpu.memory_space<vmem>>, %arg11: memref<16x16x384xf32, #tpu.memory_space<vmem>>, %arg12: memref<16x16x32xf32, #tpu.memory_space<vmem>>) attributes {dimension_semantics = [#tpu.dimension_semantics<parallel>], iteration_bounds = array<i64: 2>, scalar_prefetch = 0 : i64, scratch_operands = 2 : i64, tpu.core_type = #tpu.core_type<tc>, window_params = [{transform_indices = @transform_0, window_bounds = array<i64: 1, 16, 16, 32>}, {pipeline_mode = #tpu.pipeline_mode<synchronous>, transform_indices = @transform_1, window_bounds = array<i64: 384, 32>}, {pipeline_mode = #tpu.pipeline_mode<synchronous>, transform_indices = @transform_2, window_bounds = array<i64: 1, 32>}, {pipeline_mode = #tpu.pipeline_mode<synchronous>, transform_indices = @transform_3, window_bounds = array<i64: 384, 32>}, {pipeline_mode = #tpu.pipeline_mode<synchronous>, transform_indices = @transform_4, window_bounds = array<i64: 1, 32>}, {pipeline_mode = #tpu.pipeline_mode<synchronous>, transform_indices = @transform_5, window_bounds = array<i64: 2, 32>}, {pipeline_mode = #tpu.pipeline_mode<synchronous>, transform_indices = @transform_6, window_bounds = array<i64: 2, 1>}, {pipeline_mode = #tpu.pipeline_mode<synchronous>, transform_indices = @transform_7, window_bounds = array<i64: 2, 32>}, {pipeline_mode = #tpu.pipeline_mode<synchronous>, transform_indices = @transform_8, window_bounds = array<i64: 1, 32>}, {transform_indices = @transform_9, window_bounds = array<i64: 1, 16, 16, 32>}]} {
    %cst = arith.constant 0.000000e+00 : f32
    %0 = vector.broadcast %cst : f32 to vector<16x16x384xf32>
    %c0 = arith.constant 0 : index
    %c0_0 = arith.constant 0 : index
    %c0_1 = arith.constant 0 : index
    %1 = vector.load %arg11[%c0, %c0_0, %c0_1] : memref<16x16x384xf32, #tpu.memory_space<vmem>>, vector<16x16x384xf32>
    tpu.vector_store %arg11[%c0, %c0_0, %c0_1], %0 {strides = array<i32>} : memref<16x16x384xf32, #tpu.memory_space<vmem>>, vector<16x16x384xf32>,
    %c0_2 = arith.constant 0 : index
    %c0_3 = arith.constant 0 : index
    %c0_4 = arith.constant 0 : index
    %c0_5 = arith.constant 0 : index
    %2 = vector.load %arg1[%c0_2, %c0_3, %c0_4, %c0_5] : memref<1x16x16x32xf32, #tpu.memory_space<vmem>>, vector<1x15x15x32xf32>
    %3 = vector.shape_cast %2 : vector<1x15x15x32xf32> to vector<15x15x32xf32>
    %c1 = arith.constant 1 : index
    %c1_6 = arith.constant 1 : index
    %c0_7 = arith.constant 0 : index
    %4 = vector.load %arg11[%c1, %c1_6, %c0_7] : memref<16x16x384xf32, #tpu.memory_space<vmem>>, vector<15x15x32xf32>
    tpu.vector_store %arg11[%c1, %c1_6, %c0_7], %3 {strides = array<i32>} : memref<16x16x384xf32, #tpu.memory_space<vmem>>, vector<15x15x32xf32>,
    %c0_8 = arith.constant 0 : index
    %c0_9 = arith.constant 0 : index
    %c0_10 = arith.constant 0 : index
    %c0_11 = arith.constant 0 : index
    %5 = vector.load %arg1[%c0_8, %c0_9, %c0_10, %c0_11] : memref<1x16x16x32xf32, #tpu.memory_space<vmem>>, vector<1x15x16x32xf32>
    %6 = vector.shape_cast %5 : vector<1x15x16x32xf32> to vector<15x16x32xf32>
    %c1_12 = arith.constant 1 : index
    %c0_13 = arith.constant 0 : index
    %c32 = arith.constant 32 : index
    %7 = vector.load %arg11[%c1_12, %c0_13, %c32] : memref<16x16x384xf32, #tpu.memory_space<vmem>>, vector<15x16x32xf32>
    tpu.vector_store %arg11[%c1_12, %c0_13, %c32], %6 {strides = array<i32>} : memref<16x16x384xf32, #tpu.memory_space<vmem>>, vector<15x16x32xf32>,
    %c0_14 = arith.constant 0 : index
    %c0_15 = arith.constant 0 : index
    %c1_16 = arith.constant 1 : index
    %c0_17 = arith.constant 0 : index
    %8 = vector.load %arg1[%c0_14, %c0_15, %c1_16, %c0_17] : memref<1x16x16x32xf32, #tpu.memory_space<vmem>>, vector<1x15x15x32xf32>
    %9 = vector.shape_cast %8 : vector<1x15x15x32xf32> to vector<15x15x32xf32>
    %c1_18 = arith.constant 1 : index
    %c0_19 = arith.constant 0 : index
    %c64 = arith.constant 64 : index
    %10 = vector.load %arg11[%c1_18, %c0_19, %c64] : memref<16x16x384xf32, #tpu.memory_space<vmem>>, vector<15x15x32xf32>
    tpu.vector_store %arg11[%c1_18, %c0_19, %c64], %9 {strides = array<i32>} : memref<16x16x384xf32, #tpu.memory_space<vmem>>, vector<15x15x32xf32>,
    %c0_20 = arith.constant 0 : index
    %c0_21 = arith.constant 0 : index
    %c0_22 = arith.constant 0 : index
    %c0_23 = arith.constant 0 : index
    %11 = vector.load %arg1[%c0_20, %c0_21, %c0_22, %c0_23] : memref<1x16x16x32xf32, #tpu.memory_space<vmem>>, vector<1x16x15x32xf32>
    %12 = vector.shape_cast %11 : vector<1x16x15x32xf32> to vector<16x15x32xf32>
    %c0_24 = arith.constant 0 : index
    %c1_25 = arith.constant 1 : index
    %c96 = arith.constant 96 : index
    %13 = vector.load %arg11[%c0_24, %c1_25, %c96] : memref<16x16x384xf32, #tpu.memory_space<vmem>>, vector<16x15x32xf32>
    tpu.vector_store %arg11[%c0_24, %c1_25, %c96], %12 {strides = array<i32>} : memref<16x16x384xf32, #tpu.memory_space<vmem>>, vector<16x15x32xf32>,
    %c0_26 = arith.constant 0 : index
    %c0_27 = arith.constant 0 : index
    %c0_28 = arith.constant 0 : index
    %c0_29 = arith.constant 0 : index
    %14 = vector.load %arg1[%c0_26, %c0_27, %c0_28, %c0_29] : memref<1x16x16x32xf32, #tpu.memory_space<vmem>>, vector<1x16x16x32xf32>
    %15 = vector.shape_cast %14 : vector<1x16x16x32xf32> to vector<16x16x32xf32>
    %c0_30 = arith.constant 0 : index
    %c0_31 = arith.constant 0 : index
    %c128 = arith.constant 128 : index
    %16 = vector.load %arg11[%c0_30, %c0_31, %c128] : memref<16x16x384xf32, #tpu.memory_space<vmem>>, vector<16x16x32xf32>
    tpu.vector_store %arg11[%c0_30, %c0_31, %c128], %15 {strides = array<i32>} : memref<16x16x384xf32, #tpu.memory_space<vmem>>, vector<16x16x32xf32>,
    %c0_32 = arith.constant 0 : index
    %c0_33 = arith.constant 0 : index
    %c1_34 = arith.constant 1 : index
    %c0_35 = arith.constant 0 : index
    %17 = vector.load %arg1[%c0_32, %c0_33, %c1_34, %c0_35] : memref<1x16x16x32xf32, #tpu.memory_space<vmem>>, vector<1x16x15x32xf32>
    %18 = vector.shape_cast %17 : vector<1x16x15x32xf32> to vector<16x15x32xf32>
    %c0_36 = arith.constant 0 : index
    %c0_37 = arith.constant 0 : index
    %c160 = arith.constant 160 : index
    %19 = vector.load %arg11[%c0_36, %c0_37, %c160] : memref<16x16x384xf32, #tpu.memory_space<vmem>>, vector<16x15x32xf32>
    tpu.vector_store %arg11[%c0_36, %c0_37, %c160], %18 {strides = array<i32>} : memref<16x16x384xf32, #tpu.memory_space<vmem>>, vector<16x15x32xf32>,
    %c0_38 = arith.constant 0 : index
    %c1_39 = arith.constant 1 : index
    %c0_40 = arith.constant 0 : index
    %c0_41 = arith.constant 0 : index
    %20 = vector.load %arg1[%c0_38, %c1_39, %c0_40, %c0_41] : memref<1x16x16x32xf32, #tpu.memory_space<vmem>>, vector<1x15x15x32xf32>
    %21 = vector.shape_cast %20 : vector<1x15x15x32xf32> to vector<15x15x32xf32>
    %c0_42 = arith.constant 0 : index
    %c1_43 = arith.constant 1 : index
    %c192 = arith.constant 192 : index
    %22 = vector.load %arg11[%c0_42, %c1_43, %c192] : memref<16x16x384xf32, #tpu.memory_space<vmem>>, vector<15x15x32xf32>
    tpu.vector_store %arg11[%c0_42, %c1_43, %c192], %21 {strides = array<i32>} : memref<16x16x384xf32, #tpu.memory_space<vmem>>, vector<15x15x32xf32>,
    %c0_44 = arith.constant 0 : index
    %c1_45 = arith.constant 1 : index
    %c0_46 = arith.constant 0 : index
    %c0_47 = arith.constant 0 : index
    %23 = vector.load %arg1[%c0_44, %c1_45, %c0_46, %c0_47] : memref<1x16x16x32xf32, #tpu.memory_space<vmem>>, vector<1x15x16x32xf32>
    %24 = vector.shape_cast %23 : vector<1x15x16x32xf32> to vector<15x16x32xf32>
    %c0_48 = arith.constant 0 : index
    %c0_49 = arith.constant 0 : index
    %c224 = arith.constant 224 : index
    %25 = vector.load %arg11[%c0_48, %c0_49, %c224] : memref<16x16x384xf32, #tpu.memory_space<vmem>>, vector<15x16x32xf32>
    tpu.vector_store %arg11[%c0_48, %c0_49, %c224], %24 {strides = array<i32>} : memref<16x16x384xf32, #tpu.memory_space<vmem>>, vector<15x16x32xf32>,
    %c0_50 = arith.constant 0 : index
    %c1_51 = arith.constant 1 : index
    %c1_52 = arith.constant 1 : index
    %c0_53 = arith.constant 0 : index
    %26 = vector.load %arg1[%c0_50, %c1_51, %c1_52, %c0_53] : memref<1x16x16x32xf32, #tpu.memory_space<vmem>>, vector<1x15x15x32xf32>
    %27 = vector.shape_cast %26 : vector<1x15x15x32xf32> to vector<15x15x32xf32>
    %c0_54 = arith.constant 0 : index
    %c0_55 = arith.constant 0 : index
    %c256 = arith.constant 256 : index
    %28 = vector.load %arg11[%c0_54, %c0_55, %c256] : memref<16x16x384xf32, #tpu.memory_space<vmem>>, vector<15x15x32xf32>
    tpu.vector_store %arg11[%c0_54, %c0_55, %c256], %27 {strides = array<i32>} : memref<16x16x384xf32, #tpu.memory_space<vmem>>, vector<15x15x32xf32>,
    %c0_56 = arith.constant 0 : index
    %c0_57 = arith.constant 0 : index
    %c0_58 = arith.constant 0 : index
    %29 = vector.load %arg11[%c0_56, %c0_57, %c0_58] : memref<16x16x384xf32, #tpu.memory_space<vmem>>, vector<16x16x384xf32>
    %30 = vector.shape_cast %29 : vector<16x16x384xf32> to vector<256x384xf32>
    %c0_59 = arith.constant 0 : index
    %c0_60 = arith.constant 0 : index
    %31 = vector.load %arg2[%c0_59, %c0_60] : memref<384x32xf32, #tpu.memory_space<vmem>>, vector<384x32xf32>
    %cst_61 = arith.constant dense<0.000000e+00> : vector<256x32xf32>
    %32 = tpu.matmul %30, %31, %cst_61 {dimension_numbers = #tpu.dot_dimension_numbers<[1], [0], [0], [1], [0, 0, 1, 1], [], []>} : vector<256x384xf32>, vector<384x32xf32>, vector<256x32xf32> -> vector<256x32xf32>
    %c0_62 = arith.constant 0 : index
    %c0_63 = arith.constant 0 : index
    %33 = vector.load %arg3[%c0_62, %c0_63] : memref<1x32xf32, #tpu.memory_space<vmem>>, vector<1x32xf32>
    %34 = vector.broadcast %33 : vector<1x32xf32> to vector<256x32xf32>
    %35 = arith.addf %32, %34 : vector<256x32xf32>
    %cst_64 = arith.constant 0.000000e+00 : f32
    %36 = vector.broadcast %cst_64 : f32 to vector<256x32xf32>
    %37 = arith.maximumf %35, %36 : vector<256x32xf32>
    %38 = vector.shape_cast %37 : vector<256x32xf32> to vector<16x16x32xf32>
    %c0_65 = arith.constant 0 : index
    %c0_66 = arith.constant 0 : index
    %c0_67 = arith.constant 0 : index
    %39 = vector.load %arg12[%c0_65, %c0_66, %c0_67] : memref<16x16x32xf32, #tpu.memory_space<vmem>>, vector<16x16x32xf32>
    tpu.vector_store %arg12[%c0_65, %c0_66, %c0_67], %38 {strides = array<i32>} : memref<16x16x32xf32, #tpu.memory_space<vmem>>, vector<16x16x32xf32>,
    %c0_68 = arith.constant 0 : index
    %c0_69 = arith.constant 0 : index
    %c0_70 = arith.constant 0 : index
    %40 = vector.load %arg12[%c0_68, %c0_69, %c0_70] : memref<16x16x32xf32, #tpu.memory_space<vmem>>, vector<15x15x32xf32>
    %c1_71 = arith.constant 1 : index
    %c1_72 = arith.constant 1 : index
    %c0_73 = arith.constant 0 : index
    %41 = vector.load %arg11[%c1_71, %c1_72, %c0_73] : memref<16x16x384xf32, #tpu.memory_space<vmem>>, vector<15x15x32xf32>
    tpu.vector_store %arg11[%c1_71, %c1_72, %c0_73], %40 {strides = array<i32>} : memref<16x16x384xf32, #tpu.memory_space<vmem>>, vector<15x15x32xf32>,
    %c0_74 = arith.constant 0 : index
    %c0_75 = arith.constant 0 : index
    %c0_76 = arith.constant 0 : index
    %42 = vector.load %arg12[%c0_74, %c0_75, %c0_76] : memref<16x16x32xf32, #tpu.memory_space<vmem>>, vector<15x16x32xf32>
    %c1_77 = arith.constant 1 : index
    %c0_78 = arith.constant 0 : index
    %c32_79 = arith.constant 32 : index
    %43 = vector.load %arg11[%c1_77, %c0_78, %c32_79] : memref<16x16x384xf32, #tpu.memory_space<vmem>>, vector<15x16x32xf32>
    tpu.vector_store %arg11[%c1_77, %c0_78, %c32_79], %42 {strides = array<i32>} : memref<16x16x384xf32, #tpu.memory_space<vmem>>, vector<15x16x32xf32>,
    %c0_80 = arith.constant 0 : index
    %c1_81 = arith.constant 1 : index
    %c0_82 = arith.constant 0 : index
    %44 = vector.load %arg12[%c0_80, %c1_81, %c0_82] : memref<16x16x32xf32, #tpu.memory_space<vmem>>, vector<15x15x32xf32>
    %c1_83 = arith.constant 1 : index
    %c0_84 = arith.constant 0 : index
    %c64_85 = arith.constant 64 : index
    %45 = vector.load %arg11[%c1_83, %c0_84, %c64_85] : memref<16x16x384xf32, #tpu.memory_space<vmem>>, vector<15x15x32xf32>
    tpu.vector_store %arg11[%c1_83, %c0_84, %c64_85], %44 {strides = array<i32>} : memref<16x16x384xf32, #tpu.memory_space<vmem>>, vector<15x15x32xf32>,
    %c0_86 = arith.constant 0 : index
    %c0_87 = arith.constant 0 : index
    %c0_88 = arith.constant 0 : index
    %46 = vector.load %arg12[%c0_86, %c0_87, %c0_88] : memref<16x16x32xf32, #tpu.memory_space<vmem>>, vector<16x15x32xf32>
    %c0_89 = arith.constant 0 : index
    %c1_90 = arith.constant 1 : index
    %c96_91 = arith.constant 96 : index
    %47 = vector.load %arg11[%c0_89, %c1_90, %c96_91] : memref<16x16x384xf32, #tpu.memory_space<vmem>>, vector<16x15x32xf32>
    tpu.vector_store %arg11[%c0_89, %c1_90, %c96_91], %46 {strides = array<i32>} : memref<16x16x384xf32, #tpu.memory_space<vmem>>, vector<16x15x32xf32>,
    %c0_92 = arith.constant 0 : index
    %c0_93 = arith.constant 0 : index
    %c0_94 = arith.constant 0 : index
    %48 = vector.load %arg12[%c0_92, %c0_93, %c0_94] : memref<16x16x32xf32, #tpu.memory_space<vmem>>, vector<16x16x32xf32>
    %c0_95 = arith.constant 0 : index
    %c0_96 = arith.constant 0 : index
    %c128_97 = arith.constant 128 : index
    %49 = vector.load %arg11[%c0_95, %c0_96, %c128_97] : memref<16x16x384xf32, #tpu.memory_space<vmem>>, vector<16x16x32xf32>
    tpu.vector_store %arg11[%c0_95, %c0_96, %c128_97], %48 {strides = array<i32>} : memref<16x16x384xf32, #tpu.memory_space<vmem>>, vector<16x16x32xf32>,
    %c0_98 = arith.constant 0 : index
    %c1_99 = arith.constant 1 : index
    %c0_100 = arith.constant 0 : index
    %50 = vector.load %arg12[%c0_98, %c1_99, %c0_100] : memref<16x16x32xf32, #tpu.memory_space<vmem>>, vector<16x15x32xf32>
    %c0_101 = arith.constant 0 : index
    %c0_102 = arith.constant 0 : index
    %c160_103 = arith.constant 160 : index
    %51 = vector.load %arg11[%c0_101, %c0_102, %c160_103] : memref<16x16x384xf32, #tpu.memory_space<vmem>>, vector<16x15x32xf32>
    tpu.vector_store %arg11[%c0_101, %c0_102, %c160_103], %50 {strides = array<i32>} : memref<16x16x384xf32, #tpu.memory_space<vmem>>, vector<16x15x32xf32>,
    %c1_104 = arith.constant 1 : index
    %c0_105 = arith.constant 0 : index
    %c0_106 = arith.constant 0 : index
    %52 = vector.load %arg12[%c1_104, %c0_105, %c0_106] : memref<16x16x32xf32, #tpu.memory_space<vmem>>, vector<15x15x32xf32>
    %c0_107 = arith.constant 0 : index
    %c1_108 = arith.constant 1 : index
    %c192_109 = arith.constant 192 : index
    %53 = vector.load %arg11[%c0_107, %c1_108, %c192_109] : memref<16x16x384xf32, #tpu.memory_space<vmem>>, vector<15x15x32xf32>
    tpu.vector_store %arg11[%c0_107, %c1_108, %c192_109], %52 {strides = array<i32>} : memref<16x16x384xf32, #tpu.memory_space<vmem>>, vector<15x15x32xf32>,
    %c1_110 = arith.constant 1 : index
    %c0_111 = arith.constant 0 : index
    %c0_112 = arith.constant 0 : index
    %54 = vector.load %arg12[%c1_110, %c0_111, %c0_112] : memref<16x16x32xf32, #tpu.memory_space<vmem>>, vector<15x16x32xf32>
    %c0_113 = arith.constant 0 : index
    %c0_114 = arith.constant 0 : index
    %c224_115 = arith.constant 224 : index
    %55 = vector.load %arg11[%c0_113, %c0_114, %c224_115] : memref<16x16x384xf32, #tpu.memory_space<vmem>>, vector<15x16x32xf32>
    tpu.vector_store %arg11[%c0_113, %c0_114, %c224_115], %54 {strides = array<i32>} : memref<16x16x384xf32, #tpu.memory_space<vmem>>, vector<15x16x32xf32>,
    %c1_116 = arith.constant 1 : index
    %c1_117 = arith.constant 1 : index
    %c0_118 = arith.constant 0 : index
    %56 = vector.load %arg12[%c1_116, %c1_117, %c0_118] : memref<16x16x32xf32, #tpu.memory_space<vmem>>, vector<15x15x32xf32>
    %c0_119 = arith.constant 0 : index
    %c0_120 = arith.constant 0 : index
    %c256_121 = arith.constant 256 : index
    %57 = vector.load %arg11[%c0_119, %c0_120, %c256_121] : memref<16x16x384xf32, #tpu.memory_space<vmem>>, vector<15x15x32xf32>
    tpu.vector_store %arg11[%c0_119, %c0_120, %c256_121], %56 {strides = array<i32>} : memref<16x16x384xf32, #tpu.memory_space<vmem>>, vector<15x15x32xf32>,
    %c0_122 = arith.constant 0 : index
    %c0_123 = arith.constant 0 : index
    %c0_124 = arith.constant 0 : index
    %58 = vector.load %arg11[%c0_122, %c0_123, %c0_124] : memref<16x16x384xf32, #tpu.memory_space<vmem>>, vector<16x16x384xf32>
    %59 = vector.shape_cast %58 : vector<16x16x384xf32> to vector<256x384xf32>
    %c0_125 = arith.constant 0 : index
    %c0_126 = arith.constant 0 : index
    %60 = vector.load %arg4[%c0_125, %c0_126] : memref<384x32xf32, #tpu.memory_space<vmem>>, vector<384x32xf32>
    %cst_127 = arith.constant dense<0.000000e+00> : vector<256x32xf32>
    %61 = tpu.matmul %59, %60, %cst_127 {dimension_numbers = #tpu.dot_dimension_numbers<[1], [0], [0], [1], [0, 0, 1, 1], [], []>} : vector<256x384xf32>, vector<384x32xf32>, vector<256x32xf32> -> vector<256x32xf32>
    %c0_128 = arith.constant 0 : index
    %c0_129 = arith.constant 0 : index
    %62 = vector.load %arg5[%c0_128, %c0_129] : memref<1x32xf32, #tpu.memory_space<vmem>>, vector<1x32xf32>
    %63 = vector.broadcast %62 : vector<1x32xf32> to vector<256x32xf32>
    %64 = arith.addf %61, %63 : vector<256x32xf32>
    %cst_130 = arith.constant dense<0.000000e+00> : vector<32xf32>
    %65 = vector.multi_reduction <add>, %64, %cst_130 [0] : vector<256x32xf32> to vector<32xf32>
    %66 = vector.shape_cast %65 : vector<32xf32> to vector<1x32xf32>
    %cst_131 = arith.constant 3.906250e-03 : f32
    %67 = vector.broadcast %cst_131 : f32 to vector<1x32xf32>
    %68 = arith.mulf %66, %67 : vector<1x32xf32>
    %c0_132 = arith.constant 0 : index
    %c0_133 = arith.constant 0 : index
    %69 = vector.load %arg6[%c0_132, %c0_133] : memref<2x32xf32, #tpu.memory_space<vmem>>, vector<2x32xf32>
    %70 = vector.broadcast %68 : vector<1x32xf32> to vector<2x32xf32>
    %71 = arith.mulf %69, %70 : vector<2x32xf32>
    %cst_134 = arith.constant dense<0.000000e+00> : vector<2xf32>
    %72 = vector.multi_reduction <add>, %71, %cst_134 [1] : vector<2x32xf32> to vector<2xf32>
    %73 = vector.shape_cast %72 : vector<2xf32> to vector<2x1xf32>
    %c0_135 = arith.constant 0 : index
    %c0_136 = arith.constant 0 : index
    %74 = vector.load %arg7[%c0_135, %c0_136] : memref<2x1xf32, #tpu.memory_space<vmem>>, vector<2x1xf32>
    %75 = arith.addf %73, %74 : vector<2x1xf32>
    %cst_137 = arith.constant 0.000000e+00 : f32
    %76 = vector.broadcast %cst_137 : f32 to vector<2x1xf32>
    %77 = arith.maximumf %75, %76 : vector<2x1xf32>
    %c0_138 = arith.constant 0 : index
    %c0_139 = arith.constant 0 : index
    %78 = vector.load %arg8[%c0_138, %c0_139] : memref<2x32xf32, #tpu.memory_space<vmem>>, vector<2x32xf32>
    %79 = vector.broadcast %77 : vector<2x1xf32> to vector<2x32xf32>
    %80 = arith.mulf %78, %79 : vector<2x32xf32>
    %cst_140 = arith.constant dense<0.000000e+00> : vector<32xf32>
    %81 = vector.multi_reduction <add>, %80, %cst_140 [0] : vector<2x32xf32> to vector<32xf32>
    %82 = vector.shape_cast %81 : vector<32xf32> to vector<1x32xf32>
    %c0_141 = arith.constant 0 : index
    %c0_142 = arith.constant 0 : index
    %83 = vector.load %arg9[%c0_141, %c0_142] : memref<1x32xf32, #tpu.memory_space<vmem>>, vector<1x32xf32>
    %84 = arith.addf %82, %83 : vector<1x32xf32>
    %85 = arith.negf %84 : vector<1x32xf32>
    %86 = math.exp %85 : vector<1x32xf32>
    %cst_143 = arith.constant 1.000000e+00 : f32
    %87 = vector.broadcast %cst_143 : f32 to vector<1x32xf32>
    %88 = arith.addf %87, %86 : vector<1x32xf32>
    %89 = arith.divf %87, %88 : vector<1x32xf32>
    %c0_144 = arith.constant 0 : index
    %c0_145 = arith.constant 0 : index
    %c0_146 = arith.constant 0 : index
    %c0_147 = arith.constant 0 : index
    %90 = vector.load %arg1[%c0_144, %c0_145, %c0_146, %c0_147] : memref<1x16x16x32xf32, #tpu.memory_space<vmem>>, vector<1x16x16x32xf32>
    %91 = vector.shape_cast %90 : vector<1x16x16x32xf32> to vector<16x16x32xf32>
    %92 = vector.shape_cast %91 : vector<16x16x32xf32> to vector<256x32xf32>
    %93 = vector.broadcast %89 : vector<1x32xf32> to vector<256x32xf32>
    %94 = arith.mulf %64, %93 : vector<256x32xf32>
    %95 = arith.addf %94, %92 : vector<256x32xf32>
    %96 = vector.shape_cast %95 : vector<256x32xf32> to vector<16x16x32xf32>
    %c0_148 = arith.constant 0 : index
    %c0_149 = arith.constant 0 : index
    %c0_150 = arith.constant 0 : index
    %c0_151 = arith.constant 0 : index
    %97 = vector.load %arg10[%c0_148, %c0_149, %c0_150, %c0_151] : memref<1x16x16x32xf32, #tpu.memory_space<vmem>>, vector<1x16x16x32xf32>
    %98 = vector.shape_cast %97 : vector<1x16x16x32xf32> to vector<16x16x32xf32>
    %99 = vector.shape_cast %96 : vector<16x16x32xf32> to vector<1x16x16x32xf32>
    tpu.vector_store %arg10[%c0_148, %c0_149, %c0_150, %c0_151], %99 {strides = array<i32>} : memref<1x16x16x32xf32, #tpu.memory_space<vmem>>, vector<1x16x16x32xf32>,
    return
  }
  func.func @transform_0(%arg0: i32) -> (i32, i32, i32, i32) {
    %c0_i32 = arith.constant 0 : i32
    %c0_i32_0 = arith.constant 0 : i32
    %c0_i32_1 = arith.constant 0 : i32
    %c0_i32_2 = arith.constant 0 : i32
    return %arg0, %c0_i32, %c0_i32_0, %c0_i32_1 : i32, i32, i32, i32
  }
  func.func @transform_1(%arg0: i32) -> (i32, i32) {
    %c0_i32 = arith.constant 0 : i32
    %c0_i32_0 = arith.constant 0 : i32
    %c0_i32_1 = arith.constant 0 : i32
    return %c0_i32, %c0_i32_0 : i32, i32
  }
  func.func @transform_2(%arg0: i32) -> (i32, i32) {
    %c0_i32 = arith.constant 0 : i32
    %c0_i32_0 = arith.constant 0 : i32
    %c0_i32_1 = arith.constant 0 : i32
    return %c0_i32, %c0_i32_0 : i32, i32
  }
  func.func @transform_3(%arg0: i32) -> (i32, i32) {
    %c0_i32 = arith.constant 0 : i32
    %c0_i32_0 = arith.constant 0 : i32
    %c0_i32_1 = arith.constant 0 : i32
    return %c0_i32, %c0_i32_0 : i32, i32
  }
  func.func @transform_4(%arg0: i32) -> (i32, i32) {
    %c0_i32 = arith.constant 0 : i32
    %c0_i32_0 = arith.constant 0 : i32
    %c0_i32_1 = arith.constant 0 : i32
    return %c0_i32, %c0_i32_0 : i32, i32
  }
  func.func @transform_5(%arg0: i32) -> (i32, i32) {
    %c0_i32 = arith.constant 0 : i32
    %c0_i32_0 = arith.constant 0 : i32
    %c0_i32_1 = arith.constant 0 : i32
    return %c0_i32, %c0_i32_0 : i32, i32
  }
  func.func @transform_6(%arg0: i32) -> (i32, i32) {
    %c0_i32 = arith.constant 0 : i32
    %c0_i32_0 = arith.constant 0 : i32
    %c0_i32_1 = arith.constant 0 : i32
    return %c0_i32, %c0_i32_0 : i32, i32
  }
  func.func @transform_7(%arg0: i32) -> (i32, i32) {
    %c0_i32 = arith.constant 0 : i32
    %c0_i32_0 = arith.constant 0 : i32
    %c0_i32_1 = arith.constant 0 : i32
    return %c0_i32, %c0_i32_0 : i32, i32
  }
  func.func @transform_8(%arg0: i32) -> (i32, i32) {
    %c0_i32 = arith.constant 0 : i32
    %c0_i32_0 = arith.constant 0 : i32
    %c0_i32_1 = arith.constant 0 : i32
    return %c0_i32, %c0_i32_0 : i32, i32
  }
  func.func @transform_9(%arg0: i32) -> (i32, i32, i32, i32) {
    %c0_i32 = arith.constant 0 : i32
    %c0_i32_0 = arith.constant 0 : i32
    %c0_i32_1 = arith.constant 0 : i32
    %c0_i32_2 = arith.constant 0 : i32
    return %arg0, %c0_i32, %c0_i32_0, %c0_i32_1 : i32, i32, i32, i32
  }
}

</mosaic_0001>

<bundles_post_ra>
// kernel: rcab_pallas.1
= control target key start
LH: loop header
LB: loop body
LE: loop exit
PB: predicated region body
PF: predicated region fallthrough
CT: control target
= control target key end

     0   :  { %14 = vsyncpa [#allocation5], 0  ;;  %s8785_s0 = inlined_call_operand.vmem [shape: f32[2,16,16,32], index: 0, kind: input, shape index: {}]   ;;  %s8786_s1 = inlined_call_operand.vmem [shape: f32[384,32], index: 1, kind: input, shape index: {}]   ;;  %s8787_s2 = inlined_call_operand.vmem [shape: f32[1,32], index: 2, kind: input, shape index: {}]   ;;  %s8788_s3 = inlined_call_operand.vmem [shape: f32[384,32], index: 3, kind: input, shape index: {}]   ;;  %s8789_s4 = inlined_call_operand.vmem [shape: f32[1,32], index: 4, kind: input, shape index: {}]   ;;  %s8790_s5 = inlined_call_operand.vmem [shape: f32[2,32], index: 5, kind: input, shape index: {}]   ;;  %s8791_s6 = inlined_call_operand.vmem [shape: f32[2,1], index: 6, kind: input, shape index: {}]   ;;  %s8792_s7 = inlined_call_operand.vmem [shape: f32[2,32], index: 7, kind: input, shape index: {}]   ;;  %s8793_s8 = inlined_call_operand.vmem [shape: f32[1,32], index: 8, kind: input, shape index: {}]   ;;  %s8794_s9 = inlined_call_operand.hbm [shape: f32[2,16,16,32], index: 9, kind: output, shape index: {}]  }
   0x1   :  { %16 = vsyncpa [#allocation5 + $0x1], 0  ;;  %s5707_s30 = smov 0   ;;  %s5709_s10 = smov 0  }
   0x2   :  { %s5711_s11 = smov 0   ;;  %s5713_s12 = smov 0  }
   0x3 LB: > { %s5728_s13 = sadd.s32 4294967295, %s5646_s12   ;;  %s4988_s14 = sadd.s32 4294967294, %s5646_s12   ;;  %s5646_s12 = sphi %s5713_s12, %s8808_s12   ;;  %s5642_s11 = sphi %s5711_s11, %s8807_s11   ;;  %s5638_s10 = sphi %s5709_s10, %s8806_s10   ;;  %s5634_s30 = sphi %s5707_s30, %s8805_s30  }
   0x4   : > { %s5732_s15 = sadd.s32 1, %s5646_s12   ;;  %s223_s16 = sadd.s32 1, %s5642_s11 }
   0x5   : > { %s220_s17 = ssub.s32 %s5646_s12, %s5732_s15  ;;  %p233_p0 = scmp.ne.s32.totalorder %s5642_s11, %s5638_s10 }
   0x6   : > { %p221_p1 = scmp.eq.s32.totalorder %s220_s17, 0  ;;  %p234_p2 = scmp.eq.s32.totalorder %s5728_s13, 1 }
   0x7   : > { %p239_p3 = scmp.ne.s32.totalorder %s5638_s10, %s5634_s30  ;;  %p240_p4 = scmp.eq.s32.totalorder %s4988_s14, 1 }
   0x8   : > { %s5743_s18 = scalar_select %p221_p1, %s5642_s11, %s223_s16  }
   0x9   : > { %p5745_p5 = por %p234_p2, %p233_p0  ;;  %p5749_p6 = por %p240_p4, %p239_p3 }
   0xa   : > { %p4991_p7 = scmp.ge.s32.totalorder %s5646_s12, 1  ;;  %p290_p8 = scmp.lt.s32.totalorder %s5646_s12, 3 }
   0xc   : > { %p291_p9 = pnand %p4991_p7, %p290_p8 }
   0xe   : > { %294 = sbr.rel (%p291_p9) target bundleno = 1523 (0x5f3), region = 56 }
  0x15   : > { %p326_p10 = scmp.lt.s32.totalorder %s5728_s13, 1  ;;  %v5759_v0 = vld [vmem:[%s8786_s1] sm:$0xff]  ;;  %v5764_v1 = vld [vmem:[%s8786_s1 + $0x8] sm:$0xff]  ;;  %v5648_v2 = vmov 0.0|0.0   ;;  %v5772_v4 = vld [vmem:[%s8786_s1 + $0x10] sm:$0xff]  ;;  %v5649_v6 = vmov 0.0  }
  0x16   : > { %5351 = vmatprep.subr.bf16.mxu0 %v5648_v2  ;;  %v5352_v3 = vpack.c.bf16 %v5764_v1, %v5759_v0  ;;  %v5777_v5 = vld [vmem:[%s8786_s1 + $0x18] sm:$0xff]  ;;  %332 = vst [vmem:[#allocation2 + $0x8] sm:$0xff] %v5649_v6  ;;  %331 = vst [vmem:[#allocation2] sm:$0xff] %v5649_v6  ;;  %v2026_v8 = vld [vmem:[%s8786_s1 + $0x20] sm:$0xff]  ;;  %vm566_vm0 = vcmask 261120   ;;  %s5650_s26 = smov 96  }
  0x17   : > { %s5780_s29 = scalar_select %p326_p10, %s5728_s13, 1  ;;  %333 = vst [vmem:[#allocation2 + $0x10] sm:$0xff] %v5649_v6  ;;  %334 = vst [vmem:[#allocation2 + $0x18] sm:$0xff] %v5649_v6  ;;  %v5355_v7 = vpack.c.bf16 %v5777_v5, %v5772_v4  ;;  %v2027_v9 = vld [vmem:[%s8786_s1 + $0x28] sm:$0xff]  ;;  %v2028_v15 = vld [vmem:[%s8786_s1 + $0x30] sm:$0xff]  ;;  %vm487_vm1 = vcmask 1040384  }
  0x18   : > { %335 = vst [vmem:[#allocation2 + $0x20] sm:$0xff] %v5649_v6  ;;  %336 = vst [vmem:[#allocation2 + $0x28] sm:$0xff] %v5649_v6  ;;  %5353 = vmatpush1.bf16.msra.mxu0 %v5352_v3  ;;  %s5651_s27 = smov 32   ;;  %v5358_v21 = vpack.c.bf16 %v2027_v9, %v2026_v8  ;;  %v2029_v22 = vld [vmem:[%s8786_s1 + $0x38] sm:$0xff]  ;;  %vm564_vm2 = vcmask 261121   ;;  %v2030_v32 = vld [vmem:[%s8786_s1 + $0x40] sm:$0xff] }
  0x19   : > { %337 = vst [vmem:[#allocation2 + $0x30] sm:$0xff] %v5649_v6  ;;  %338 = vst [vmem:[#allocation2 + $0x38] sm:$0xff] %v5649_v6  ;;  %s5093_s14 = sshll.u32 %s5780_s29, 8  ;;  %5354 = vmatprep.subr.bf16.mxu0 %v5648_v2  ;;  %v5361_v30 = vpack.c.bf16 %v2029_v22, %v2028_v15  ;;  %v2031_v33 = vld [vmem:[%s8786_s1 + $0x48] sm:$0xff]  ;;  %s5652_s25 = smov 64   ;;  %v2032_v37 = vld [vmem:[%s8786_s1 + $0x50] sm:$0xff] }
  0x1a   : > { %339 = vst [vmem:[#allocation2 + $0x40] sm:$0xff] %v5649_v6  ;;  %340 = vst [vmem:[#allocation2 + $0x48] sm:$0xff] %v5649_v6  ;;  %s5887_s21 = scalar_lea.vmem %s8785_s0, %s5093_s14  ;;  %v5364_v35 = vpack.c.bf16 %v2031_v33, %v2030_v32  ;;  %v2033_v38 = vld [vmem:[%s8786_s1 + $0x58] sm:$0xff]  ;;  %v2054_v39 = vld [vmem:[%s8786_s1 + $0x100] sm:$0xff]  ;;  %vm1896_vm3 = vcmask 260096   ;;  %vm746_vm4 = vcmask 523520  }
  0x1b   : > { %341 = vst [vmem:[#allocation2 + $0x50] sm:$0xff] %v5649_v6  ;;  %342 = vst [vmem:[#allocation2 + $0x58] sm:$0xff] %v5649_v6  ;;  %v5896_v10 = vld [vmem:[%s5887_s21 + $0x10] sm:$0xff]  ;;  %v5899_v11 = vld [vmem:[%s5887_s21 + $0x1] sm:$0xff]  ;;  %v5367_v43 = vpack.c.bf16 %v2033_v38, %v2032_v37  ;;  %vm1426_vm5 = vcmask 522496   ;;  %vm1167_vm6 = vcmask 1048321  }
  0x1c   : > { %343 = vst [vmem:[#allocation2 + $0x60] sm:$0xff] %v5649_v6  ;;  %344 = vst [vmem:[#allocation2 + $0x68] sm:$0xff] %v5649_v6  ;;  %v1266_v12 = vld [vmem:[%s5887_s21 + $0x9] sm:$0x7f]  ;;  %1745 = vrot.lane.b32.xlu1 %v5896_v10, %s5650_s26  ;;  %1329 = vrot.lane.b32.xlu0 %v5899_v11, %s5651_s27  ;;  %v5907_v13 = vld [vmem:[%s5887_s21] sm:$0xff]  ;;  %v5919_v17 = vrot.slane %v5896_v10, 7 }
  0x1d   : > { %345 = vst [vmem:[#allocation2 + $0x70] sm:$0xff] %v5649_v6  ;;  %346 = vst [vmem:[#allocation2 + $0x78] sm:$0xff] %v5649_v6  ;;  %v4996_v14 = vld [vmem:[%s5887_s21 + $0x18] sm:$0x7f]  ;;  %v5916_v16 = vrot.slane %v5907_v13, 7  ;;  %5356 = vmatpush1.bf16.msra.mxu0 %v5355_v7  ;;  %v5934_v24 = vld [vmem:[%s5887_s21 + $0x20] sm:$0xff] }
  0x1e   : > { %347 = vst [vmem:[#allocation2 + $0x80] sm:$0xff] %v5649_v6  ;;  %348 = vst [vmem:[#allocation2 + $0x88] sm:$0xff] %v5649_v6  ;;  %v1520_v18 = vrot.slane %v4996_v14, 7  ;;  %v5922_v19 = vld [vmem:[%s5887_s21 + $0x18] sm:$0xff]  ;;  %v960_v23 = vld [vmem:[%s5887_s21 + $0x8] sm:$0x7f]  ;;  %5357 = vmatprep.subr.bf16.mxu0 %v5648_v2 }
  0x1f   : > { %349 = vst [vmem:[#allocation2 + $0x90] sm:$0xff] %v5649_v6  ;;  %350 = vst [vmem:[#allocation2 + $0x98] sm:$0xff] %v5649_v6  ;;  %v5925_v20 = vld [vmem:[%s5887_s21 + $0x11] sm:$0xff]  ;;  %v5937_v25 = vld [vmem:[%s5887_s21 + $0x8] sm:$0xff]  ;;  %v1024_v29 = vrot.slane %v960_v23, 7  ;;  %v6027_v51 = vrot.slane %v5934_v24, 7 }
  0x20   : > { %351 = vst [vmem:[#allocation2 + $0xa0] sm:$0xff] %v5649_v6  ;;  %352 = vst [vmem:[#allocation2 + $0xa8] sm:$0xff] %v5649_v6  ;;  %v5945_v26 = vld [vmem:[%s5887_s21 + $0x28] sm:$0xff]  ;;  %1331 = vrot.lane.b32.xlu0 %v1266_v12, %s5651_s27  ;;  %1071 = vrot.lane.b32.xlu1 %v5916_v16, %s5650_s26  ;;  %v1521_v28 = vsel %vm487_vm1, %v5919_v17, %v1520_v18  ;;  %v5966_v31 = vld [vmem:[%s5887_s21 + $0x31] sm:$0xff]  ;;  %vm1654_vm7 = vcmask 785921   ;;  %vm927_vm8 = vcmask 785920  }
  0x21   : > { %353 = vst [vmem:[#allocation2 + $0xb0] sm:$0xff] %v5649_v6  ;;  %354 = vst [vmem:[#allocation2 + $0xb8] sm:$0xff] %v5649_v6  ;;  %v5957_v27 = vld [vmem:[%s5887_s21 + $0x21] sm:$0xff]  ;;  %5359 = vmatpush1.bf16.msra.mxu0 %v5358_v21  ;;  %v1025_v34 = vsel %vm487_vm1, %v5916_v16, %v1024_v29  ;;  %v2056_v44 = vld [vmem:[%s8786_s1 + $0x110] sm:$0xff]  ;;  %vm1169_vm9 = vcmask 1048320   ;;  %vm929_vm10 = vcmask 784896  }
  0x22   : > { %355 = vst [vmem:[#allocation2 + $0xc0] sm:$0xff] %v5649_v6  ;;  %356 = vst [vmem:[#allocation2 + $0xc8] sm:$0xff] %v5649_v6  ;;  %5360 = vmatprep.subr.bf16.mxu0 %v5648_v2  ;;  %v5983_v36 = vld [vmem:[%s5887_s21 + $0x41] sm:$0xff]  ;;  %v2057_v45 = vld [vmem:[%s8786_s1 + $0x118] sm:$0xff]  ;;  %vm4751_vm11 = vcmask 254976   ;;  %s323_s29 = sand.u32 1, %s5638_s10  }
  0x23   : > { %357 = vst [vmem:[#allocation2 + $0xd0] sm:$0xff] %v5649_v6  ;;  %358 = vst [vmem:[#allocation2 + $0xd8] sm:$0xff] %v5649_v6  ;;  %v2055_v40 = vld [vmem:[%s8786_s1 + $0x108] sm:$0xff]  ;;  %v2034_v46 = vld [vmem:[%s8786_s1 + $0x60] sm:$0xff]  ;;  %v5403_v48 = vpack.c.bf16 %v2057_v45, %v2056_v44  ;;  %s8564_s14 = sshll.u32 %s323_s29, 8  ;;  %s5654_s23 = smov [#allocation4]  }
  0x24   : > { %359 = vst [vmem:[#allocation2 + $0xe0] sm:$0xff] %v5649_v6  ;;  %360 = vst [vmem:[#allocation2 + $0xe8] sm:$0xff] %v5649_v6  ;;  %1564 = vrot.lane.b32.xlu0 %v5919_v17, %s5652_s25  ;;  %1566 = vrot.lane.b32.xlu1 %v1521_v28, %s5652_s25  ;;  %v5399_v41 = vpack.c.bf16 %v2055_v40, %v2054_v39  ;;  %v2035_v47 = vld [vmem:[%s8786_s1 + $0x68] sm:$0xff]  ;;  %v2058_v49 = vld [vmem:[%s8786_s1 + $0x120] sm:$0xff]  ;;  %s8637_s16 = scalar_lea.vmem [#allocation4], %s8564_s14  ;;  %s5588_s24 = sshll.u32 %s5654_s23, 4  ;;  %s5589_s24 = int_to_ptr.vmem [resolvable:$false] %s5588_s24 }
  0x25   : > { %361 = vst [vmem:[#allocation2 + $0xf0] sm:$0xff] %v5649_v6  ;;  %362 = vst [vmem:[#allocation2 + $0xf8] sm:$0xff] %v5649_v6  ;;  %5362 = vmatpush1.bf16.msra.mxu0 %v5361_v30  ;;  %v2059_v50 = vld [vmem:[%s8786_s1 + $0x128] sm:$0xff]  ;;  %v5370_v52 = vpack.c.bf16 %v2035_v47, %v2034_v46  ;;  %v2036_v53 = vld [vmem:[%s8786_s1 + $0x70] sm:$0xff]  ;;  %s5590_s28 = scalar_lea.vmem %s5589_s24, 8192 }
  0x26   : > { %363 = vst [vmem:[#allocation2 + $0x100] sm:$0xff] %v5649_v6  ;;  %364 = vst [vmem:[#allocation2 + $0x108] sm:$0xff] %v5649_v6  ;;  %5363 = vmatprep.subr.bf16.mxu0 %v5648_v2  ;;  %5400 = vmatprep.subr.bf16.mxu1 %v5399_v41  ;;  %v2037_v54 = vld [vmem:[%s8786_s1 + $0x78] sm:$0xff]  ;;  %v5407_v55 = vpack.c.bf16 %v2059_v50, %v2058_v49  ;;  %v2060_v56 = vld [vmem:[%s8786_s1 + $0x130] sm:$0xff] }
  0x27   : > { %365 = vst [vmem:[#allocation2 + $0x110] sm:$0xff] %v5649_v6  ;;  %366 = vst [vmem:[#allocation2 + $0x118] sm:$0xff] %v5649_v6  ;;  %5402 = vmatpush3.bf16.msra.mxu1 %v5399_v41  ;;  %v2061_v57 = vld [vmem:[%s8786_s1 + $0x138] sm:$0xff]  ;;  %v6043_v58 = vld [vmem:[%s5887_s21 + $0x60] sm:$0xff]  ;;  %v5373_v60 = vpack.c.bf16 %v2037_v54, %v2036_v53 }
  0x28   : > { %367 = vst [vmem:[#allocation2 + $0x120] sm:$0xff] %v5649_v6  ;;  %368 = vst [vmem:[#allocation2 + $0x128] sm:$0xff] %v5649_v6  ;;  %1747 = vrot.lane.b32.xlu0 %v5922_v19, %s5650_s26  ;;  %1073 = vrot.lane.b32.xlu1 %v1025_v34, %s5650_s26  ;;  %v4998_v59 = vld [vmem:[%s5887_s21 + $0x28] sm:$0x7f]  ;;  %v2038_v61 = vld [vmem:[%s8786_s1 + $0x80] sm:$0xff]  ;;  %v5411_v62 = vpack.c.bf16 %v2061_v57, %v2060_v56 }
  0x29   : > { %369 = vst [vmem:[#allocation2 + $0x130] sm:$0xff] %v5649_v6  ;;  %370 = vst [vmem:[#allocation2 + $0x138] sm:$0xff] %v5649_v6  ;;  %5365 = vmatpush1.bf16.msra.mxu0 %v5364_v35  ;;  %5404 = vmatprep.subr.bf16.mxu1 %v5403_v48  ;;  %v2039_v63 = vld [vmem:[%s8786_s1 + $0x88] sm:$0xff]  ;;  %v2062_v0 = vld [vmem:[%s8786_s1 + $0x140] sm:$0xff]  ;;  %v1523_v7 = vrot.slane %v4998_v59, 7 }
  0x2a   : > { %371 = vst [vmem:[#allocation2 + $0x140] sm:$0xff] %v5649_v6  ;;  %372 = vst [vmem:[#allocation2 + $0x148] sm:$0xff] %v5649_v6  ;;  %5366 = vmatprep.subr.bf16.mxu0 %v5648_v2  ;;  %v2063_v1 = vld [vmem:[%s8786_s1 + $0x148] sm:$0xff]  ;;  %v1268_v3 = vld [vmem:[%s5887_s21 + $0x19] sm:$0x7f]  ;;  %v5376_v8 = vpack.c.bf16 %v2039_v63, %v2038_v61 }
  0x2b   : > { %373 = vst [vmem:[#allocation2 + $0x150] sm:$0xff] %v5649_v6  ;;  %374 = vst [vmem:[#allocation2 + $0x158] sm:$0xff] %v5649_v6  ;;  %5406 = vmatpush3.bf16.msra.mxu1 %v5403_v48  ;;  %v962_v4 = vld [vmem:[%s5887_s21 + $0x18] sm:$0x7f]  ;;  %v2040_v5 = vld [vmem:[%s8786_s1 + $0x90] sm:$0xff]  ;;  %v5415_v9 = vpack.c.bf16 %v2063_v1, %v2062_v0  ;;  %v1524_v30 = vsel %vm487_vm1, %v6027_v51, %v1523_v7 }
  0x2c   : > { %375 = vst [vmem:[#allocation2 + $0x160] sm:$0xff] %v5649_v6  ;;  %376 = vst [vmem:[#allocation2 + $0x168] sm:$0xff] %v5649_v6  ;;  %1333 = vrot.lane.b32.xlu0 %v5925_v20, %s5651_s27  ;;  %656 = vrot.lane.b32.xlu1 %v5907_v13, %s5651_s27  ;;  %v2065_v12 = vld [vmem:[%s8786_s1 + $0x158] sm:$0xff]  ;;  %v6089_v15 = vld [vmem:[%s5887_s21 + $0x61] sm:$0xff]  ;;  %v1027_v33 = vrot.slane %v962_v4, 7 }
  0x2d   : > { %377 = vst [vmem:[#allocation2 + $0x170] sm:$0xff] %v5649_v6  ;;  %378 = vst [vmem:[#allocation2 + $0x178] sm:$0xff] %v5649_v6  ;;  %5368 = vmatpush1.bf16.msra.mxu0 %v5367_v43  ;;  %5408 = vmatprep.subr.bf16.mxu1 %v5407_v55  ;;  %v5056_v14 = vld [vmem:[%s5887_s21 + $0x19] sm:$0x7f]  ;;  %v6092_v18 = vld [vmem:[%s5887_s21 + $0x70] sm:$0xff] }
  0x2e   : > { %379 = vst [vmem:[#allocation2 + $0x180] sm:$0xff] %v5649_v6  ;;  %380 = vst [vmem:[#allocation2 + $0x188] sm:$0xff] %v5649_v6  ;;  %5369 = vmatprep.subr.bf16.mxu0 %v5648_v2  ;;  %v428_v21 = vld [vmem:[%s5887_s21 + $0x8] sm:$0x7f]  ;;  %v429_v22 = vld [vmem:[%s5887_s21 + $0x10] sm:$0xff] }
  0x2f   : > { %381 = vst [vmem:[#allocation2 + $0x190] sm:$0xff] %v5649_v6  ;;  %382 = vst [vmem:[#allocation2 + $0x198] sm:$0xff] %v5649_v6  ;;  %5410 = vmatpush3.bf16.msra.mxu1 %v5407_v55  ;;  %v489_v23 = vrot.slane %v428_v21, 7  ;;  %v5058_v28 = vld [vmem:[%s5887_s21 + $0x29] sm:$0x7f]  ;;  %v491_v29 = vrot.slane %v429_v22, 7 }
  0x30   : > { %383 = vst [vmem:[#allocation2 + $0x1a0] sm:$0xff] %v5649_v6  ;;  %384 = vst [vmem:[#allocation2 + $0x1a8] sm:$0xff] %v5649_v6  ;;  %1568 = vrot.lane.b32.xlu0 %v6027_v51, %s5652_s25  ;;  %837 = vrot.lane.b32.xlu1 %v5899_v11, %s5652_s25  ;;  %v2064_v11 = vld [vmem:[%s8786_s1 + $0x150] sm:$0xff]  ;;  %v778_v32 = vld [vmem:[%s5887_s21 + $0x9] sm:$0x7f] }
  0x31   : > { %385 = vst [vmem:[#allocation2 + $0x1b0] sm:$0xff] %v5649_v6  ;;  %386 = vst [vmem:[#allocation2 + $0x1b8] sm:$0xff] %v5649_v6  ;;  %5371 = vmatpush1.bf16.msra.mxu0 %v5370_v52  ;;  %5412 = vmatprep.subr.bf16.mxu1 %v5411_v62  ;;  %v2042_v35 = vld [vmem:[%s8786_s1 + $0xa0] sm:$0xff]  ;;  %v5419_v37 = vpack.c.bf16 %v2065_v12, %v2064_v11  ;;  %v2043_v38 = vld [vmem:[%s8786_s1 + $0xa8] sm:$0xff]  ;;  %v490_v41 = vsel %vm487_vm1, %v5916_v16, %v489_v23 }
  0x32   : > { %387 = vst [vmem:[#allocation2 + $0x1c0] sm:$0xff] %v5649_v6  ;;  %388 = vst [vmem:[#allocation2 + $0x1c8] sm:$0xff] %v5649_v6  ;;  %5372 = vmatprep.subr.bf16.mxu0 %v5648_v2  ;;  %v2066_v39 = vld [vmem:[%s8786_s1 + $0x160] sm:$0xff]  ;;  %v2067_v40 = vld [vmem:[%s8786_s1 + $0x168] sm:$0xff]  ;;  %v5382_v43 = vpack.c.bf16 %v2043_v38, %v2042_v35 }
  0x33   : > { %389 = vst [vmem:[#allocation2 + $0x1d0] sm:$0xff] %v5649_v6  ;;  %390 = vst [vmem:[#allocation2 + $0x1d8] sm:$0xff] %v5649_v6  ;;  %5414 = vmatpush3.bf16.msra.mxu1 %v5411_v62  ;;  %v2044_v44 = vld [vmem:[%s8786_s1 + $0xb0] sm:$0xff]  ;;  %v2045_v45 = vld [vmem:[%s8786_s1 + $0xb8] sm:$0xff]  ;;  %v5423_v46 = vpack.c.bf16 %v2067_v40, %v2066_v39 }
  0x34   : > { %391 = vst [vmem:[#allocation2 + $0x1e0] sm:$0xff] %v5649_v6  ;;  %392 = vst [vmem:[#allocation2 + $0x1e8] sm:$0xff] %v5649_v6  ;;  %1749 = vrot.lane.b32.xlu0 %v5934_v24, %s5650_s26  ;;  %1075 = vrot.lane.b32.xlu1 %v5919_v17, %s5650_s26  ;;  %v2069_v47 = vld [vmem:[%s8786_s1 + $0x178] sm:$0xff]  ;;  %v6156_v48 = vld [vmem:[%s5887_s21 + $0x80] sm:$0xff]  ;;  %v5385_v52 = vpack.c.bf16 %v2045_v45, %v2044_v44 }
  0x35   : > { %393 = vst [vmem:[#allocation2 + $0x1f0] sm:$0xff] %v5649_v6  ;;  %394 = vst [vmem:[#allocation2 + $0x1f8] sm:$0xff] %v5649_v6  ;;  %5374 = vmatpush1.bf16.msra.mxu0 %v5373_v60  ;;  %5416 = vmatprep.subr.bf16.mxu1 %v5415_v9  ;;  %v430_v49 = vld [vmem:[%s5887_s21 + $0x18] sm:$0x7f]  ;;  %v6165_v50 = vld [vmem:[%s5887_s21 + $0x30] sm:$0xff] }
  0x36   : > { %395 = vst [vmem:[#allocation2 + $0x200] sm:$0xff] %v5649_v6  ;;  %396 = vst [vmem:[#allocation2 + $0x208] sm:$0xff] %v5649_v6  ;;  %5375 = vmatprep.subr.bf16.mxu0 %v5648_v2  ;;  %v492_v54 = vrot.slane %v430_v49, 7  ;;  %v5060_v55 = vld [vmem:[%s5887_s21 + $0x39] sm:$0x7f]  ;;  %v2046_v56 = vld [vmem:[%s8786_s1 + $0xc0] sm:$0xff] }
  0x37   : > { %397 = vst [vmem:[#allocation2 + $0x210] sm:$0xff] %v5649_v6  ;;  %398 = vst [vmem:[#allocation2 + $0x218] sm:$0xff] %v5649_v6  ;;  %5418 = vmatpush3.bf16.msra.mxu1 %v5415_v9  ;;  %v2047_v57 = vld [vmem:[%s8786_s1 + $0xc8] sm:$0xff]  ;;  %v6182_v60 = vrot.slane %v6165_v50, 7  ;;  %v2048_v62 = vld [vmem:[%s8786_s1 + $0xd0] sm:$0xff] }
  0x38   : > { %399 = vst [vmem:[#allocation2 + $0x220] sm:$0xff] %v5649_v6  ;;  %400 = vst [vmem:[#allocation2 + $0x228] sm:$0xff] %v5649_v6  ;;  %1335 = vrot.lane.b32.xlu0 %v1268_v3, %s5651_s27  ;;  %658 = vrot.lane.b32.xlu1 %v5937_v25, %s5651_s27  ;;  %v493_v59 = vsel %vm487_vm1, %v491_v29, %v492_v54  ;;  %v5388_v61 = vpack.c.bf16 %v2047_v57, %v2046_v56  ;;  %v2049_v63 = vld [vmem:[%s8786_s1 + $0xd8] sm:$0xff]  ;;  %v2050_v4 = vld [vmem:[%s8786_s1 + $0xe0] sm:$0xff] }
  0x39   : > { %401 = vst [vmem:[#allocation2 + $0x230] sm:$0xff] %v5649_v6  ;;  %402 = vst [vmem:[#allocation2 + $0x238] sm:$0xff] %v5649_v6  ;;  %5377 = vmatpush1.bf16.msra.mxu0 %v5376_v8  ;;  %5420 = vmatprep.subr.bf16.mxu1 %v5419_v37  ;;  %v5391_v1 = vpack.c.bf16 %v2049_v63, %v2048_v62  ;;  %v5000_v3 = vld [vmem:[%s5887_s21 + $0x38] sm:$0x7f]  ;;  %v1270_v7 = vld [vmem:[%s5887_s21 + $0x29] sm:$0x7f] }
  0x3a   : > { %403 = vst [vmem:[#allocation2 + $0x240] sm:$0xff] %v5649_v6  ;;  %404 = vst [vmem:[#allocation2 + $0x248] sm:$0xff] %v5649_v6  ;;  %5378 = vmatprep.subr.bf16.mxu0 %v5648_v2  ;;  %v1526_v8 = vrot.slane %v5000_v3, 7  ;;  %v964_v9 = vld [vmem:[%s5887_s21 + $0x28] sm:$0x7f]  ;;  %v431_v12 = vld [vmem:[%s5887_s21 + $0x20] sm:$0xff] }
  0x3b   : > { %405 = vst [vmem:[#allocation2 + $0x250] sm:$0xff] %v5649_v6  ;;  %406 = vst [vmem:[#allocation2 + $0x258] sm:$0xff] %v5649_v6  ;;  %5422 = vmatpush3.bf16.msra.mxu1 %v5419_v37  ;;  %v2053_v21 = vld [vmem:[%s8786_s1 + $0xf8] sm:$0xff]  ;;  %v6220_v22 = vld [vmem:[%s5887_s21 + $0x30] sm:$0xff]  ;;  %v494_v23 = vrot.slane %v431_v12, 7 }
  0x3c   : > { %407 = vst [vmem:[#allocation2 + $0x260] sm:$0xff] %v5649_v6  ;;  %408 = vst [vmem:[#allocation2 + $0x268] sm:$0xff] %v5649_v6  ;;  %1570 = vrot.lane.b32.xlu0 %v1524_v30, %s5652_s25  ;;  %839 = vrot.lane.b32.xlu1 %v778_v32, %s5652_s25  ;;  %v1527_v30 = vsel %vm487_vm1, %v6182_v60, %v1526_v8  ;;  %v780_v32 = vld [vmem:[%s5887_s21 + $0x19] sm:$0x7f]  ;;  %v6250_v38 = vld [vmem:[%s5887_s21 + $0x90] sm:$0xff] }
  0x3d   : > { %409 = vst [vmem:[#allocation2 + $0x270] sm:$0xff] %v5649_v6  ;;  %410 = vst [vmem:[#allocation2 + $0x278] sm:$0xff] %v5649_v6  ;;  %5424 = vmatprep.subr.bf16.mxu1 %v5423_v46  ;;  %v6245_v35 = vld [vmem:[%s5887_s21 + $0x38] sm:$0xff]  ;;  %v432_v39 = vld [vmem:[%s5887_s21 + $0x28] sm:$0x7f] }
  0x3e   : > { %411 = vst [vmem:[#allocation2 + $0x280] sm:$0xff] %v5649_v6  ;;  %412 = vst [vmem:[#allocation2 + $0x288] sm:$0xff] %v5649_v6  ;;  %v6259_v40 = vld [vmem:[%s5887_s21 + $0x40] sm:$0xff]  ;;  %v966_v49 = vld [vmem:[%s5887_s21 + $0x38] sm:$0x7f] }
  0x3f   : > { %413 = vst [vmem:[#allocation2 + $0x290] sm:$0xff] %v5649_v6  ;;  %414 = vst [vmem:[#allocation2 + $0x298] sm:$0xff] %v5649_v6  ;;  %5426 = vmatpush3.bf16.msra.mxu1 %v5423_v46  ;;  %v6271_v44 = vrot.slane %v6259_v40, 7  ;;  %v1033_v56 = vrot.slane %v966_v49, 7  ;;  %v6304_v57 = vld [vmem:[%s5887_s21 + $0x91] sm:$0xff] }
  0x40   : > { %415 = vst [vmem:[#allocation2 + $0x2a0] sm:$0xff] %v5649_v6  ;;  %416 = vst [vmem:[#allocation2 + $0x2a8] sm:$0xff] %v5649_v6  ;;  %1751 = vrot.lane.b32.xlu0 %v5945_v26, %s5650_s26  ;;  %v434_v62 = vld [vmem:[%s5887_s21 + $0x38] sm:$0x7f]  ;;  %v968_v8 = vld [vmem:[%s5887_s21 + $0x48] sm:$0x7f] }
  0x41   : > { %417 = vst [vmem:[#allocation2 + $0x2b0] sm:$0xff] %v5649_v6  ;;  %418 = vst [vmem:[#allocation2 + $0x2b8] sm:$0xff] %v5649_v6  ;;  %v5063_v63 = vld [vmem:[%s5887_s21 + $0x51] sm:$0xff] }
  0x42   : > { %419 = vst [vmem:[#allocation2 + $0x2c0] sm:$0xff] %v5649_v6  ;;  %420 = vst [vmem:[#allocation2 + $0x2c8] sm:$0xff] %v5649_v6 }
  0x43   : > { %421 = vst [vmem:[#allocation2 + $0x2d0] sm:$0xff] %v5649_v6  ;;  %422 = vst [vmem:[#allocation2 + $0x2d8] sm:$0xff] %v5649_v6 }
  0x44   : > { %423 = vst [vmem:[#allocation2 + $0x2e0] sm:$0xff] %v5649_v6  ;;  %424 = vst [vmem:[#allocation2 + $0x2e8] sm:$0xff] %v5649_v6  ;;  %1337 = vrot.lane.b32.xlu0 %v5957_v27, %s5651_s27 }
  0x45   : > { %425 = vst [vmem:[#allocation2 + $0x2f0] sm:$0xff] %v5649_v6  ;;  %1235 = vst.msk [vmem:[#allocation2 + $0x38] sm:$0xff] %vm566_vm0, %v5896_v10  ;;  %v2041_v6 = vld [vmem:[%s8786_s1 + $0x98] sm:$0xff] }
  0x46   : > { %1233 = vst.msk [vmem:[#allocation2 + $0x8] sm:$0xff] %vm566_vm0, %v5907_v13  ;;  %1895 = vst.msk [vmem:[#allocation2 + $0x10] sm:$0xff] %vm566_vm0, %v5925_v20  ;;  %v6084_v13 = vld [vmem:[%s5887_s21 + $0x68] sm:$0xff]  ;;  %v5379_v34 = vpack.c.bf16 %v2041_v6, %v2040_v5 }
  0x47   : > { %1236 = vst.msk [vmem:[#allocation2 + $0x50] sm:$0xff] %vm566_vm0, %v5922_v19  ;;  %1234 = vst.msk [vmem:[#allocation2 + $0x20] sm:$0xff] %vm566_vm0, %v5937_v25  ;;  %v6115_v25 = vld [vmem:[%s5887_s21 + $0x78] sm:$0xff]  ;;  %v2051_v5 = vld [vmem:[%s8786_s1 + $0xe8] sm:$0xff] }
  0x48   : > { %565 = vst.msk [vmem:[#allocation2 + $0x30] sm:$0xfe] %vm564_vm2, %v5916_v16  ;;  %568 = vst.msk [vmem:[#allocation2 + $0x60] sm:$0xfe] %vm564_vm2, %v491_v29  ;;  %v1028_v16 = vsel %vm487_vm1, %v5919_v17, %v1027_v33  ;;  %5380 = vmatpush1.bf16.msra.mxu0 %v5379_v34  ;;  %v2068_v17 = vld [vmem:[%s8786_s1 + $0x170] sm:$0xff]  ;;  %1572 = vrot.lane.b32.xlu0 %v6182_v60, %s5652_s25  ;;  %v5394_v11 = vpack.c.bf16 %v2051_v5, %v2050_v4  ;;  %v6225_v29 = vld [vmem:[%s5887_s21 + $0x88] sm:$0xff] }
  0x49   : > { %1237 = vst.msk [vmem:[#allocation2 + $0x68] sm:$0xff] %vm566_vm0, %v5934_v24  ;;  %1238 = vst.msk [vmem:[#allocation2 + $0x80] sm:$0xff] %vm566_vm0, %v5945_v26  ;;  %5381 = vmatprep.subr.bf16.mxu0 %v5648_v2  ;;  %1077 = vrot.lane.b32.xlu1 %v1028_v16, %s5650_s26  ;;  %v5427_v53 = vpack.c.bf16 %v2069_v47, %v2068_v17  ;;  %v1030_v33 = vrot.slane %v964_v9, 7  ;;  %v5062_v16 = vld [vmem:[%s5887_s21 + $0x49] sm:$0x7f]  ;;  %v6354_v9 = vld [vmem:[%s5887_s21 + $0x50] sm:$0xff] }
  0x4a   : > { %1898 = vst.msk [vmem:[#allocation2 + $0x40] sm:$0xff] %vm566_vm0, %v5957_v27  ;;  %1900 = vst.msk [vmem:[#allocation2 + $0x70] sm:$0xff] %vm566_vm0, %v5966_v31  ;;  %v5002_v17 = vld [vmem:[%s5887_s21 + $0x48] sm:$0x7f]  ;;  %v503_v49 = vrot.slane %v6354_v9, 7 }
  0x4b   : > { %1902 = vst.msk [vmem:[#allocation2 + $0xa0] sm:$0xff] %vm566_vm0, %v5983_v36  ;;  %1245 = vst.msk [vmem:[#allocation2 + $0x128] sm:$0xff] %vm566_vm0, %v6043_v58  ;;  %5428 = vmatprep.subr.bf16.mxu1 %v5427_v53  ;;  %v1031_v37 = vsel %vm487_vm1, %v6027_v51, %v1030_v33  ;;  %v1529_v47 = vrot.slane %v5002_v17, 7  ;;  %v6393_v33 = vld [vmem:[%s5887_s21 + $0x51] sm:$0xff] }
  0x4c   : > { %1246 = vst.msk [vmem:[#allocation2 + $0x140] sm:$0xff] %vm566_vm0, %v6084_v13  ;;  %1906 = vst.msk [vmem:[#allocation2 + $0x100] sm:$0xff] %vm566_vm0, %v6089_v15  ;;  %5383 = vmatpush1.bf16.msra.mxu0 %v5382_v43  ;;  %5430 = vmatpush3.bf16.msra.mxu1 %v5427_v53  ;;  %v1208_v43 = vld [vmem:[%s5887_s21 + $0x38] sm:$0xff] }
  0x4d   : > { %v1928_v42 = vld [vmem:[#allocation2 + $0x10] sm:$0xff]  ;;  %1897 = vst.msk [vmem:[#allocation2 + $0x28] sm:$0x7f] %vm1896_vm3, %v5056_v14  ;;  %1899 = vst.msk [vmem:[#allocation2 + $0x58] sm:$0x7f] %vm1896_vm3, %v5058_v28  ;;  %5384 = vmatprep.subr.bf16.mxu0 %v5648_v2  ;;  %660 = vrot.lane.b32.xlu1 %v5896_v10, %s5651_s27  ;;  %v6292_v53 = vld [vmem:[%s5887_s21 + $0x98] sm:$0xff]  ;;  %v1530_v54 = vsel %vm487_vm1, %v6271_v44, %v1529_v47 }
  0x4e   : > { %5223 = vmatprep.mubr.f32.mxu1 %v1928_v42  ;;  %1247 = vst.msk [vmem:[#allocation2 + $0x158] sm:$0xff] %vm566_vm0, %v6092_v18  ;;  %1248 = vst.msk [vmem:[#allocation2 + $0x170] sm:$0xff] %vm566_vm0, %v6115_v25  ;;  %v6134_v42 = vld [vmem:[%s5887_s21 + $0x71] sm:$0xff]  ;;  %5431 = vmatprep.subr.bf16.mxu1 %v5648_v2 }
  0x4f   : > { %567 = vst.msk [vmem:[#allocation2 + $0x48] sm:$0xff] %vm566_vm0, %v490_v41  ;;  %1908 = vst.msk [vmem:[#allocation2 + $0x130] sm:$0xff] %vm566_vm0, %v6134_v42  ;;  %1753 = vrot.lane.b32.xlu0 %v6165_v50, %s5650_s26  ;;  %v2052_v14 = vld [vmem:[%s8786_s1 + $0xf0] sm:$0xff]  ;;  %v495_v41 = vrot.slane %v432_v39, 7 }
  0x50   : > { %1249 = vst.msk [vmem:[#allocation2 + $0x188] sm:$0xff] %vm566_vm0, %v6156_v48  ;;  %569 = vst.msk [vmem:[#allocation2 + $0x78] sm:$0xff] %vm566_vm0, %v493_v59  ;;  %5386 = vmatpush1.bf16.msra.mxu0 %v5385_v52  ;;  %v5397_v34 = vpack.c.bf16 %v2053_v21, %v2052_v14  ;;  %v6286_v52 = vld [vmem:[%s5887_s21 + $0x40] sm:$0xff]  ;;  %v1034_v59 = vsel %vm487_vm1, %v6182_v60, %v1033_v56  ;;  %v784_v14 = vld [vmem:[%s5887_s21 + $0x39] sm:$0x7f]  ;;  %v1036_v21 = vrot.slane %v968_v8, 7 }
  0x51   : > { %1901 = vst.msk [vmem:[#allocation2 + $0x88] sm:$0x7f] %vm1896_vm3, %v5060_v55  ;;  %5387 = vmatprep.subr.bf16.mxu0 %v5648_v2  ;;  %841 = vrot.lane.b32.xlu1 %v5925_v20, %s5652_s25  ;;  %v1934_v0 = vld [vmem:[#allocation2 + $0x40] sm:$0xff]  ;;  %v1940_v6 = vld [vmem:[#allocation2 + $0x70] sm:$0xff]  ;;  %1903 = vst.msk [vmem:[#allocation2 + $0xb8] sm:$0x7f] %vm1896_vm3, %v5062_v16 }
  0x52   : > { %1239 = vst.msk [vmem:[#allocation2 + $0x98] sm:$0xff] %vm566_vm0, %v6220_v22  ;;  %1250 = vst.msk [vmem:[#allocation2 + $0x1a0] sm:$0xff] %vm566_vm0, %v6225_v29  ;;  %v1946_v45 = vld [vmem:[#allocation2 + $0xa0] sm:$0xff]  ;;  %v782_v55 = vld [vmem:[%s5887_s21 + $0x29] sm:$0x7f] }
  0x53   : > { %1339 = vrot.lane.b32.xlu0 %v1270_v7, %s5651_s27  ;;  %570 = vst.msk [vmem:[#allocation2 + $0x90] sm:$0xfe] %vm564_vm2, %v494_v23  ;;  %576 = vst.msk [vmem:[#allocation2 + $0x120] sm:$0xfe] %vm564_vm2, %v503_v49 }
  0x54   : > { %v1931_v10 = vld [vmem:[#allocation2 + $0x28] sm:$0xff]  ;;  %5389 = vmatpush1.bf16.msra.mxu0 %v5388_v61  ;;  %v1937_v20 = vld [vmem:[#allocation2 + $0x58] sm:$0xff]  ;;  %1251 = vst.msk [vmem:[#allocation2 + $0x1b8] sm:$0xff] %vm566_vm0, %v6250_v38  ;;  %1240 = vst.msk [vmem:[#allocation2 + $0xb0] sm:$0xff] %vm566_vm0, %v1208_v43 }
  0x55   : > { %5390 = vmatprep.subr.bf16.mxu0 %v5648_v2  ;;  %5224 = vmatmul.mubr.f32.vlgmr.msra.gmra.mrb[0].mxu1 %v1931_v10  ;;  %1241 = vst.msk [vmem:[#allocation2 + $0xc8] sm:$0xff] %vm566_vm0, %v6286_v52  ;;  %1252 = vst.msk [vmem:[#allocation2 + $0x1d0] sm:$0xff] %vm566_vm0, %v6292_v53  ;;  %v6316_v61 = vld [vmem:[%s5887_s21 + $0xa0] sm:$0xff]  ;;  %v6326_v10 = vld [vmem:[%s5887_s21 + $0x50] sm:$0xff] }
  0x56   : > { %5226 = vmatprep.mubr.f32.mxu1 %v1934_v0  ;;  %1079 = vrot.lane.b32.xlu1 %v6027_v51, %s5650_s26  ;;  %v496_v51 = vsel %vm487_vm1, %v494_v23, %v495_v41  ;;  %1912 = vst.msk [vmem:[#allocation2 + $0x190] sm:$0xff] %vm566_vm0, %v6304_v57  ;;  %1253 = vst.msk [vmem:[#allocation2 + $0x1e8] sm:$0xff] %vm566_vm0, %v6316_v61  ;;  %v498_v0 = vrot.slane %v434_v62, 7  ;;  %v6339_v4 = vrot.slane %v6326_v10, 7  ;;  %v6379_v23 = vld [vmem:[%s5887_s21 + $0x58] sm:$0xff]  ;;  %v6405_v41 = vrot.slane %v6043_v58, 7 }
  0x57   : > { %1574 = vrot.lane.b32.xlu0 %v1527_v30, %s5652_s25  ;;  %571 = vst.msk [vmem:[#allocation2 + $0xa8] sm:$0xff] %vm566_vm0, %v496_v51  ;;  %1904 = vst.msk [vmem:[#allocation2 + $0xd0] sm:$0xff] %vm566_vm0, %v5063_v63  ;;  %v6384_v30 = vld [vmem:[%s5887_s21 + $0xb0] sm:$0xff]  ;;  %v1958_v51 = vld [vmem:[#allocation2 + $0x100] sm:$0xff] }
  0x58   : > { %5392 = vmatpush1.bf16.msra.mxu0 %v5391_v1  ;;  %v1943_v28 = vld [vmem:[#allocation2 + $0x88] sm:$0xff]  ;;  %v1949_v46 = vld [vmem:[#allocation2 + $0xb8] sm:$0xff]  ;;  %1243 = vst.msk [vmem:[#allocation2 + $0xf8] sm:$0xff] %vm566_vm0, %v6354_v9  ;;  %1255 = vst.msk [vmem:[#allocation2 + $0x218] sm:$0xff] %vm566_vm0, %v6384_v30 }
  0x59   : > { %5393 = vmatprep.subr.bf16.mxu0 %v5648_v2  ;;  %5227 = vmatmul.mubr.f32.gmra.mrb[2].mxu1 %v1937_v20  ;;  %v5064_v1 = vld [vmem:[%s5887_s21 + $0x59] sm:$0x7f] }
  0x5a   : > { %5229 = vmatprep.mubr.f32.mxu1 %v1940_v6  ;;  %662 = vrot.lane.b32.xlu1 %v5922_v19, %s5651_s27  ;;  %v6238_v19 = vld [vmem:[%s5887_s21 + $0x81] sm:$0xff]  ;;  %1905 = vst.msk [vmem:[#allocation2 + $0xe8] sm:$0x7f] %vm1896_vm3, %v5064_v1  ;;  %v5004_v6 = vld [vmem:[%s5887_s21 + $0x58] sm:$0x7f] }
  0x5b   : > { %1910 = vst.msk [vmem:[#allocation2 + $0x160] sm:$0xff] %vm566_vm0, %v6238_v19  ;;  %1755 = vrot.lane.b32.xlu0 %v6245_v35, %s5650_s26  ;;  %v1532_v7 = vrot.slane %v5004_v6, 7  ;;  %v5068_v6 = vld [vmem:[%s5887_s21 + $0x79] sm:$0x7f] }
  0x5c   : > { %5395 = vmatpush1.bf16.msra.mxu0 %v5394_v11  ;;  %v6360_v11 = vld [vmem:[%s5887_s21 + $0xa8] sm:$0xff]  ;;  %1909 = vst.msk [vmem:[#allocation2 + $0x148] sm:$0x7f] %vm1896_vm3, %v5068_v6 }
  0x5d   : > { %5396 = vmatprep.subr.bf16.mxu0 %v5648_v2  ;;  %5230 = vmatmul.mubr.f32.gmra.mrb[4].mxu1 %v1943_v28  ;;  %1254 = vst.msk [vmem:[#allocation2 + $0x200] sm:$0xff] %vm566_vm0, %v6360_v11  ;;  %v1533_v12 = vsel %vm487_vm1, %v6339_v4, %v1532_v7  ;;  %v1037_v28 = vsel %vm487_vm1, %v6271_v44, %v1036_v21 }
  0x5e   : > { %843 = vrot.lane.b32.xlu1 %v780_v32, %s5652_s25  ;;  %5232 = vmatprep.mubr.f32.mxu1 %v1946_v45  ;;  %v1952_v5 = vld [vmem:[#allocation2 + $0xd0] sm:$0xff]  ;;  %v436_v32 = vld [vmem:[%s5887_s21 + $0x48] sm:$0x7f] }
  0x5f   : > { %1341 = vrot.lane.b32.xlu0 %v5966_v31, %s5651_s27 }
  0x60   : > { %5398 = vmatpush1.bf16.msra.mxu0 %v5397_v34  ;;  %v501_v34 = vrot.slane %v436_v32, 7 }
  0x61   : > { %5233 = vmatmul.mubr.f32.gmra.mrb[6].mxu1 %v1949_v46  ;;  %v1955_v20 = vld [vmem:[#allocation2 + $0xe8] sm:$0xff] }
  0x62   : > { %1081 = vrot.lane.b32.xlu1 %v1031_v37, %s5650_s26  ;;  %5235 = vmatprep.mubr.f32.mxu1 %v1952_v5  ;;  %v1212_v37 = vld [vmem:[%s5887_s21 + $0x58] sm:$0xff]  ;;  %v5006_v46 = vld [vmem:[%s5887_s21 + $0x68] sm:$0x7f] }
  0x63   : > { %1576 = vrot.lane.b32.xlu0 %v6271_v44, %s5652_s25  ;;  %1244 = vst.msk [vmem:[#allocation2 + $0x110] sm:$0xff] %vm566_vm0, %v1212_v37  ;;  %v1535_v17 = vrot.slane %v5006_v46, 7  ;;  %v1967_v32 = vld [vmem:[#allocation2 + $0x148] sm:$0xff] }
  0x64   : > { %v6494_v46 = vld [vmem:[%s5887_s21 + $0xc8] sm:$0xff] }
  0x65   : > { %5236 = vmatmul.mubr.f32.gmra.mrb[8].mxu1 %v1955_v20  ;;  %v438_v20 = vld [vmem:[%s5887_s21 + $0x58] sm:$0x7f]  ;;  %1258 = vst.msk [vmem:[#allocation2 + $0x260] sm:$0xff] %vm566_vm0, %v6494_v46 }
  0x66   : > { %664 = vrot.lane.b32.xlu1 %v5934_v24, %s5651_s27  ;;  %v1272_v24 = vld [vmem:[%s5887_s21 + $0x39] sm:$0x7f]  ;;  %5238 = vmatprep.mubr.f32.mxu1 %v1958_v51 }
  0x67   : > { %1757 = vrot.lane.b32.xlu0 %v6259_v40, %s5650_s26 }
  0x6a   : > { %845 = vrot.lane.b32.xlu1 %v5957_v27, %s5652_s25  ;;  %v497_v27 = vrot.slane %v6220_v22, 7  ;;  %v6372_v22 = vld [vmem:[%s5887_s21 + $0xa1] sm:$0xff] }
  0x6b   : > { %1343 = vrot.lane.b32.xlu0 %v1272_v24, %s5651_s27  ;;  %1914 = vst.msk [vmem:[#allocation2 + $0x1c0] sm:$0xff] %vm566_vm0, %v6372_v22 }
  0x6c   : > { %572 = vst.msk [vmem:[#allocation2 + $0xc0] sm:$0xfe] %vm564_vm2, %v497_v27  ;;  %v499_v3 = vsel %vm487_vm1, %v497_v27, %v498_v0  ;;  %v6431_v27 = vld [vmem:[%s5887_s21 + $0xb8] sm:$0xff] }
  0x6d   : > { %573 = vst.msk [vmem:[#allocation2 + $0xd8] sm:$0xff] %vm566_vm0, %v499_v3  ;;  %1256 = vst.msk [vmem:[#allocation2 + $0x230] sm:$0xff] %vm566_vm0, %v6431_v27 }
  0x6e   : > { %1083 = vrot.lane.b32.xlu1 %v6182_v60, %s5650_s26  ;;  %v1210_v60 = vld [vmem:[%s5887_s21 + $0x48] sm:$0xff] }
  0x6f   : > { %1578 = vrot.lane.b32.xlu0 %v1530_v54, %s5652_s25  ;;  %1242 = vst.msk [vmem:[#allocation2 + $0xe0] sm:$0xff] %vm566_vm0, %v1210_v60  ;;  %v1536_v54 = vsel %vm487_vm1, %v6405_v41, %v1535_v17  ;;  %v6450_v60 = vld [vmem:[%s5887_s21 + $0xc0] sm:$0xff] }
  0x70   : > { %1257 = vst.msk [vmem:[#allocation2 + $0x248] sm:$0xff] %vm566_vm0, %v6450_v60 }
  0x72   : > { %666 = vrot.lane.b32.xlu1 %v5945_v26, %s5651_s27  ;;  %v6311_v26 = vld [vmem:[%s5887_s21 + $0x48] sm:$0xff] }
  0x73   : > { %1759 = vrot.lane.b32.xlu0 %v6311_v26, %s5650_s26 }
  0x76   : > { %847 = vrot.lane.b32.xlu1 %v782_v55, %s5652_s25  ;;  %v786_v55 = vld [vmem:[%s5887_s21 + $0x49] sm:$0x7f] }
  0x77   : > { %1345 = vrot.lane.b32.xlu0 %v5983_v36, %s5651_s27 }
  0x7a   : > { %1085 = vrot.lane.b32.xlu1 %v1034_v59, %s5650_s26 }
  0x7b   : > { %1580 = vrot.lane.b32.xlu0 %v6339_v4, %s5652_s25 }
  0x7e   : > { %668 = vrot.lane.b32.xlu1 %v6165_v50, %s5651_s27  ;;  %v1274_v50 = vld [vmem:[%s5887_s21 + $0x49] sm:$0x7f] }
  0x7f   : > { %1761 = vrot.lane.b32.xlu0 %v6326_v10, %s5650_s26 }
  0x82   : > { %849 = vrot.lane.b32.xlu1 %v5966_v31, %s5652_s25  ;;  %v500_v31 = vrot.slane %v6286_v52, 7  ;;  %v970_v52 = vld [vmem:[%s5887_s21 + $0x58] sm:$0x7f] }
  0x83   : > { %1347 = vrot.lane.b32.xlu0 %v1274_v50, %s5651_s27  ;;  %v1039_v62 = vrot.slane %v970_v52, 7 }
  0x84   : > { %574 = vst.msk [vmem:[#allocation2 + $0xf0] sm:$0xfe] %vm564_vm2, %v500_v31  ;;  %v502_v39 = vsel %vm487_vm1, %v500_v31, %v501_v34 }
  0x85   : > { %575 = vst.msk [vmem:[#allocation2 + $0x108] sm:$0xff] %vm566_vm0, %v502_v39  ;;  %v1040_v1 = vsel %vm487_vm1, %v6339_v4, %v1039_v62  ;;  %v439_v39 = vld [vmem:[%s5887_s21 + $0x60] sm:$0xff] }
  0x86   : > { %1087 = vrot.lane.b32.xlu1 %v6271_v44, %s5650_s26 }
  0x87   : > { %1582 = vrot.lane.b32.xlu0 %v1533_v12, %s5652_s25  ;;  %v6468_v12 = vrot.slane %v6092_v18, 7 }
  0x8a   : > { %670 = vrot.lane.b32.xlu1 %v6245_v35, %s5651_s27  ;;  %v5066_v35 = vld [vmem:[%s5887_s21 + $0x69] sm:$0x7f] }
  0x8b   : > { %1763 = vrot.lane.b32.xlu0 %v6379_v23, %s5650_s26  ;;  %1907 = vst.msk [vmem:[#allocation2 + $0x118] sm:$0x7f] %vm1896_vm3, %v5066_v35  ;;  %v5008_v35 = vld [vmem:[%s5887_s21 + $0x78] sm:$0x7f] }
  0x8c   : > { %v1538_v37 = vrot.slane %v5008_v35, 7  ;;  %v974_v35 = vld [vmem:[%s5887_s21 + $0x78] sm:$0x7f] }
  0x8e   : > { %851 = vrot.lane.b32.xlu1 %v784_v14, %s5652_s25  ;;  %v1746_v16 = vpop.permute.xlu1 %1745  ;;  %v1330_v43 = vpop.permute.xlu0 %1329 }
  0x8f   : > { %1349 = vrot.lane.b32.xlu0 %v6393_v33, %s5651_s27  ;;  %1425 = vst.msk [vmem:[#allocation2 + $0x8] sm:$0xff] %vm746_vm4, %v1330_v43 }
  0x92   : > { %1089 = vrot.lane.b32.xlu1 %v1037_v28, %s5650_s26  ;;  %v1332_v44 = vpop.permute.xlu0 %1331  ;;  %v1072_v45 = vpop.permute.xlu1 %1071  ;;  %v1964_v28 = vld [vmem:[#allocation2 + $0x130] sm:$0xff] }
  0x93   : > { %1584 = vrot.lane.b32.xlu0 %v6405_v41, %s5652_s25  ;;  %1427 = vst.msk [vmem:[#allocation2 + $0x20] sm:$0x7f] %vm1426_vm5, %v1332_v44  ;;  %v506_v44 = vrot.slane %v439_v39, 7 }
  0x94   : > { %1168 = vst.msk [vmem:[#allocation2] sm:$0xfe] %vm1167_vm6, %v1072_v45  ;;  %v972_v45 = vld [vmem:[%s5887_s21 + $0x68] sm:$0x7f] }
  0x95   : > { %578 = vst.msk [vmem:[#allocation2 + $0x150] sm:$0xfe] %vm564_vm2, %v506_v44 }
  0x96   : > { %672 = vrot.lane.b32.xlu1 %v6259_v40, %s5651_s27  ;;  %v1961_v40 = vld [vmem:[#allocation2 + $0x118] sm:$0xff]  ;;  %v1565_v24 = vpop.permute.xlu0 %1564  ;;  %v1567_v47 = vpop.permute.xlu1 %1566 }
  0x97   : > { %5239 = vmatmul.mubr.f32.gmra.mrb[10].mxu1 %v1961_v40  ;;  %1765 = vrot.lane.b32.xlu0 %v6043_v58, %s5650_s26  ;;  %1655 = vst.msk [vmem:[#allocation2 + $0x8] sm:$0xfe] %vm1654_vm7, %v1565_v24 }
  0x98   : > { %1656 = vst.msk [vmem:[#allocation2 + $0x20] sm:$0xff] %vm927_vm8, %v1567_v47  ;;  %5241 = vmatprep.mubr.f32.mxu1 %v1964_v28  ;;  %v788_v47 = vld [vmem:[%s5887_s21 + $0x59] sm:$0x7f] }
  0x99   : > { %1835 = vst.msk [vmem:[#allocation2 + $0x8] sm:$0xff] %vm1169_vm9, %v1746_v16 }
  0x9a   : > { %853 = vrot.lane.b32.xlu1 %v5983_v36, %s5652_s25  ;;  %v1276_v36 = vld [vmem:[%s5887_s21 + $0x59] sm:$0x7f]  ;;  %v1748_v56 = vpop.permute.xlu0 %1747  ;;  %v1074_v59 = vpop.permute.xlu1 %1073 }
  0x9b   : > { %1351 = vrot.lane.b32.xlu0 %v1276_v36, %s5651_s27  ;;  %1836 = vst.msk [vmem:[#allocation2 + $0x20] sm:$0xff] %vm1169_vm9, %v1748_v56  ;;  %1170 = vst.msk [vmem:[#allocation2 + $0x18] sm:$0xff] %vm1169_vm9, %v1074_v59  ;;  %v1926_v5 = vld [vmem:[#allocation2] sm:$0xff]  ;;  %5242 = vmatmul.mubr.f32.gmra.mrb[12].mxu1 %v1967_v32  ;;  %v1539_v36 = vsel %vm487_vm1, %v6468_v12, %v1538_v37  ;;  %v6515_v56 = vld [vmem:[%s5887_s21 + $0xd0] sm:$0xff] }
  0x9c   : > { %1259 = vst.msk [vmem:[#allocation2 + $0x278] sm:$0xff] %vm566_vm0, %v6515_v56  ;;  %v440_v59 = vld [vmem:[%s5887_s21 + $0x68] sm:$0x7f] }
  0x9d   : > { %v507_v62 = vrot.slane %v440_v59, 7 }
  0x9e   : > { %1091 = vrot.lane.b32.xlu1 %v6339_v4, %s5650_s26  ;;  %v1334_v63 = vpop.permute.xlu0 %1333  ;;  %v657_v0 = vpop.permute.xlu1 %656  ;;  %v504_v4 = vrot.slane %v438_v20, 7  ;;  %v6533_v20 = vrot.slane %v6156_v48, 7 }
  0x9f   : > { %1586 = vrot.lane.b32.xlu0 %v1536_v54, %s5652_s25  ;;  %1428 = vst.msk [vmem:[#allocation2 + $0x38] sm:$0xff] %vm746_vm4, %v1334_v63  ;;  %747 = vst.msk [vmem:[#allocation2 + $0x30] sm:$0xff] %vm746_vm4, %v657_v0  ;;  %v5070_v63 = vld [vmem:[%s5887_s21 + $0x89] sm:$0x7f] }
  0xa0   : > { %v1927_v3 = vld [vmem:[#allocation2 + $0x8] sm:$0xff]  ;;  %v505_v31 = vsel %vm487_vm1, %v503_v49, %v504_v4  ;;  %v1042_v49 = vrot.slane %v972_v45, 7  ;;  %1911 = vst.msk [vmem:[#allocation2 + $0x178] sm:$0x7f] %vm1896_vm3, %v5070_v63  ;;  %v1976_v63 = vld [vmem:[#allocation2 + $0x190] sm:$0xff] }
  0xa1   : > { %2141 = vmatprep.mubr.f32.mxu0 %v1927_v3  ;;  %577 = vst.msk [vmem:[#allocation2 + $0x138] sm:$0xff] %vm566_vm0, %v505_v31  ;;  %v1280_v31 = vld [vmem:[%s5887_s21 + $0x79] sm:$0x7f] }
  0xa2   : > { %674 = vrot.lane.b32.xlu1 %v6311_v26, %s5651_s27  ;;  %v6443_v26 = vld [vmem:[%s5887_s21 + $0xb1] sm:$0xff]  ;;  %2142 = vmatmul.mubr.f32.vlgmr.msra.gmra.mrb[0].mxu0 %v1926_v5  ;;  %v1569_v50 = vpop.permute.xlu0 %1568  ;;  %v838_v7 = vpop.permute.xlu1 %837  ;;  %v1930_v8 = vld [vmem:[#allocation2 + $0x20] sm:$0xff]  ;;  %v508_v5 = vsel %vm487_vm1, %v506_v44, %v507_v62 }
  0xa3   : > { %1916 = vst.msk [vmem:[#allocation2 + $0x1f0] sm:$0xff] %vm566_vm0, %v6443_v26  ;;  %1767 = vrot.lane.b32.xlu0 %v6084_v13, %s5650_s26  ;;  %v1929_v9 = vld [vmem:[#allocation2 + $0x18] sm:$0xff]  ;;  %2146 = vmatprep.mubr.f32.mxu0 %v1930_v8  ;;  %579 = vst.msk [vmem:[#allocation2 + $0x168] sm:$0xff] %vm566_vm0, %v508_v5 }
  0xa4   : > { %1657 = vst.msk [vmem:[#allocation2 + $0x38] sm:$0xfe] %vm1654_vm7, %v1569_v50  ;;  %v1970_v50 = vld [vmem:[#allocation2 + $0x160] sm:$0xff] }
  0xa5   : > { %928 = vst.msk [vmem:[#allocation2 + $0x30] sm:$0xff] %vm927_vm8, %v838_v7  ;;  %5244 = vmatprep.mubr.f32.mxu1 %v1970_v50 }
  0xa6   : > { %855 = vrot.lane.b32.xlu1 %v786_v55, %s5652_s25  ;;  %2147 = vmatmul.mubr.f32.gmra.mrb[2].mxu0 %v1929_v9  ;;  %v1750_v14 = vpop.permute.xlu0 %1749  ;;  %v1076_v21 = vpop.permute.xlu1 %1075  ;;  %v1043_v55 = vsel %vm487_vm1, %v6405_v41, %v1042_v49 }
  0xa7   : > { %1353 = vrot.lane.b32.xlu0 %v6089_v15, %s5651_s27  ;;  %1837 = vst.msk [vmem:[#allocation2 + $0x38] sm:$0xff] %vm1169_vm9, %v1750_v14  ;;  %v1973_v7 = vld [vmem:[#allocation2 + $0x178] sm:$0xff]  ;;  %v441_v14 = vld [vmem:[%s5887_s21 + $0x70] sm:$0xff] }
  0xa8   : > { %1171 = vst.msk [vmem:[#allocation2 + $0x30] sm:$0xfe] %vm1167_vm6, %v1076_v21  ;;  %5245 = vmatmul.mubr.f32.gmra.mrb[14].mxu1 %v1973_v7 }
  0xa9   : > { %5247 = vmatprep.mubr.f32.mxu1 %v1976_v63 }
  0xaa   : > { %1093 = vrot.lane.b32.xlu1 %v1040_v1, %s5650_s26  ;;  %v1336_v34 = vpop.permute.xlu0 %1335 }
  0xab   : > { %1588 = vrot.lane.b32.xlu0 %v6468_v12, %s5652_s25  ;;  %1429 = vst.msk [vmem:[#allocation2 + $0x50] sm:$0x7f] %vm1426_vm5, %v1336_v34 }
  0xae   : > { %676 = vrot.lane.b32.xlu1 %v6326_v10, %s5651_s27  ;;  %v659_v10 = vpop.permute.xlu1 %658  ;;  %v1571_v16 = vpop.permute.xlu0 %1570  ;;  %v1933_v51 = vld [vmem:[#allocation2 + $0x38] sm:$0xff] }
  0xaf   : > { %748 = vst.msk [vmem:[#allocation2 + $0x48] sm:$0xff] %vm746_vm4, %v659_v10  ;;  %1769 = vrot.lane.b32.xlu0 %v6092_v18, %s5650_s26  ;;  %v1932_v40 = vld [vmem:[#allocation2 + $0x30] sm:$0xff]  ;;  %2151 = vmatprep.mubr.f32.mxu0 %v1933_v51  ;;  %v509_v10 = vrot.slane %v441_v14, 7  ;;  %v1045_v51 = vrot.slane %v974_v35, 7  ;;  %v792_v14 = vld [vmem:[%s5887_s21 + $0x79] sm:$0x7f] }
  0xb0   : > { %1658 = vst.msk [vmem:[#allocation2 + $0x50] sm:$0xff] %vm927_vm8, %v1571_v16  ;;  %2152 = vmatmul.mubr.f32.gmra.mrb[4].mxu0 %v1932_v40  ;;  %v6572_v40 = vld [vmem:[%s5887_s21 + $0xd1] sm:$0xff] }
  0xb1   : > { %580 = vst.msk [vmem:[#allocation2 + $0x180] sm:$0xfe] %vm564_vm2, %v509_v10  ;;  %v1046_v45 = vsel %vm487_vm1, %v6468_v12, %v1045_v51 }
  0xb2   : > { %857 = vrot.lane.b32.xlu1 %v6393_v33, %s5652_s25  ;;  %v1278_v33 = vld [vmem:[%s5887_s21 + $0x69] sm:$0x7f]  ;;  %v840_v43 = vpop.permute.xlu1 %839  ;;  %v1752_v17 = vpop.permute.xlu0 %1751  ;;  %1920 = vst.msk [vmem:[#allocation2 + $0x250] sm:$0xff] %vm566_vm0, %v6572_v40 }
  0xb3   : > { %930 = vst.msk [vmem:[#allocation2 + $0x48] sm:$0x7f] %vm929_vm10, %v840_v43  ;;  %1355 = vrot.lane.b32.xlu0 %v1278_v33, %s5651_s27  ;;  %v6559_v33 = vld [vmem:[%s5887_s21 + $0xd8] sm:$0xff]  ;;  %v790_v43 = vld [vmem:[%s5887_s21 + $0x69] sm:$0x7f] }
  0xb4   : > { %1838 = vst.msk [vmem:[#allocation2 + $0x50] sm:$0xff] %vm1169_vm9, %v1752_v17 }
  0xb5   : > { %1260 = vst.msk [vmem:[#allocation2 + $0x290] sm:$0xff] %vm566_vm0, %v6559_v33 }
  0xb6   : > { %1095 = vrot.lane.b32.xlu1 %v6405_v41, %s5650_s26  ;;  %v1338_v52 = vpop.permute.xlu0 %1337 }
  0xb7   : > { %1590 = vrot.lane.b32.xlu0 %v1539_v36, %s5652_s25  ;;  %1430 = vst.msk [vmem:[#allocation2 + $0x68] sm:$0xff] %vm746_vm4, %v1338_v52  ;;  %v442_v36 = vld [vmem:[%s5887_s21 + $0x78] sm:$0x7f] }
  0xb8   : > { %v510_v17 = vrot.slane %v442_v36, 7  ;;  %v1982_v36 = vld [vmem:[#allocation2 + $0x1c0] sm:$0xff] }
  0xba   : > { %678 = vrot.lane.b32.xlu1 %v6379_v23, %s5651_s27  ;;  %v6507_v23 = vld [vmem:[%s5887_s21 + $0xc1] sm:$0xff]  ;;  %v1573_v0 = vpop.permute.xlu0 %1572 }
  0xbb   : > { %v1078_v24 = vpop.permute.xlu1 %1077  ;;  %1918 = vst.msk [vmem:[#allocation2 + $0x220] sm:$0xff] %vm566_vm0, %v6507_v23  ;;  %1771 = vrot.lane.b32.xlu0 %v6115_v25, %s5650_s26  ;;  %v1936_v41 = vld [vmem:[#allocation2 + $0x50] sm:$0xff] }
  0xbc   : > { %1172 = vst.msk [vmem:[#allocation2 + $0x48] sm:$0xff] %vm1169_vm9, %v1078_v24  ;;  %2156 = vmatprep.mubr.f32.mxu0 %v1936_v41  ;;  %v5072_v24 = vld [vmem:[%s5887_s21 + $0x99] sm:$0x7f] }
  0xbd   : > { %1659 = vst.msk [vmem:[#allocation2 + $0x68] sm:$0xfe] %vm1654_vm7, %v1573_v0 }
  0xbe   : > { %859 = vrot.lane.b32.xlu1 %v788_v47, %s5652_s25  ;;  %1913 = vst.msk [vmem:[#allocation2 + $0x1a8] sm:$0x7f] %vm1896_vm3, %v5072_v24 }
  0xbf   : > { %v661_v54 = vpop.permute.xlu1 %660  ;;  %1357 = vrot.lane.b32.xlu0 %v6134_v42, %s5651_s27 }
  0xc0   : > { %749 = vst.msk [vmem:[#allocation2 + $0x60] sm:$0xff] %vm746_vm4, %v661_v54 }
  0xc1   : > { %v1754_v4 = vpop.permute.xlu0 %1753 }
  0xc2   : > { %1097 = vrot.lane.b32.xlu1 %v1043_v55, %s5650_s26  ;;  %1839 = vst.msk [vmem:[#allocation2 + $0x68] sm:$0xff] %vm1169_vm9, %v1754_v4  ;;  %v6593_v55 = vrot.slane %v6250_v38, 7 }
  0xc3   : > { %v842_v1 = vpop.permute.xlu1 %841  ;;  %v1935_v3 = vld [vmem:[#allocation2 + $0x48] sm:$0xff]  ;;  %1592 = vrot.lane.b32.xlu0 %v6533_v20, %s5652_s25 }
  0xc4   : > { %931 = vst.msk [vmem:[#allocation2 + $0x60] sm:$0xff] %vm927_vm8, %v842_v1  ;;  %2157 = vmatmul.mubr.f32.gmra.mrb[6].mxu0 %v1935_v3  ;;  %v1282_v3 = vld [vmem:[%s5887_s21 + $0x89] sm:$0x7f] }
  0xc5   : > { %v1340_v8 = vpop.permute.xlu0 %1339  ;;  %v1979_v0 = vld [vmem:[#allocation2 + $0x1a8] sm:$0xff] }
  0xc6   : > { %680 = vrot.lane.b32.xlu1 %v6043_v58, %s5651_s27  ;;  %v5010_v58 = vld [vmem:[%s5887_s21 + $0x88] sm:$0x7f]  ;;  %1431 = vst.msk [vmem:[#allocation2 + $0x80] sm:$0x7f] %vm1426_vm5, %v1340_v8  ;;  %5248 = vmatmul.mubr.f32.gmra.mrb[16].mxu1 %v1979_v0  ;;  %v978_v0 = vld [vmem:[%s5887_s21 + $0x98] sm:$0x7f] }
  0xc7   : > { %1773 = vrot.lane.b32.xlu0 %v6156_v48, %s5650_s26  ;;  %5250 = vmatprep.mubr.f32.mxu1 %v1982_v36 }
  0xc8   : > { %v1080_v6 = vpop.permute.xlu1 %1079 }
  0xc9   : > { %1173 = vst.msk [vmem:[#allocation2 + $0x60] sm:$0xfe] %vm1167_vm6, %v1080_v6  ;;  %v1575_v21 = vpop.permute.xlu0 %1574  ;;  %v1939_v32 = vld [vmem:[#allocation2 + $0x68] sm:$0xff] }
  0xca   : > { %861 = vrot.lane.b32.xlu1 %v6089_v15, %s5652_s25  ;;  %v1541_v15 = vrot.slane %v5010_v58, 7  ;;  %1660 = vst.msk [vmem:[#allocation2 + $0x80] sm:$0xff] %vm927_vm8, %v1575_v21  ;;  %2161 = vmatprep.mubr.f32.mxu0 %v1939_v32 }
  0xcb   : > { %1359 = vrot.lane.b32.xlu0 %v1280_v31, %s5651_s27 }
  0xcc   : > { %v663_v9 = vpop.permute.xlu1 %662  ;;  %v1542_v37 = vsel %vm487_vm1, %v6533_v20, %v1541_v15 }
  0xcd   : > { %750 = vst.msk [vmem:[#allocation2 + $0x78] sm:$0xff] %vm746_vm4, %v663_v9  ;;  %v1756_v39 = vpop.permute.xlu0 %1755  ;;  %v976_v9 = vld [vmem:[%s5887_s21 + $0x88] sm:$0x7f] }
  0xce   : > { %1099 = vrot.lane.b32.xlu1 %v6468_v12, %s5650_s26  ;;  %1840 = vst.msk [vmem:[#allocation2 + $0x80] sm:$0xff] %vm1169_vm9, %v1756_v39  ;;  %v511_v12 = vsel %vm487_vm1, %v509_v10, %v510_v17  ;;  %v1048_v21 = vrot.slane %v976_v9, 7  ;;  %v444_v10 = vld [vmem:[%s5887_s21 + $0x88] sm:$0x7f] }
  0xcf   : > { %1594 = vrot.lane.b32.xlu0 %v1542_v37, %s5652_s25  ;;  %581 = vst.msk [vmem:[#allocation2 + $0x198] sm:$0xff] %vm566_vm0, %v511_v12  ;;  %v513_v35 = vrot.slane %v444_v10, 7  ;;  %v5074_v37 = vld [vmem:[%s5887_s21 + $0xa9] sm:$0x7f] }
  0xd0   : > { %v844_v28 = vpop.permute.xlu1 %843  ;;  %v1938_v34 = vld [vmem:[#allocation2 + $0x60] sm:$0xff]  ;;  %1915 = vst.msk [vmem:[#allocation2 + $0x1d8] sm:$0x7f] %vm1896_vm3, %v5074_v37  ;;  %v1286_v37 = vld [vmem:[%s5887_s21 + $0xa9] sm:$0x7f] }
  0xd1   : > { %932 = vst.msk [vmem:[#allocation2 + $0x78] sm:$0x7f] %vm929_vm10, %v844_v28  ;;  %2162 = vmatmul.mubr.f32.gmra.mrb[8].mxu0 %v1938_v34  ;;  %v6627_v28 = vld [vmem:[%s5887_s21 + $0xe1] sm:$0xff]  ;;  %v1049_v34 = vsel %vm487_vm1, %v6533_v20, %v1048_v21 }
  0xd2   : > { %682 = vrot.lane.b32.xlu1 %v6084_v13, %s5651_s27  ;;  %v1342_v13 = vpop.permute.xlu0 %1341  ;;  %1922 = vst.msk [vmem:[#allocation2 + $0x280] sm:$0xff] %vm566_vm0, %v6627_v28 }
  0xd3   : > { %1432 = vst.msk [vmem:[#allocation2 + $0x98] sm:$0xff] %vm746_vm4, %v1342_v13  ;;  %1775 = vrot.lane.b32.xlu0 %v6225_v29, %s5650_s26  ;;  %v6648_v13 = vrot.slane %v6316_v61, 7 }
  0xd4   : > { %v1082_v16 = vpop.permute.xlu1 %1081 }
  0xd5   : > { %1174 = vst.msk [vmem:[#allocation2 + $0x78] sm:$0xff] %vm1169_vm9, %v1082_v16  ;;  %v1942_v52 = vld [vmem:[#allocation2 + $0x80] sm:$0xff] }
  0xd6   : > { %863 = vrot.lane.b32.xlu1 %v790_v43, %s5652_s25  ;;  %v1577_v47 = vpop.permute.xlu0 %1576  ;;  %2166 = vmatprep.mubr.f32.mxu0 %v1942_v52 }
  0xd7   : > { %1661 = vst.msk [vmem:[#allocation2 + $0x98] sm:$0xfe] %vm1654_vm7, %v1577_v47  ;;  %1361 = vrot.lane.b32.xlu0 %v6238_v19, %s5651_s27  ;;  %v1985_v17 = vld [vmem:[#allocation2 + $0x1d8] sm:$0xff] }
  0xd8   : > { %v665_v44 = vpop.permute.xlu1 %664  ;;  %5251 = vmatmul.mubr.f32.gmra.mrb[18].mxu1 %v1985_v17 }
  0xd9   : > { %751 = vst.msk [vmem:[#allocation2 + $0x90] sm:$0xff] %vm746_vm4, %v665_v44 }
  0xda   : > { %1101 = vrot.lane.b32.xlu1 %v1046_v45, %s5650_s26  ;;  %v1758_v59 = vpop.permute.xlu0 %1757 }
  0xdb   : > { %1841 = vst.msk [vmem:[#allocation2 + $0x98] sm:$0xff] %vm1169_vm9, %v1758_v59  ;;  %1596 = vrot.lane.b32.xlu0 %v6593_v55, %s5652_s25 }
  0xdc   : > { %v846_v49 = vpop.permute.xlu1 %845  ;;  %v1941_v54 = vld [vmem:[#allocation2 + $0x78] sm:$0xff] }
  0xdd   : > { %933 = vst.msk [vmem:[#allocation2 + $0x90] sm:$0xff] %vm927_vm8, %v846_v49  ;;  %2167 = vmatmul.mubr.f32.gmra.mrb[10].mxu0 %v1941_v54  ;;  %v1284_v49 = vld [vmem:[%s5887_s21 + $0x99] sm:$0x7f] }
  0xde   : > { %684 = vrot.lane.b32.xlu1 %v6092_v18, %s5651_s27  ;;  %v1344_v1 = vpop.permute.xlu0 %1343  ;;  %v5012_v18 = vld [vmem:[%s5887_s21 + $0x98] sm:$0x7f] }
  0xdf   : > { %1433 = vst.msk [vmem:[#allocation2 + $0xb0] sm:$0x7f] %vm1426_vm5, %v1344_v1  ;;  %1777 = vrot.lane.b32.xlu0 %v6250_v38, %s5650_s26  ;;  %v1544_v5 = vrot.slane %v5012_v18, 7 }
  0xe0   : > { %v1084_v62 = vpop.permute.xlu1 %1083 }
  0xe1   : > { %1175 = vst.msk [vmem:[#allocation2 + $0x90] sm:$0xfe] %vm1167_vm6, %v1084_v62  ;;  %v1545_v58 = vsel %vm487_vm1, %v6593_v55, %v1544_v5  ;;  %v1051_v5 = vrot.slane %v978_v0, 7 }
  0xe2   : > { %865 = vrot.lane.b32.xlu1 %v6134_v42, %s5652_s25  ;;  %v443_v42 = vld [vmem:[%s5887_s21 + $0x80] sm:$0xff]  ;;  %v1579_v4 = vpop.permute.xlu0 %1578  ;;  %v1945_v50 = vld [vmem:[#allocation2 + $0x98] sm:$0xff] }
  0xe3   : > { %v512_v8 = vrot.slane %v443_v42, 7  ;;  %1662 = vst.msk [vmem:[#allocation2 + $0xb0] sm:$0xff] %vm927_vm8, %v1579_v4  ;;  %2171 = vmatprep.mubr.f32.mxu0 %v1945_v50  ;;  %1363 = vrot.lane.b32.xlu0 %v1282_v3, %s5651_s27  ;;  %v794_v3 = vld [vmem:[%s5887_s21 + $0x89] sm:$0x7f]  ;;  %v1052_v4 = vsel %vm487_vm1, %v6593_v55, %v1051_v5  ;;  %v446_v50 = vld [vmem:[%s5887_s21 + $0x98] sm:$0x7f] }
  0xe4   : > { %v667_v41 = vpop.permute.xlu1 %666 }
  0xe5   : > { %752 = vst.msk [vmem:[#allocation2 + $0xa8] sm:$0xff] %vm746_vm4, %v667_v41 }
  0xe6   : > { %1103 = vrot.lane.b32.xlu1 %v6533_v20, %s5650_s26  ;;  %582 = vst.msk [vmem:[#allocation2 + $0x1b0] sm:$0xfe] %vm564_vm2, %v512_v8  ;;  %v1760_v31 = vpop.permute.xlu0 %1759  ;;  %v514_v20 = vsel %vm487_vm1, %v512_v8, %v513_v35  ;;  %v5076_v8 = vld [vmem:[%s5887_s21 + $0xb9] sm:$0x7f] }
  0xe7   : > { %1842 = vst.msk [vmem:[#allocation2 + $0xb0] sm:$0xff] %vm1169_vm9, %v1760_v31  ;;  %1598 = vrot.lane.b32.xlu0 %v1545_v58, %s5652_s25 }
  0xe8   : > { %v848_v6 = vpop.permute.xlu1 %847  ;;  %v1944_v7 = vld [vmem:[#allocation2 + $0x90] sm:$0xff]  ;;  %583 = vst.msk [vmem:[#allocation2 + $0x1c8] sm:$0xff] %vm566_vm0, %v514_v20 }
  0xe9   : > { %934 = vst.msk [vmem:[#allocation2 + $0xa8] sm:$0x7f] %vm929_vm10, %v848_v6  ;;  %2172 = vmatmul.mubr.f32.gmra.mrb[12].mxu0 %v1944_v7  ;;  %v6689_v6 = vld [vmem:[%s5887_s21 + $0xf1] sm:$0xff]  ;;  %v516_v7 = vrot.slane %v446_v50, 7  ;;  %v5018_v50 = vld [vmem:[%s5887_s21 + $0xc8] sm:$0x7f] }
  0xea   : > { %686 = vrot.lane.b32.xlu1 %v6115_v25, %s5651_s27  ;;  %v1346_v25 = vpop.permute.xlu0 %1345  ;;  %1924 = vst.msk [vmem:[#allocation2 + $0x2b0] sm:$0xff] %vm566_vm0, %v6689_v6 }
  0xeb   : > { %1434 = vst.msk [vmem:[#allocation2 + $0xc8] sm:$0xff] %vm746_vm4, %v1346_v25  ;;  %1779 = vrot.lane.b32.xlu0 %v6292_v53, %s5650_s26 }
  0xec   : > { %v1086_v15 = vpop.permute.xlu1 %1085  ;;  %1917 = vst.msk [vmem:[#allocation2 + $0x208] sm:$0x7f] %vm1896_vm3, %v5076_v8 }
  0xed   : > { %1176 = vst.msk [vmem:[#allocation2 + $0xa8] sm:$0xff] %vm1169_vm9, %v1086_v15 }
  0xee   : > { %867 = vrot.lane.b32.xlu1 %v792_v14, %s5652_s25  ;;  %v1581_v39 = vpop.permute.xlu0 %1580  ;;  %v1948_v43 = vld [vmem:[#allocation2 + $0xb0] sm:$0xff]  ;;  %v6703_v14 = vrot.slane %v6384_v30, 7 }
  0xef   : > { %1663 = vst.msk [vmem:[#allocation2 + $0xc8] sm:$0xfe] %vm1654_vm7, %v1581_v39  ;;  %2176 = vmatprep.mubr.f32.mxu0 %v1948_v43  ;;  %1365 = vrot.lane.b32.xlu0 %v6304_v57, %s5651_s27 }
  0xf0   : > { %v669_v32 = vpop.permute.xlu1 %668 }
  0xf1   : > { %753 = vst.msk [vmem:[#allocation2 + $0xc0] sm:$0xff] %vm746_vm4, %v669_v32  ;;  %v1988_v32 = vld [vmem:[#allocation2 + $0x1f0] sm:$0xff] }
  0xf2   : > { %1105 = vrot.lane.b32.xlu1 %v1049_v34, %s5650_s26  ;;  %v1762_v44 = vpop.permute.xlu0 %1761  ;;  %5253 = vmatprep.mubr.f32.mxu1 %v1988_v32 }
  0xf3   : > { %1843 = vst.msk [vmem:[#allocation2 + $0xc8] sm:$0xff] %vm1169_vm9, %v1762_v44  ;;  %1600 = vrot.lane.b32.xlu0 %v6648_v13, %s5652_s25  ;;  %v1991_v34 = vld [vmem:[#allocation2 + $0x208] sm:$0xff] }
  0xf4   : > { %v850_v16 = vpop.permute.xlu1 %849  ;;  %v1947_v51 = vld [vmem:[#allocation2 + $0xa8] sm:$0xff]  ;;  %5254 = vmatmul.mubr.f32.gmra.mrb[20].mxu1 %v1991_v34 }
  0xf5   : > { %935 = vst.msk [vmem:[#allocation2 + $0xc0] sm:$0xff] %vm927_vm8, %v850_v16  ;;  %2177 = vmatmul.mubr.f32.gmra.mrb[14].mxu0 %v1947_v51 }
  0xf6   : > { %688 = vrot.lane.b32.xlu1 %v6156_v48, %s5651_s27  ;;  %v1348_v24 = vpop.permute.xlu0 %1347  ;;  %v5014_v48 = vld [vmem:[%s5887_s21 + $0xa8] sm:$0x7f] }
  0xf7   : > { %1435 = vst.msk [vmem:[#allocation2 + $0xe0] sm:$0x7f] %vm1426_vm5, %v1348_v24  ;;  %1781 = vrot.lane.b32.xlu0 %v6316_v61, %s5650_s26  ;;  %v1547_v52 = vrot.slane %v5014_v48, 7  ;;  %v796_v24 = vld [vmem:[%s5887_s21 + $0x99] sm:$0x7f] }
  0xf8   : > { %v1088_v45 = vpop.permute.xlu1 %1087 }
  0xf9   : > { %1177 = vst.msk [vmem:[#allocation2 + $0xc0] sm:$0xfe] %vm1167_vm6, %v1088_v45  ;;  %v1548_v1 = vsel %vm487_vm1, %v6648_v13, %v1547_v52  ;;  %v980_v45 = vld [vmem:[%s5887_s21 + $0xa8] sm:$0x7f] }
  0xfa   : > { %869 = vrot.lane.b32.xlu1 %v6238_v19, %s5652_s25  ;;  %v445_v19 = vld [vmem:[%s5887_s21 + $0x90] sm:$0xff]  ;;  %v1583_v54 = vpop.permute.xlu0 %1582  ;;  %v1951_v59 = vld [vmem:[#allocation2 + $0xc8] sm:$0xff] }
  0xfb   : > { %v515_v63 = vrot.slane %v445_v19, 7  ;;  %1664 = vst.msk [vmem:[#allocation2 + $0xe0] sm:$0xff] %vm927_vm8, %v1583_v54  ;;  %2181 = vmatprep.mubr.f32.mxu0 %v1951_v59  ;;  %1367 = vrot.lane.b32.xlu0 %v1284_v49, %s5651_s27  ;;  %v448_v19 = vld [vmem:[%s5887_s21 + $0xa8] sm:$0x7f] }
  0xfc   : > { %v671_v47 = vpop.permute.xlu1 %670  ;;  %v519_v54 = vrot.slane %v448_v19, 7  ;;  %v2000_v19 = vld [vmem:[#allocation2 + $0x250] sm:$0xff] }
  0xfd   : > { %754 = vst.msk [vmem:[#allocation2 + $0xd8] sm:$0xff] %vm746_vm4, %v671_v47  ;;  %v517_v15 = vsel %vm487_vm1, %v515_v63, %v516_v7  ;;  %v1054_v47 = vrot.slane %v980_v45, 7 }
  0xfe   : > { %1107 = vrot.lane.b32.xlu1 %v6593_v55, %s5650_s26  ;;  %584 = vst.msk [vmem:[#allocation2 + $0x1e0] sm:$0xfe] %vm564_vm2, %v515_v63  ;;  %v1764_v41 = vpop.permute.xlu0 %1763 }
  0xff   : > { %1844 = vst.msk [vmem:[#allocation2 + $0xe0] sm:$0xff] %vm1169_vm9, %v1764_v41  ;;  %1602 = vrot.lane.b32.xlu0 %v1548_v1, %s5652_s25  ;;  %v6753_v1 = vrot.slane %v6450_v60, 7 }
 0x100   : > { %v852_v12 = vpop.permute.xlu1 %851  ;;  %v1950_v62 = vld [vmem:[#allocation2 + $0xc0] sm:$0xff]  ;;  %585 = vst.msk [vmem:[#allocation2 + $0x1f8] sm:$0xff] %vm566_vm0, %v517_v15 }
 0x101   : > { %936 = vst.msk [vmem:[#allocation2 + $0xd8] sm:$0x7f] %vm929_vm10, %v852_v12  ;;  %2182 = vmatmul.mubr.f32.gmra.mrb[16].mxu0 %v1950_v62  ;;  %v5078_v12 = vld [vmem:[%s5887_s21 + $0xc9] sm:$0x7f] }
 0x102   : > { %690 = vrot.lane.b32.xlu1 %v6225_v29, %s5651_s27  ;;  %v1350_v42 = vpop.permute.xlu0 %1349  ;;  %1919 = vst.msk [vmem:[#allocation2 + $0x238] sm:$0x7f] %vm1896_vm3, %v5078_v12  ;;  %v5020_v12 = vld [vmem:[%s5887_s21 + $0xd8] sm:$0x7f] }
 0x103   : > { %1436 = vst.msk [vmem:[#allocation2 + $0xf8] sm:$0xff] %vm746_vm4, %v1350_v42  ;;  %1783 = vrot.lane.b32.xlu0 %v6360_v11, %s5650_s26  ;;  %v1994_v42 = vld [vmem:[#allocation2 + $0x220] sm:$0xff] }
 0x104   : > { %v1090_v18 = vpop.permute.xlu1 %1089  ;;  %5256 = vmatprep.mubr.f32.mxu1 %v1994_v42  ;;  %v984_v42 = vld [vmem:[%s5887_s21 + $0xc8] sm:$0x7f] }
 0x105   : > { %1178 = vst.msk [vmem:[#allocation2 + $0xd8] sm:$0xff] %vm1169_vm9, %v1090_v18 }
 0x106   : > { %871 = vrot.lane.b32.xlu1 %v794_v3, %s5652_s25  ;;  %v1585_v9 = vpop.permute.xlu0 %1584  ;;  %v1954_v55 = vld [vmem:[#allocation2 + $0xe0] sm:$0xff] }
 0x107   : > { %1665 = vst.msk [vmem:[#allocation2 + $0xf8] sm:$0xfe] %vm1654_vm7, %v1585_v9  ;;  %2186 = vmatprep.mubr.f32.mxu0 %v1954_v55  ;;  %1369 = vrot.lane.b32.xlu0 %v6372_v22, %s5651_s27  ;;  %v1553_v9 = vrot.slane %v5018_v50, 7  ;;  %v449_v55 = vld [vmem:[%s5887_s21 + $0xb0] sm:$0xff] }
 0x108   : > { %v673_v29 = vpop.permute.xlu1 %672 }
 0x109   : > { %755 = vst.msk [vmem:[#allocation2 + $0xf0] sm:$0xff] %vm746_vm4, %v673_v29  ;;  %v1997_v29 = vld [vmem:[#allocation2 + $0x238] sm:$0xff] }
 0x10a   : > { %1109 = vrot.lane.b32.xlu1 %v1052_v4, %s5650_s26  ;;  %v1766_v21 = vpop.permute.xlu0 %1765  ;;  %5257 = vmatmul.mubr.f32.gmra.mrb[22].mxu1 %v1997_v29 }
 0x10b   : > { %1845 = vst.msk [vmem:[#allocation2 + $0xf8] sm:$0xff] %vm1169_vm9, %v1766_v21  ;;  %1604 = vrot.lane.b32.xlu0 %v6703_v14, %s5652_s25  ;;  %5259 = vmatprep.mubr.f32.mxu1 %v2000_v19 }
 0x10c   : > { %v854_v58 = vpop.permute.xlu1 %853  ;;  %v1953_v31 = vld [vmem:[#allocation2 + $0xd8] sm:$0xff] }
 0x10d   : > { %937 = vst.msk [vmem:[#allocation2 + $0xf0] sm:$0xff] %vm927_vm8, %v854_v58  ;;  %2187 = vmatmul.mubr.f32.gmra.mrb[18].mxu0 %v1953_v31 }
 0x10e   : > { %692 = vrot.lane.b32.xlu1 %v6250_v38, %s5651_s27  ;;  %v1352_v10 = vpop.permute.xlu0 %1351  ;;  %v5016_v38 = vld [vmem:[%s5887_s21 + $0xb8] sm:$0x7f] }
 0x10f   : > { %1437 = vst.msk [vmem:[#allocation2 + $0x110] sm:$0x7f] %vm1426_vm5, %v1352_v10  ;;  %1785 = vrot.lane.b32.xlu0 %v6384_v30, %s5650_s26  ;;  %v1550_v39 = vrot.slane %v5016_v38, 7  ;;  %v982_v10 = vld [vmem:[%s5887_s21 + $0xb8] sm:$0x7f] }
 0x110   : > { %v1092_v25 = vpop.permute.xlu1 %1091 }
 0x111   : > { %1179 = vst.msk [vmem:[#allocation2 + $0xf0] sm:$0xfe] %vm1167_vm6, %v1092_v25  ;;  %v1551_v36 = vsel %vm487_vm1, %v6703_v14, %v1550_v39  ;;  %v521_v25 = vrot.slane %v449_v55, 7  ;;  %v1057_v39 = vrot.slane %v982_v10, 7 }
 0x112   : > { %873 = vrot.lane.b32.xlu1 %v6304_v57, %s5652_s25  ;;  %v447_v57 = vld [vmem:[%s5887_s21 + $0xa0] sm:$0xff]  ;;  %v1587_v16 = vpop.permute.xlu0 %1586  ;;  %v1957_v51 = vld [vmem:[#allocation2 + $0xf8] sm:$0xff] }
 0x113   : > { %v518_v44 = vrot.slane %v447_v57, 7  ;;  %1666 = vst.msk [vmem:[#allocation2 + $0x110] sm:$0xff] %vm927_vm8, %v1587_v16  ;;  %2191 = vmatprep.mubr.f32.mxu0 %v1957_v51  ;;  %1371 = vrot.lane.b32.xlu0 %v1286_v37, %s5651_s27  ;;  %v798_v37 = vld [vmem:[%s5887_s21 + $0xa9] sm:$0x7f]  ;;  %v450_v51 = vld [vmem:[%s5887_s21 + $0xb8] sm:$0x7f] }
 0x114   : > { %v675_v35 = vpop.permute.xlu1 %674  ;;  %588 = vst.msk [vmem:[#allocation2 + $0x240] sm:$0xfe] %vm564_vm2, %v521_v25 }
 0x115   : > { %756 = vst.msk [vmem:[#allocation2 + $0x108] sm:$0xff] %vm746_vm4, %v675_v35  ;;  %v520_v0 = vsel %vm487_vm1, %v518_v44, %v519_v54  ;;  %v1554_v35 = vsel %vm487_vm1, %v6753_v1, %v1553_v9 }
 0x116   : > { %1111 = vrot.lane.b32.xlu1 %v6648_v13, %s5650_s26  ;;  %586 = vst.msk [vmem:[#allocation2 + $0x210] sm:$0xfe] %vm564_vm2, %v518_v44  ;;  %v1768_v17 = vpop.permute.xlu0 %1767  ;;  %v5080_v44 = vld [vmem:[%s5887_s21 + $0xd9] sm:$0x7f] }
 0x117   : > { %1846 = vst.msk [vmem:[#allocation2 + $0x110] sm:$0xff] %vm1169_vm9, %v1768_v17  ;;  %1606 = vrot.lane.b32.xlu0 %v1551_v36, %s5652_s25 }
 0x118   : > { %v856_v43 = vpop.permute.xlu1 %855  ;;  %v1956_v20 = vld [vmem:[#allocation2 + $0xf0] sm:$0xff]  ;;  %587 = vst.msk [vmem:[#allocation2 + $0x228] sm:$0xff] %vm566_vm0, %v520_v0  ;;  %v451_v0 = vld [vmem:[%s5887_s21 + $0xc0] sm:$0xff] }
 0x119   : > { %938 = vst.msk [vmem:[#allocation2 + $0x108] sm:$0x7f] %vm929_vm10, %v856_v43  ;;  %2192 = vmatmul.mubr.f32.gmra.mrb[20].mxu0 %v1956_v20  ;;  %v522_v20 = vrot.slane %v450_v51, 7  ;;  %v524_v29 = vrot.slane %v451_v0, 7 }
 0x11a   : > { %694 = vrot.lane.b32.xlu1 %v6292_v53, %s5651_s27  ;;  %v1354_v49 = vpop.permute.xlu0 %1353  ;;  %v1055_v53 = vsel %vm487_vm1, %v6648_v13, %v1054_v47  ;;  %1921 = vst.msk [vmem:[#allocation2 + $0x268] sm:$0x7f] %vm1896_vm3, %v5080_v44  ;;  %v6815_v47 = vrot.slane %v6515_v56, 7 }
 0x11b   : > { %1438 = vst.msk [vmem:[#allocation2 + $0x128] sm:$0xff] %vm746_vm4, %v1354_v49  ;;  %1787 = vrot.lane.b32.xlu0 %v6431_v27, %s5650_s26 }
 0x11c   : > { %v1094_v48 = vpop.permute.xlu1 %1093  ;;  %590 = vst.msk [vmem:[#allocation2 + $0x270] sm:$0xfe] %vm564_vm2, %v524_v29 }
 0x11d   : > { %1180 = vst.msk [vmem:[#allocation2 + $0x108] sm:$0xff] %vm1169_vm9, %v1094_v48 }
 0x11e   : > { %875 = vrot.lane.b32.xlu1 %v796_v24, %s5652_s25  ;;  %v1589_v59 = vpop.permute.xlu0 %1588  ;;  %v1960_v62 = vld [vmem:[#allocation2 + $0x110] sm:$0xff]  ;;  %v523_v24 = vsel %vm487_vm1, %v521_v25, %v522_v20  ;;  %v452_v25 = vld [vmem:[%s5887_s21 + $0xc8] sm:$0x7f] }
 0x11f   : > { %1667 = vst.msk [vmem:[#allocation2 + $0x128] sm:$0xfe] %vm1654_vm7, %v1589_v59  ;;  %2196 = vmatprep.mubr.f32.mxu0 %v1960_v62  ;;  %1373 = vrot.lane.b32.xlu0 %v6443_v26, %s5651_s27  ;;  %v1290_v62 = vld [vmem:[%s5887_s21 + $0xc9] sm:$0x7f]  ;;  %v525_v10 = vrot.slane %v452_v25, 7  ;;  %v5023_v25 = vld [vmem:[%s5887_s21 + $0xf0] sm:$0xff] }
 0x120   : > { %v677_v52 = vpop.permute.xlu1 %676  ;;  %589 = vst.msk [vmem:[#allocation2 + $0x258] sm:$0xff] %vm566_vm0, %v523_v24  ;;  %v5022_v20 = vld [vmem:[%s5887_s21 + $0xe8] sm:$0x7f] }
 0x121   : > { %757 = vst.msk [vmem:[#allocation2 + $0x120] sm:$0xff] %vm746_vm4, %v677_v52  ;;  %v1559_v24 = vrot.slane %v5022_v20, 7  ;;  %v4183_v20 = vld [vmem:[%s8788_s3 + $0x48] sm:$0xff] }
 0x122   : > { %1113 = vrot.lane.b32.xlu1 %v1055_v53, %s5650_s26  ;;  %v1770_v18 = vpop.permute.xlu0 %1769 }
 0x123   : > { %1847 = vst.msk [vmem:[#allocation2 + $0x128] sm:$0xff] %vm1169_vm9, %v1770_v18  ;;  %1608 = vrot.lane.b32.xlu0 %v6753_v1, %s5652_s25 }
 0x124   : > { %v858_v13 = vpop.permute.xlu1 %857  ;;  %v1959_v63 = vld [vmem:[#allocation2 + $0x108] sm:$0xff] }
 0x125   : > { %939 = vst.msk [vmem:[#allocation2 + $0x120] sm:$0xff] %vm927_vm8, %v858_v13  ;;  %2197 = vmatmul.mubr.f32.gmra.mrb[22].mxu0 %v1959_v63  ;;  %v1556_v13 = vrot.slane %v5020_v12, 7 }
 0x126   : > { %696 = vrot.lane.b32.xlu1 %v6316_v61, %s5651_s27  ;;  %v1356_v4 = vpop.permute.xlu0 %1355 }
 0x127   : > { %1439 = vst.msk [vmem:[#allocation2 + $0x140] sm:$0x7f] %vm1426_vm5, %v1356_v4  ;;  %1789 = vrot.lane.b32.xlu0 %v6450_v60, %s5650_s26  ;;  %v1557_v4 = vsel %vm487_vm1, %v6815_v47, %v1556_v13  ;;  %v4176_v13 = vld [vmem:[%s8788_s3 + $0x10] sm:$0xff] }
 0x128   : > { %v6758_v41 = vpop.f32.mrb[0].mxu1  ;;  %v1096_v5 = vpop.permute.xlu1 %1095 }
 0x129   : > { %v6760_v3 = vpop.f32.mrb[1].mxu1  ;;  %1181 = vst.msk [vmem:[#allocation2 + $0x120] sm:$0xfe] %vm1167_vm6, %v1096_v5 }
 0x12a   : > { %877 = vrot.lane.b32.xlu1 %v6372_v22, %s5652_s25  ;;  %v1288_v22 = vld [vmem:[%s5887_s21 + $0xb9] sm:$0x7f]  ;;  %v1591_v31 = vpop.permute.xlu0 %1590  ;;  %v1963_v15 = vld [vmem:[#allocation2 + $0x128] sm:$0xff] }
 0x12b   : > { %1668 = vst.msk [vmem:[#allocation2 + $0x140] sm:$0xff] %vm927_vm8, %v1591_v31  ;;  %2201 = vmatprep.mubr.f32.mxu0 %v1963_v15  ;;  %1375 = vrot.lane.b32.xlu0 %v1288_v22, %s5651_s27  ;;  %v1060_v22 = vrot.slane %v984_v42, 7  ;;  %v6861_v15 = vld [vmem:[%s5887_s21 + $0xe0] sm:$0xff] }
 0x12c   : > { %v6768_v61 = vpop.f32.mrb[2].mxu1  ;;  %v679_v8 = vpop.permute.xlu1 %678 }
 0x12d   : > { %v6771_v7 = vpop.f32.mrb[3].mxu1  ;;  %758 = vst.msk [vmem:[#allocation2 + $0x138] sm:$0xff] %vm746_vm4, %v679_v8  ;;  %v800_v8 = vld [vmem:[%s5887_s21 + $0xb9] sm:$0x7f]  ;;  %v1061_v55 = vsel %vm487_vm1, %v6753_v1, %v1060_v22 }
 0x12e   : > { %1115 = vrot.lane.b32.xlu1 %v6703_v14, %s5650_s26  ;;  %v1772_v38 = vpop.permute.xlu0 %1771 }
 0x12f   : > { %1848 = vst.msk [vmem:[#allocation2 + $0x140] sm:$0xff] %vm1169_vm9, %v1772_v38  ;;  %1610 = vrot.lane.b32.xlu0 %v1554_v35, %s5652_s25  ;;  %v5082_v35 = vld [vmem:[%s5887_s21 + $0xe9] sm:$0x7f] }
 0x130   : > { %v6780_v58 = vpop.f32.mrb[4].mxu1  ;;  %v860_v32 = vpop.permute.xlu1 %859  ;;  %v1962_v34 = vld [vmem:[#allocation2 + $0x120] sm:$0xff]  ;;  %1923 = vst.msk [vmem:[#allocation2 + $0x298] sm:$0x7f] %vm1896_vm3, %v5082_v35 }
 0x131   : > { %v6783_v21 = vpop.f32.mrb[5].mxu1  ;;  %940 = vst.msk [vmem:[#allocation2 + $0x138] sm:$0x7f] %vm929_vm10, %v860_v32  ;;  %2202 = vmatmul.mubr.f32.gmra.mrb[24].mxu0 %v1962_v34 }
 0x132   : > { %698 = vrot.lane.b32.xlu1 %v6360_v11, %s5651_s27  ;;  %v1358_v16 = vpop.permute.xlu0 %1357  ;;  %v1058_v11 = vsel %vm487_vm1, %v6703_v14, %v1057_v39  ;;  %v526_v39 = vsel %vm487_vm1, %v524_v29, %v525_v10 }
 0x133   : > { %1440 = vst.msk [vmem:[#allocation2 + $0x158] sm:$0xff] %vm746_vm4, %v1358_v16  ;;  %1791 = vrot.lane.b32.xlu0 %v6494_v46, %s5650_s26 }
 0x134   : > { %v1098_v57 = vpop.permute.xlu1 %1097  ;;  %v6820_v48 = vpop.f32.mrb[6].mxu1  ;;  %591 = vst.msk [vmem:[#allocation2 + $0x288] sm:$0xff] %vm566_vm0, %v526_v39 }
 0x135   : > { %1182 = vst.msk [vmem:[#allocation2 + $0x138] sm:$0xff] %vm1169_vm9, %v1098_v57  ;;  %v6822_v53 = vpop.f32.mrb[7].mxu1 }
 0x136   : > { %879 = vrot.lane.b32.xlu1 %v798_v37, %s5652_s25  ;;  %v1593_v45 = vpop.permute.xlu0 %1592  ;;  %v1966_v36 = vld [vmem:[#allocation2 + $0x140] sm:$0xff]  ;;  %v6871_v37 = vrot.slane %v6861_v15, 7 }
 0x137   : > { %1669 = vst.msk [vmem:[#allocation2 + $0x158] sm:$0xfe] %vm1654_vm7, %v1593_v45  ;;  %2206 = vmatprep.mubr.f32.mxu0 %v1966_v36  ;;  %1377 = vrot.lane.b32.xlu0 %v6507_v23, %s5651_s27  ;;  %v2009_v44 = vld [vmem:[#allocation2 + $0x298] sm:$0xff]  ;;  %v4174_v36 = vld [vmem:[%s8788_s3] sm:$0xff] }
 0x138   : > { %v681_v43 = vpop.permute.xlu1 %680  ;;  %v6877_v16 = vpop.f32.mrb[8].mxu1  ;;  %v1560_v0 = vsel %vm487_vm1, %v6871_v37, %v1559_v24  ;;  %v4206_v24 = vld [vmem:[%s8788_s3 + $0x100] sm:$0xff] }
 0x139   : > { %759 = vst.msk [vmem:[#allocation2 + $0x150] sm:$0xff] %vm746_vm4, %v681_v43  ;;  %v6880_v43 = vpop.f32.mrb[9].mxu1 }
 0x13a   : > { %1117 = vrot.lane.b32.xlu1 %v1058_v11, %s5650_s26  ;;  %v1774_v49 = vpop.permute.xlu0 %1773 }
 0x13b   : > { %1849 = vst.msk [vmem:[#allocation2 + $0x158] sm:$0xff] %vm1169_vm9, %v1774_v49  ;;  %1612 = vrot.lane.b32.xlu0 %v6815_v47, %s5652_s25  ;;  %v986_v49 = vld [vmem:[%s5887_s21 + $0xd8] sm:$0x7f] }
 0x13c   : > { %v862_v14 = vpop.permute.xlu1 %861  ;;  %v1965_v17 = vld [vmem:[#allocation2 + $0x138] sm:$0xff]  ;;  %v1063_v42 = vrot.slane %v986_v49, 7 }
 0x13d   : > { %941 = vst.msk [vmem:[#allocation2 + $0x150] sm:$0xff] %vm927_vm8, %v862_v14  ;;  %2207 = vmatmul.mubr.f32.gmra.mrb[26].mxu0 %v1965_v17  ;;  %v1292_v17 = vld [vmem:[%s5887_s21 + $0xd9] sm:$0x7f] }
 0x13e   : > { %700 = vrot.lane.b32.xlu1 %v6384_v30, %s5651_s27  ;;  %v2003_v30 = vld [vmem:[#allocation2 + $0x268] sm:$0xff]  ;;  %v1360_v54 = vpop.permute.xlu0 %1359 }
 0x13f   : > { %5260 = vmatmul.mubr.f32.gmra.mrb[24].mxu1 %v2003_v30  ;;  %1441 = vst.msk [vmem:[#allocation2 + $0x170] sm:$0x7f] %vm1426_vm5, %v1360_v54  ;;  %1793 = vrot.lane.b32.xlu0 %v6515_v56, %s5650_s26  ;;  %v6903_v30 = vld [vmem:[%s5887_s21 + $0xe0] sm:$0xff]  ;;  %v6906_v54 = vld [vmem:[%s5887_s21 + $0xd0] sm:$0xff] }
 0x140   : > { %v1100_v52 = vpop.permute.xlu1 %1099  ;;  %1261 = vst.msk [vmem:[#allocation2 + $0x2a8] sm:$0xff] %vm566_vm0, %v6903_v30 }
 0x141   : > { %1183 = vst.msk [vmem:[#allocation2 + $0x150] sm:$0xfe] %vm1167_vm6, %v1100_v52 }
 0x142   : > { %881 = vrot.lane.b32.xlu1 %v6443_v26, %s5652_s25  ;;  %v1595_v26 = vpop.permute.xlu0 %1594  ;;  %v1969_v63 = vld [vmem:[#allocation2 + $0x158] sm:$0xff] }
 0x143   : > { %1670 = vst.msk [vmem:[#allocation2 + $0x170] sm:$0xff] %vm927_vm8, %v1595_v26  ;;  %2211 = vmatprep.mubr.f32.mxu0 %v1969_v63  ;;  %1379 = vrot.lane.b32.xlu0 %v1290_v62, %s5651_s27  ;;  %v527_v62 = vrot.slane %v6906_v54, 7  ;;  %v4177_v26 = vld [vmem:[%s8788_s3 + $0x18] sm:$0xff] }
 0x144   : > { %v683_v59 = vpop.permute.xlu1 %682  ;;  %v5435_v63 = vpack.c.bf16 %v4177_v26, %v4176_v13  ;;  %v4186_v26 = vld [vmem:[%s8788_s3 + $0x60] sm:$0xff] }
 0x145   : > { %760 = vst.msk [vmem:[#allocation2 + $0x168] sm:$0xff] %vm746_vm4, %v683_v59 }
 0x146   : > { %1119 = vrot.lane.b32.xlu1 %v6753_v1, %s5650_s26  ;;  %v1776_v50 = vpop.permute.xlu0 %1775  ;;  %592 = vst.msk [vmem:[#allocation2 + $0x2a0] sm:$0xfe] %vm564_vm2, %v527_v62 }
 0x147   : > { %1850 = vst.msk [vmem:[#allocation2 + $0x170] sm:$0xff] %vm1169_vm9, %v1776_v50  ;;  %1614 = vrot.lane.b32.xlu0 %v1557_v4, %s5652_s25  ;;  %v4178_v4 = vld [vmem:[%s8788_s3 + $0x20] sm:$0xff] }
 0x148   : > { %v864_v18 = vpop.permute.xlu1 %863  ;;  %v1968_v5 = vld [vmem:[#allocation2 + $0x150] sm:$0xff] }
 0x149   : > { %942 = vst.msk [vmem:[#allocation2 + $0x168] sm:$0x7f] %vm929_vm10, %v864_v18  ;;  %2212 = vmatmul.mubr.f32.gmra.mrb[28].mxu0 %v1968_v5  ;;  %v802_v5 = vld [vmem:[%s5887_s21 + $0xc9] sm:$0x7f] }
 0x14a   : > { %702 = vrot.lane.b32.xlu1 %v6431_v27, %s5651_s27  ;;  %v1362_v27 = vpop.permute.xlu0 %1361 }
 0x14b   : > { %1442 = vst.msk [vmem:[#allocation2 + $0x188] sm:$0xff] %vm746_vm4, %v1362_v27  ;;  %1795 = vrot.lane.b32.xlu0 %v6559_v33, %s5650_s26 }
 0x14c   : > { %v1102_v9 = vpop.permute.xlu1 %1101 }
 0x14d   : > { %1184 = vst.msk [vmem:[#allocation2 + $0x168] sm:$0xff] %vm1169_vm9, %v1102_v9  ;;  %v1064_v9 = vsel %vm487_vm1, %v6815_v47, %v1063_v42 }
 0x14e   : > { %883 = vrot.lane.b32.xlu1 %v800_v8, %s5652_s25  ;;  %v1597_v32 = vpop.permute.xlu0 %1596  ;;  %v1972_v34 = vld [vmem:[#allocation2 + $0x170] sm:$0xff]  ;;  %v6939_v8 = vld [vmem:[%s5887_s21 + $0xe8] sm:$0xff] }
 0x14f   : > { %1671 = vst.msk [vmem:[#allocation2 + $0x188] sm:$0xfe] %vm1654_vm7, %v1597_v32  ;;  %2216 = vmatprep.mubr.f32.mxu0 %v1972_v34  ;;  %1381 = vrot.lane.b32.xlu0 %v6572_v40, %s5651_s27  ;;  %v454_v32 = vld [vmem:[%s5887_s21 + $0xd8] sm:$0x7f] }
 0x150   : > { %v685_v31 = vpop.permute.xlu1 %684  ;;  %v528_v35 = vrot.slane %v454_v32, 7  ;;  %v4210_v32 = vld [vmem:[%s8788_s3 + $0x120] sm:$0xff] }
 0x151   : > { %761 = vst.msk [vmem:[#allocation2 + $0x180] sm:$0xff] %vm746_vm4, %v685_v31  ;;  %v4181_v31 = vld [vmem:[%s8788_s3 + $0x38] sm:$0xff] }
 0x152   : > { %1121 = vrot.lane.b32.xlu1 %v1061_v55, %s5650_s26  ;;  %v1778_v57 = vpop.permute.xlu0 %1777  ;;  %v4180_v55 = vld [vmem:[%s8788_s3 + $0x30] sm:$0xff] }
 0x153   : > { %1851 = vst.msk [vmem:[#allocation2 + $0x188] sm:$0xff] %vm1169_vm9, %v1778_v57  ;;  %1616 = vrot.lane.b32.xlu0 %v6871_v37, %s5652_s25  ;;  %v1230_v57 = vld [vmem:[%s5887_s21 + $0xe8] sm:$0xff] }
 0x154   : > { %v866_v1 = vpop.permute.xlu1 %865  ;;  %v1971_v38 = vld [vmem:[#allocation2 + $0x168] sm:$0xff]  ;;  %1262 = vst.msk [vmem:[#allocation2 + $0x2c0] sm:$0xff] %vm566_vm0, %v1230_v57 }
 0x155   : > { %943 = vst.msk [vmem:[#allocation2 + $0x180] sm:$0xff] %vm927_vm8, %v866_v1  ;;  %2217 = vmatmul.mubr.f32.gmra.mrb[30].mxu0 %v1971_v38  ;;  %v5084_v1 = vld [vmem:[%s5887_s21 + $0xf9] sm:$0x7f] }
 0x156   : > { %704 = vrot.lane.b32.xlu1 %v6450_v60, %s5651_s27  ;;  %v2006_v60 = vld [vmem:[#allocation2 + $0x280] sm:$0xff]  ;;  %v1364_v51 = vpop.permute.xlu0 %1363  ;;  %1925 = vst.msk [vmem:[#allocation2 + $0x2c8] sm:$0x7f] %vm1896_vm3, %v5084_v1 }
 0x157   : > { %5262 = vmatprep.mubr.f32.mxu1 %v2006_v60  ;;  %1443 = vst.msk [vmem:[#allocation2 + $0x1a0] sm:$0x7f] %vm1426_vm5, %v1364_v51  ;;  %1797 = vrot.lane.b32.xlu0 %v6861_v15, %s5650_s26  ;;  %v6968_v60 = vrot.slane %v5023_v25, 7  ;;  %v529_v51 = vsel %vm487_vm1, %v527_v62, %v528_v35 }
 0x158   : > { %v1104_v11 = vpop.permute.xlu1 %1103  ;;  %5263 = vmatmul.mubr.f32.gmra.mrb[26].mxu1 %v2009_v44  ;;  %593 = vst.msk [vmem:[#allocation2 + $0x2b8] sm:$0xff] %vm566_vm0, %v529_v51  ;;  %v4190_v51 = vld [vmem:[%s8788_s3 + $0x80] sm:$0xff] }
 0x159   : > { %1185 = vst.msk [vmem:[#allocation2 + $0x180] sm:$0xfe] %vm1167_vm6, %v1104_v11  ;;  %v4182_v11 = vld [vmem:[%s8788_s3 + $0x40] sm:$0xff] }
 0x15a   : > { %885 = vrot.lane.b32.xlu1 %v6507_v23, %s5652_s25  ;;  %v4175_v23 = vld [vmem:[%s8788_s3 + $0x8] sm:$0xff]  ;;  %v1599_v52 = vpop.permute.xlu0 %1598  ;;  %v5444_v44 = vpack.c.bf16 %v4183_v20, %v4182_v11  ;;  %v1231_v11 = vld [vmem:[%s5887_s21 + $0xf0] sm:$0xff] }
 0x15b   : > { %v5432_v14 = vpack.c.bf16 %v4175_v23, %v4174_v36  ;;  %v1975_v19 = vld [vmem:[#allocation2 + $0x188] sm:$0xff]  ;;  %1672 = vst.msk [vmem:[#allocation2 + $0x1a0] sm:$0xff] %vm927_vm8, %v1599_v52  ;;  %1383 = vrot.lane.b32.xlu0 %v1292_v17, %s5651_s27  ;;  %v4184_v17 = vld [vmem:[%s8788_s3 + $0x50] sm:$0xff] }
 0x15c   : > { %v687_v45 = vpop.permute.xlu1 %686  ;;  %2221 = vmatprep.mubr.f32.mxu0 %v1975_v19  ;;  %v4207_v52 = vld [vmem:[%s8788_s3 + $0x108] sm:$0xff]  ;;  %v2012_v19 = vld [vmem:[#allocation2 + $0x2b0] sm:$0xff]  ;;  %1263 = vst.msk [vmem:[#allocation2 + $0x2d8] sm:$0xff] %vm566_vm0, %v1231_v11 }
 0x15d   : > { %762 = vst.msk [vmem:[#allocation2 + $0x198] sm:$0xff] %vm746_vm4, %v687_v45  ;;  %5433 = vmatpush1.bf16.msra.mxu1 %v5432_v14  ;;  %v7001_v54 = vpack.c.bf16 %v4207_v52, %v4206_v24  ;;  %5265 = vmatprep.mubr.f32.mxu1 %v2012_v19  ;;  %v2015_v62 = vld [vmem:[#allocation2 + $0x2c8] sm:$0xff]  ;;  %v4196_v11 = vld [vmem:[%s8788_s3 + $0xb0] sm:$0xff] }
 0x15e   : > { %1123 = vrot.lane.b32.xlu1 %v6815_v47, %s5650_s26  ;;  %5434 = vmatprep.subr.bf16.mxu1 %v5648_v2  ;;  %v1780_v18 = vpop.permute.xlu0 %1779  ;;  %v5441_v47 = vpack.c.bf16 %v4181_v31, %v4180_v55  ;;  %v4188_v31 = vld [vmem:[%s8788_s3 + $0x70] sm:$0xff]  ;;  %v4191_v20 = vld [vmem:[%s8788_s3 + $0x88] sm:$0xff] }
 0x15f   : > { %1852 = vst.msk [vmem:[#allocation2 + $0x1a0] sm:$0xff] %vm1169_vm9, %v1780_v18  ;;  %1618 = vrot.lane.b32.xlu0 %v1560_v0, %s5652_s25  ;;  %5480 = vmatprep.subr.bf16.mxu0 %v7001_v54  ;;  %v4209_v18 = vld [vmem:[%s8788_s3 + $0x118] sm:$0xff] }
 0x160   : > { %v868_v12 = vpop.permute.xlu1 %867  ;;  %v1974_v59 = vld [vmem:[#allocation2 + $0x180] sm:$0xff]  ;;  %5266 = vmatmul.mubr.f32.gmra.mrb[28].mxu1 %v2015_v62  ;;  %5482 = vmatpush3.bf16.msra.mxu0 %v7001_v54 }
 0x161   : > { %944 = vst.msk [vmem:[#allocation2 + $0x198] sm:$0x7f] %vm929_vm10, %v868_v12  ;;  %2222 = vmatmul.mubr.f32.gmra.mrb[32].mxu0 %v1974_v59  ;;  %5436 = vmatpush1.bf16.msra.mxu1 %v5435_v63  ;;  %v5024_v59 = vld [vmem:[%s5887_s21 + $0xf8] sm:$0x7f]  ;;  %v4208_v63 = vld [vmem:[%s8788_s3 + $0x110] sm:$0xff] }
 0x162   : > { %706 = vrot.lane.b32.xlu1 %v6494_v46, %s5651_s27  ;;  %5437 = vmatprep.subr.bf16.mxu1 %v5648_v2  ;;  %v4179_v46 = vld [vmem:[%s8788_s3 + $0x28] sm:$0xff]  ;;  %v1366_v22 = vpop.permute.xlu0 %1365  ;;  %v1562_v42 = vrot.slane %v5024_v59, 7 }
 0x163   : > { %v5438_v50 = vpack.c.bf16 %v4179_v46, %v4178_v4  ;;  %1444 = vst.msk [vmem:[#allocation2 + $0x1b8] sm:$0xff] %vm746_vm4, %v1366_v22  ;;  %1799 = vrot.lane.b32.xlu0 %v6939_v8, %s5650_s26  ;;  %v530_v22 = vrot.slane %v6903_v30, 7  ;;  %v4194_v30 = vld [vmem:[%s8788_s3 + $0xa0] sm:$0xff] }
 0x164   : > { %v1106_v29 = vpop.permute.xlu1 %1105 }
 0x165   : > { %1186 = vst.msk [vmem:[#allocation2 + $0x198] sm:$0xff] %vm1169_vm9, %v1106_v29  ;;  %5439 = vmatpush1.bf16.msra.mxu1 %v5438_v50  ;;  %v7024_v29 = vpack.c.bf16 %v4209_v18, %v4208_v63  ;;  %v988_v50 = vld [vmem:[%s5887_s21 + $0xe8] sm:$0x7f] }
 0x166   : > { %887 = vrot.lane.b32.xlu1 %v802_v5, %s5652_s25  ;;  %5440 = vmatprep.subr.bf16.mxu1 %v5648_v2  ;;  %v1601_v34 = vpop.permute.xlu0 %1600  ;;  %v1978_v10 = vld [vmem:[#allocation2 + $0x1a0] sm:$0xff]  ;;  %v1294_v5 = vld [vmem:[%s5887_s21 + $0xe9] sm:$0x7f]  ;;  %v1066_v57 = vrot.slane %v988_v50, 7 }
 0x167   : > { %1673 = vst.msk [vmem:[#allocation2 + $0x1b8] sm:$0xfe] %vm1654_vm7, %v1601_v34  ;;  %2226 = vmatprep.mubr.f32.mxu0 %v1978_v10  ;;  %1385 = vrot.lane.b32.xlu0 %v6627_v28, %s5651_s27  ;;  %v4211_v34 = vld [vmem:[%s8788_s3 + $0x128] sm:$0xff]  ;;  %v1563_v10 = vsel %vm487_vm1, %v6968_v60, %v1562_v42 }
 0x168   : > { %v689_v27 = vpop.permute.xlu1 %688  ;;  %5484 = vmatprep.subr.bf16.mxu0 %v7024_v29  ;;  %v7052_v35 = vpack.c.bf16 %v4211_v34, %v4210_v32  ;;  %v4215_v18 = vld [vmem:[%s8788_s3 + $0x148] sm:$0xff]  ;;  %v4217_v32 = vld [vmem:[%s8788_s3 + $0x158] sm:$0xff] }
 0x169   : > { %763 = vst.msk [vmem:[#allocation2 + $0x1b0] sm:$0xff] %vm746_vm4, %v689_v27  ;;  %5442 = vmatpush1.bf16.msra.mxu1 %v5441_v47  ;;  %v4189_v47 = vld [vmem:[%s8788_s3 + $0x78] sm:$0xff]  ;;  %5486 = vmatpush3.bf16.msra.mxu0 %v7024_v29 }
 0x16a   : > { %1125 = vrot.lane.b32.xlu1 %v1064_v9, %s5650_s26  ;;  %5443 = vmatprep.subr.bf16.mxu1 %v5648_v2  ;;  %v1782_v45 = vpop.permute.xlu0 %1781  ;;  %v6978_v36 = vpop.f32.mrb[10].mxu1  ;;  %v5580_v9 = vld [vmem:[#allocation2 + $0x2d0] sm:$0xff] }
 0x16b   : > { %1853 = vst.msk [vmem:[#allocation2 + $0x1b8] sm:$0xff] %vm1169_vm9, %v1782_v45  ;;  %v6981_v14 = vpop.f32.mrb[11].mxu1  ;;  %1620 = vrot.lane.b32.xlu0 %v6968_v60, %s5652_s25  ;;  %5268 = vmatprep.mubr.f32.mxu1 %v5580_v9  ;;  %v5456_v45 = vpack.c.bf16 %v4191_v20, %v4190_v51  ;;  %v4197_v51 = vld [vmem:[%s8788_s3 + $0xb8] sm:$0xff]  ;;  %v4218_v20 = vld [vmem:[%s8788_s3 + $0x160] sm:$0xff] }
 0x16c   : > { %v870_v38 = vpop.permute.xlu1 %869  ;;  %v1977_v39 = vld [vmem:[#allocation2 + $0x198] sm:$0xff]  ;;  %594 = vst.msk [vmem:[#allocation2 + $0x2d0] sm:$0xfe] %vm564_vm2, %v530_v22  ;;  %5488 = vmatprep.subr.bf16.mxu0 %v7052_v35  ;;  %5269 = vmatmul.mubr.f32.gmra.mrb[30].mxu1 %v5580_v9 }
 0x16d   : > { %945 = vst.msk [vmem:[#allocation2 + $0x1b0] sm:$0xff] %vm927_vm8, %v870_v38  ;;  %2227 = vmatmul.mubr.f32.gmra.mrb[34].mxu0 %v1977_v39  ;;  %5445 = vmatpush1.bf16.msra.mxu1 %v5444_v44  ;;  %v7057_v38 = vld [vmem:[%s8787_s2] ss:$0 sm:$0xff]  ;;  %v804_v39 = vld [vmem:[%s5887_s21 + $0xd9] sm:$0x7f] }
 0x16e   : > { %708 = vrot.lane.b32.xlu1 %v6515_v56, %s5651_s27  ;;  %v4185_v56 = vld [vmem:[%s8788_s3 + $0x58] sm:$0xff]  ;;  %5446 = vmatprep.subr.bf16.mxu1 %v5648_v2  ;;  %v1368_v12 = vpop.permute.xlu0 %1367 }
 0x16f   : > { %v5447_v49 = vpack.c.bf16 %v4185_v56, %v4184_v17  ;;  %1445 = vst.msk [vmem:[#allocation2 + $0x1d0] sm:$0x7f] %vm1426_vm5, %v1368_v12  ;;  %1801 = vrot.lane.b32.xlu0 %v5023_v25, %s5650_s26  ;;  %v5453_v25 = vpack.c.bf16 %v4189_v47, %v4188_v31  ;;  %v4213_v17 = vld [vmem:[%s8788_s3 + $0x138] sm:$0xff]  ;;  %v1067_v12 = vsel %vm487_vm1, %v6871_v37, %v1066_v57  ;;  %v7145_v57 = vpop.f32.mrb[12].mxu1 }
 0x170   : > { %v1108_v23 = vpop.permute.xlu1 %1107  ;;  %5490 = vmatpush3.bf16.msra.mxu0 %v7052_v35 }
 0x171   : > { %1187 = vst.msk [vmem:[#allocation2 + $0x1b0] sm:$0xfe] %vm1167_vm6, %v1108_v23  ;;  %5448 = vmatpush1.bf16.msra.mxu1 %v5447_v49  ;;  %v4212_v23 = vld [vmem:[%s8788_s3 + $0x130] sm:$0xff]  ;;  %v5054_v49 = vld [vmem:[%s5887_s21 + $0xf8] sm:$0xff] }
 0x172   : > { %889 = vrot.lane.b32.xlu1 %v6572_v40, %s5652_s25  ;;  %v4187_v40 = vld [vmem:[%s8788_s3 + $0x68] sm:$0xff]  ;;  %v1603_v4 = vpop.permute.xlu0 %1602  ;;  %v1981_v46 = vld [vmem:[#allocation2 + $0x1b8] sm:$0xff]  ;;  %5449 = vmatprep.subr.bf16.mxu1 %v5648_v2  ;;  %v7084_v52 = vpack.c.bf16 %v4213_v17, %v4212_v23 }
 0x173   : > { %v5450_v0 = vpack.c.bf16 %v4187_v40, %v4186_v26  ;;  %1674 = vst.msk [vmem:[#allocation2 + $0x1d0] sm:$0xff] %vm927_vm8, %v1603_v4  ;;  %2231 = vmatprep.mubr.f32.mxu0 %v1981_v46  ;;  %1387 = vrot.lane.b32.xlu0 %v1294_v5, %s5651_s27  ;;  %v4192_v26 = vld [vmem:[%s8788_s3 + $0x90] sm:$0xff]  ;;  %v4193_v40 = vld [vmem:[%s8788_s3 + $0x98] sm:$0xff] }
 0x174   : > { %v691_v13 = vpop.permute.xlu1 %690  ;;  %5492 = vmatprep.subr.bf16.mxu0 %v7084_v52  ;;  %v5459_v63 = vpack.c.bf16 %v4193_v40, %v4192_v26 }
 0x175   : > { %764 = vst.msk [vmem:[#allocation2 + $0x1c8] sm:$0xff] %vm746_vm4, %v691_v13  ;;  %5451 = vmatpush1.bf16.msra.mxu1 %v5450_v0  ;;  %v2143_v44 = vpop.f32.mrb[0].mxu0  ;;  %v456_v13 = vld [vmem:[%s5887_s21 + $0xe8] sm:$0x7f]  ;;  %v4214_v0 = vld [vmem:[%s8788_s3 + $0x140] sm:$0xff]  ;;  %5494 = vmatpush3.bf16.msra.mxu0 %v7084_v52 }
 0x176   : > { %1127 = vrot.lane.b32.xlu1 %v6871_v37, %s5650_s26  ;;  %v1784_v1 = vpop.permute.xlu0 %1783  ;;  %5452 = vmatprep.subr.bf16.mxu1 %v5648_v2  ;;  %v2144_v56 = vadd.f32 %v7057_v38, %v2143_v44  ;;  %v2145_v24 = vpop.f32.mrb[1].mxu0  ;;  %v531_v37 = vrot.slane %v456_v13, 7  ;;  %v7110_v46 = vpack.c.bf16 %v4215_v18, %v4214_v0  ;;  %v5465_v44 = vpack.c.bf16 %v4197_v51, %v4196_v11  ;;  %v4220_v13 = vld [vmem:[%s8788_s3 + $0x170] sm:$0xff]  ;;  %v1296_v0 = vld [vmem:[%s5887_s21 + $0xf9] sm:$0x7f] }
 0x177   : > { %1854 = vst.msk [vmem:[#allocation2 + $0x1d0] sm:$0xff] %vm1169_vm9, %v1784_v1  ;;  %1622 = vrot.lane.b32.xlu0 %v1563_v10, %s5652_s25  ;;  %v4204_v51 = vld [vmem:[%s8788_s3 + $0xf0] sm:$0xff] }
 0x178   : > { %v872_v27 = vpop.permute.xlu1 %871  ;;  %v1980_v55 = vld [vmem:[#allocation2 + $0x1b0] sm:$0xff]  ;;  %v2369_v59 = vadd.f32 %v6760_v3, %v2144_v56  ;;  %5496 = vmatprep.subr.bf16.mxu0 %v7110_v46  ;;  %v806_v56 = vld [vmem:[%s5887_s21 + $0xe9] sm:$0x7f] }
 0x179   : > { %946 = vst.msk [vmem:[#allocation2 + $0x1c8] sm:$0x7f] %vm929_vm10, %v872_v27  ;;  %2232 = vmatmul.mubr.f32.gmra.mrb[36].mxu0 %v1980_v55  ;;  %5454 = vmatpush1.bf16.msra.mxu1 %v5453_v25  ;;  %v2148_v3 = vpop.f32.mrb[2].mxu0  ;;  %v532_v27 = vsel %vm487_vm1, %v530_v22, %v531_v37  ;;  %v1232_v25 = vld [vmem:[%s5887_s21 + $0xf8] sm:$0xff]  ;;  %v4216_v22 = vld [vmem:[%s8788_s3 + $0x150] sm:$0xff] }
 0x17a   : > { %710 = vrot.lane.b32.xlu1 %v6559_v33, %s5651_s27  ;;  %5455 = vmatprep.subr.bf16.mxu1 %v5648_v2  ;;  %v1370_v19 = vpop.permute.xlu0 %1369  ;;  %v2527_v5 = vmax.f32 %v2369_v59, 0.0  ;;  %v2149_v42 = vadd.f32 %v7057_v38, %v2148_v3  ;;  %v2150_v4 = vpop.f32.mrb[3].mxu0  ;;  %595 = vst.msk [vmem:[#allocation2 + $0x2e8] sm:$0xff] %vm566_vm0, %v532_v27  ;;  %1264 = vst.msk [vmem:[#allocation2 + $0x2f0] sm:$0xff] %vm566_vm0, %v1232_v25  ;;  %v7140_v10 = vpack.c.bf16 %v4217_v32, %v4216_v22  ;;  %v4198_v59 = vld [vmem:[%s8788_s3 + $0xc0] sm:$0xff] }
 0x17b   : > { %1446 = vst.msk [vmem:[#allocation2 + $0x1e8] sm:$0xff] %vm746_vm4, %v1370_v19  ;;  %1803 = vrot.lane.b32.xlu0 %v5054_v49, %s5650_s26  ;;  %5498 = vmatpush3.bf16.msra.mxu0 %v7110_v46  ;;  %v4202_v32 = vld [vmem:[%s8788_s3 + $0xe0] sm:$0xff] }
 0x17c   : > { %v1110_v33 = vpop.permute.xlu1 %1109  ;;  %2559 = vst.msk [vmem:[#allocation3] sm:$0xff] %vm566_vm0, %v2527_v5  ;;  %v2374_v55 = vadd.f32 %v6758_v41, %v2149_v42  ;;  %v4195_v41 = vld [vmem:[%s8788_s3 + $0xa8] sm:$0xff]  ;;  %5500 = vmatprep.subr.bf16.mxu0 %v7140_v10 }
 0x17d   : > { %1188 = vst.msk [vmem:[#allocation2 + $0x1c8] sm:$0xff] %vm1169_vm9, %v1110_v33  ;;  %5457 = vmatpush1.bf16.msra.mxu1 %v5456_v45  ;;  %v4219_v45 = vld [vmem:[%s8788_s3 + $0x168] sm:$0xff] }
 0x17e   : > { %891 = vrot.lane.b32.xlu1 %v804_v39, %s5652_s25  ;;  %5458 = vmatprep.subr.bf16.mxu1 %v5648_v2  ;;  %v1605_v50 = vpop.permute.xlu0 %1604  ;;  %v1984_v9 = vld [vmem:[#allocation2 + $0x1d0] sm:$0xff]  ;;  %v2528_v34 = vmax.f32 %v2374_v55, 0.0  ;;  %v990_v39 = vld [vmem:[%s5887_s21 + $0xf8] sm:$0x7f]  ;;  %v7170_v23 = vpack.c.bf16 %v4219_v45, %v4218_v20 }
 0x17f   : > { %1675 = vst.msk [vmem:[#allocation2 + $0x1e8] sm:$0xfe] %vm1654_vm7, %v1605_v50  ;;  %2236 = vmatprep.mubr.f32.mxu0 %v1984_v9  ;;  %712 = vrot.lane.b32.xlu0 %v6861_v15, %s5651_s27  ;;  %v5462_v15 = vpack.c.bf16 %v4195_v41, %v4194_v30  ;;  %v1069_v24 = vrot.slane %v990_v39, 7  ;;  %v4205_v20 = vld [vmem:[%s8788_s3 + $0xf8] sm:$0xff] }
 0x180   : > { %v693_v62 = vpop.permute.xlu1 %692  ;;  %2560 = vst.msk [vmem:[#allocation3 + $0x8] sm:$0xff] %vm566_vm0, %v2528_v34  ;;  %5502 = vmatpush3.bf16.msra.mxu0 %v7140_v10  ;;  %v4203_v34 = vld [vmem:[%s8788_s3 + $0xe8] sm:$0xff] }
 0x181   : > { %765 = vst.msk [vmem:[#allocation2 + $0x1e0] sm:$0xff] %vm746_vm4, %v693_v62  ;;  %5460 = vmatpush1.bf16.msra.mxu1 %v5459_v63  ;;  %5504 = vmatprep.subr.bf16.mxu0 %v7170_v23  ;;  %v4199_v62 = vld [vmem:[%s8788_s3 + $0xc8] sm:$0xff]  ;;  %v4221_v63 = vld [vmem:[%s8788_s3 + $0x178] sm:$0xff] }
 0x182   : > { %1129 = vrot.lane.b32.xlu1 %v1067_v12, %s5650_s26  ;;  %v1786_v1 = vpop.permute.xlu0 %1785  ;;  %5461 = vmatprep.subr.bf16.mxu1 %v5648_v2  ;;  %v5468_v37 = vpack.c.bf16 %v4199_v62, %v4198_v59  ;;  %v7199_v18 = vpack.c.bf16 %v4221_v63, %v4220_v13 }
 0x183   : > { %1855 = vst.msk [vmem:[#allocation2 + $0x1e8] sm:$0xff] %vm1169_vm9, %v1786_v1  ;;  %1389 = vrot.lane.b32.xlu0 %v6689_v6, %s5651_s27  ;;  %v7173_v49 = vld [vmem:[#allocation3] sm:$0xff]  ;;  %v2153_v12 = vpop.f32.mrb[4].mxu0 }
 0x184   : > { %v874_v31 = vpop.permute.xlu1 %873  ;;  %v1983_v47 = vld [vmem:[#allocation2 + $0x1c8] sm:$0xff]  ;;  %v2591_v6 = vld [vmem:[#allocation3] sm:$0xff]  ;;  %3388 = vst.msk [vmem:[#allocation2 + $0x8] sm:$0xff] %vm566_vm0, %v7173_v49  ;;  %v2154_v40 = vadd.f32 %v7057_v38, %v2153_v12  ;;  %v2155_v3 = vpop.f32.mrb[5].mxu0  ;;  %5506 = vmatpush3.bf16.msra.mxu0 %v7170_v23 }
 0x185   : > { %947 = vst.msk [vmem:[#allocation2 + $0x1e0] sm:$0xff] %vm927_vm8, %v874_v31  ;;  %2237 = vmatmul.mubr.f32.gmra.mrb[38].mxu0 %v1983_v47  ;;  %5463 = vmatpush1.bf16.msra.mxu1 %v5462_v15  ;;  %v2651_v26 = vrot.slane %v2591_v6, 7  ;;  %v5474_v15 = vpack.c.bf16 %v4203_v34, %v4202_v32  ;;  %v3180_v3 = vrot.slane %v7173_v49, 7 }
 0x186   : > { %893 = vrot.lane.b32.xlu1 %v6627_v28, %s5652_s25  ;;  %v7150_v28 = vpop.f32.mrb[13].mxu1  ;;  %5464 = vmatprep.subr.bf16.mxu1 %v5648_v2  ;;  %v1372_v17 = vpop.permute.xlu0 %1371  ;;  %v2379_v5 = vadd.f32 %v6771_v7, %v2154_v40  ;;  %v4200_v7 = vld [vmem:[%s8788_s3 + $0xd0] sm:$0xff] }
 0x187   : > { %1447 = vst.msk [vmem:[#allocation2 + $0x200] sm:$0x7f] %vm1426_vm5, %v1372_v17  ;;  %714 = vrot.lane.b32.xlu0 %v6939_v8, %s5651_s27  ;;  %v1070_v8 = vsel %vm487_vm1, %v6968_v60, %v1069_v24  ;;  %v7207_v27 = vld [vmem:[#allocation3 + $0x8] sm:$0xff]  ;;  %5508 = vmatprep.subr.bf16.mxu0 %v7199_v18  ;;  %v5477_v17 = vpack.c.bf16 %v4205_v20, %v4204_v51 }
 0x188   : > { %v1112_v33 = vpop.permute.xlu1 %1111  ;;  %2726 = vst.msk [vmem:[#allocation2 + $0x30] sm:$0xfe] %vm564_vm2, %v2651_v26  ;;  %v2529_v55 = vmax.f32 %v2379_v5, 0.0  ;;  %v2592_v47 = vld [vmem:[#allocation3 + $0x8] sm:$0x7f]  ;;  %5510 = vmatpush3.bf16.msra.mxu0 %v7199_v18 }
 0x189   : > { %1189 = vst.msk [vmem:[#allocation2 + $0x1e0] sm:$0xfe] %vm1167_vm6, %v1112_v33  ;;  %5466 = vmatpush1.bf16.msra.mxu1 %v5465_v44  ;;  %v2652_v30 = vrot.slane %v2592_v47, 7  ;;  %v7225_v22 = vld [vmem:[#allocation3 + $0x1] sm:$0xff] }
 0x18a   : > { %1131 = vrot.lane.b32.xlu1 %v6968_v60, %s5650_s26  ;;  %5467 = vmatprep.subr.bf16.mxu1 %v5648_v2  ;;  %v1607_v42 = vpop.permute.xlu0 %1606  ;;  %v1987_v4 = vld [vmem:[#allocation2 + $0x1e8] sm:$0xff]  ;;  %v4201_v60 = vld [vmem:[%s8788_s3 + $0xd8] sm:$0xff]  ;;  %3389 = vst.msk [vmem:[#allocation2 + $0x20] sm:$0xff] %vm566_vm0, %v7207_v27  ;;  %2561 = vst.msk [vmem:[#allocation3 + $0x10] sm:$0xff] %vm566_vm0, %v2529_v55 }
 0x18b   : > { %1676 = vst.msk [vmem:[#allocation2 + $0x200] sm:$0xff] %vm927_vm8, %v1607_v42  ;;  %2241 = vmatprep.mubr.f32.mxu0 %v1987_v4  ;;  %1391 = vrot.lane.b32.xlu0 %v1296_v0, %s5651_s27  ;;  %v5471_v31 = vpack.c.bf16 %v4201_v60, %v4200_v7  ;;  %v2653_v1 = vsel %vm487_vm1, %v2651_v26, %v2652_v30  ;;  %v3421_v26 = vld [vmem:[#allocation3 + $0x9] sm:$0x7f] }
 0x18c   : > { %v695_v19 = vpop.permute.xlu1 %694  ;;  %2727 = vst.msk [vmem:[#allocation2 + $0x48] sm:$0xff] %vm566_vm0, %v2653_v1  ;;  %v3117_v30 = vld [vmem:[#allocation3 + $0x8] sm:$0x7f] }
 0x18d   : > { %766 = vst.msk [vmem:[#allocation2 + $0x1f8] sm:$0xff] %vm746_vm4, %v695_v19  ;;  %5469 = vmatpush1.bf16.msra.mxu1 %v5468_v37  ;;  %v7271_v37 = vpop.f32.mrb[14].mxu1 }
 0x18e   : > { %895 = vrot.lane.b32.xlu1 %v806_v56, %s5652_s25  ;;  %v1788_v25 = vpop.permute.xlu0 %1787  ;;  %5470 = vmatprep.subr.bf16.mxu1 %v5648_v2  ;;  %v7274_v0 = vpop.f32.mrb[15].mxu1 }
 0x18f   : > { %1856 = vst.msk [vmem:[#allocation2 + $0x200] sm:$0xff] %vm1169_vm9, %v1788_v25  ;;  %3484 = vrot.lane.b32.xlu0 %v7225_v22, %s5651_s27 }
 0x190   : > { %v876_v50 = vpop.permute.xlu1 %875  ;;  %v1986_v9 = vld [vmem:[#allocation2 + $0x1e0] sm:$0xff] }
 0x191   : > { %948 = vst.msk [vmem:[#allocation2 + $0x1f8] sm:$0x7f] %vm929_vm10, %v876_v50  ;;  %2242 = vmatmul.mubr.f32.gmra.mrb[40].mxu0 %v1986_v9  ;;  %5472 = vmatpush1.bf16.msra.mxu1 %v5471_v31  ;;  %v7249_v56 = vld [vmem:[#allocation3 + $0x10] sm:$0xff] }
 0x192   : > { %1133 = vrot.lane.b32.xlu1 %v1070_v8, %s5650_s26  ;;  %5473 = vmatprep.subr.bf16.mxu1 %v5648_v2  ;;  %v1374_v39 = vpop.permute.xlu0 %1373  ;;  %v7251_v24 = vld [vmem:[#allocation3 + $0x10] sm:$0xff]  ;;  %v7257_v59 = vrot.slane %v7249_v56, 7 }
 0x193   : > { %1448 = vst.msk [vmem:[#allocation2 + $0x218] sm:$0xff] %vm746_vm4, %v1374_v39  ;;  %3898 = vrot.lane.b32.xlu0 %v7249_v56, %s5650_s26 }
 0x194   : > { %v1114_v41 = vpop.permute.xlu1 %1113  ;;  %3390 = vst.msk [vmem:[#allocation2 + $0x38] sm:$0xff] %vm566_vm0, %v7251_v24 }
 0x195   : > { %1190 = vst.msk [vmem:[#allocation2 + $0x1f8] sm:$0xff] %vm1169_vm9, %v1114_v41  ;;  %5475 = vmatpush1.bf16.msra.mxu1 %v5474_v15 }
 0x196   : > { %5476 = vmatprep.subr.bf16.mxu1 %v5648_v2  ;;  %v1609_v19 = vpop.permute.xlu0 %1608  ;;  %v1990_v12 = vld [vmem:[#allocation2 + $0x200] sm:$0xff]  ;;  %v2654_v2 = vrot.slane %v7251_v24, 7  ;;  %3718 = vrot.lane.b32.xlu1 %v7257_v59, %s5652_s25 }
 0x197   : > { %v2158_v11 = vpop.f32.mrb[6].mxu0  ;;  %1677 = vst.msk [vmem:[#allocation2 + $0x218] sm:$0xfe] %vm1654_vm7, %v1609_v19  ;;  %2246 = vmatprep.mubr.f32.mxu0 %v1990_v12  ;;  %3486 = vrot.lane.b32.xlu0 %v3421_v26, %s5651_s27 }
 0x198   : > { %v697_v33 = vpop.permute.xlu1 %696  ;;  %v2159_v44 = vadd.f32 %v7057_v38, %v2158_v11  ;;  %v2160_v45 = vpop.f32.mrb[7].mxu0  ;;  %2728 = vst.msk [vmem:[#allocation2 + $0x60] sm:$0xfe] %vm564_vm2, %v2654_v2 }
 0x199   : > { %767 = vst.msk [vmem:[#allocation2 + $0x210] sm:$0xff] %vm746_vm4, %v697_v33  ;;  %5478 = vmatpush1.bf16.msra.mxu1 %v5477_v17  ;;  %v3181_v33 = vrot.slane %v3117_v30, 7 }
 0x19a   : > { %v2384_v6 = vadd.f32 %v6768_v61, %v2159_v44  ;;  %5511 = vmatprep.subr.bf16.mxu1 %v7001_v54  ;;  %v1790_v40 = vpop.permute.xlu0 %1789  ;;  %3228 = vrot.lane.b32.xlu1 %v3180_v3, %s5650_s26 }
 0x19b   : > { %1857 = vst.msk [vmem:[#allocation2 + $0x218] sm:$0xff] %vm1169_vm9, %v1790_v40  ;;  %v3182_v45 = vsel %vm487_vm1, %v3180_v3, %v3181_v33 }
 0x19c   : > { %v878_v62 = vpop.permute.xlu1 %877  ;;  %v1989_v13 = vld [vmem:[#allocation2 + $0x1f8] sm:$0xff]  ;;  %v2530_v61 = vmax.f32 %v2384_v6, 0.0 }
 0x19d   : > { %949 = vst.msk [vmem:[#allocation2 + $0x210] sm:$0xff] %vm927_vm8, %v878_v62  ;;  %2247 = vmatmul.mubr.f32.gmra.mrb[42].mxu0 %v1989_v13 }
 0x19e   : > { %2562 = vst.msk [vmem:[#allocation3 + $0x18] sm:$0xff] %vm566_vm0, %v2530_v61  ;;  %v1376_v5 = vpop.permute.xlu0 %1375 }
 0x19f   : > { %1449 = vst.msk [vmem:[#allocation2 + $0x230] sm:$0x7f] %vm1426_vm5, %v1376_v5 }
 0x1a0   : > { %v1116_v63 = vpop.permute.xlu1 %1115 }
 0x1a1   : > { %1191 = vst.msk [vmem:[#allocation2 + $0x210] sm:$0xfe] %vm1167_vm6, %v1116_v63 }
 0x1a2   : > { %v1611_v31 = vpop.permute.xlu0 %1610  ;;  %v1993_v47 = vld [vmem:[#allocation2 + $0x218] sm:$0xff] }
 0x1a3   : > { %1678 = vst.msk [vmem:[#allocation2 + $0x230] sm:$0xff] %vm927_vm8, %v1611_v31  ;;  %2251 = vmatprep.mubr.f32.mxu0 %v1993_v47 }
 0x1a4   : > { %v699_v42 = vpop.permute.xlu1 %698  ;;  %v2163_v4 = vpop.f32.mrb[8].mxu0 }
 0x1a5   : > { %768 = vst.msk [vmem:[#allocation2 + $0x228] sm:$0xff] %vm746_vm4, %v699_v42  ;;  %v2164_v8 = vadd.f32 %v7057_v38, %v2163_v4  ;;  %v2165_v50 = vpop.f32.mrb[9].mxu0  ;;  %v7281_v9 = vld [vmem:[#allocation3 + $0x11] sm:$0xff]  ;;  %v4019_v55 = vld [vmem:[#allocation3 + $0x19] sm:$0x7f] }
 0x1a6   : > { %v7283_v7 = vld [vmem:[#allocation3 + $0x18] sm:$0xff]  ;;  %4048 = vst.msk [vmem:[#allocation2 + $0x10] sm:$0xff] %vm566_vm0, %v7281_v9  ;;  %v1792_v51 = vpop.permute.xlu0 %1791 }
 0x1a7   : > { %4049 = vst.msk [vmem:[#allocation2 + $0x28] sm:$0x7f] %vm1896_vm3, %v4019_v55  ;;  %v2389_v60 = vadd.f32 %v6783_v21, %v2164_v8  ;;  %3900 = vrot.lane.b32.xlu0 %v7283_v7, %s5650_s26  ;;  %v3614_v25 = vld [vmem:[#allocation3 + $0x18] sm:$0x7f] }
 0x1a8   : > { %v880_v41 = vpop.permute.xlu1 %879  ;;  %v1992_v32 = vld [vmem:[#allocation2 + $0x210] sm:$0xff]  ;;  %v3674_v34 = vrot.slane %v3614_v25, 7  ;;  %v3359_v1 = vld [vmem:[#allocation3 + $0x18] sm:$0xff]  ;;  %1858 = vst.msk [vmem:[#allocation2 + $0x230] sm:$0xff] %vm1169_vm9, %v1792_v51 }
 0x1a9   : > { %v2531_v15 = vmax.f32 %v2389_v60, 0.0  ;;  %950 = vst.msk [vmem:[#allocation2 + $0x228] sm:$0x7f] %vm929_vm10, %v880_v41  ;;  %2252 = vmatmul.mubr.f32.gmra.mrb[44].mxu0 %v1992_v32  ;;  %v2594_v39 = vld [vmem:[#allocation3 + $0x18] sm:$0x7f] }
 0x1aa   : > { %v3675_v21 = vsel %vm487_vm1, %v7257_v59, %v3674_v34  ;;  %3391 = vst.msk [vmem:[#allocation2 + $0x50] sm:$0xff] %vm566_vm0, %v3359_v1  ;;  %v2655_v11 = vrot.slane %v2594_v39, 7  ;;  %v1378_v17 = vpop.permute.xlu0 %1377  ;;  %v3423_v60 = vld [vmem:[#allocation3 + $0x19] sm:$0x7f] }
 0x1ab   : > { %2563 = vst.msk [vmem:[#allocation3 + $0x20] sm:$0xff] %vm566_vm0, %v2531_v15  ;;  %3720 = vrot.lane.b32.xlu1 %v3675_v21, %s5652_s25  ;;  %3488 = vrot.lane.b32.xlu0 %v7281_v9, %s5651_s27  ;;  %v3119_v39 = vld [vmem:[#allocation3 + $0x18] sm:$0x7f] }
 0x1ac   : > { %v1118_v20 = vpop.permute.xlu1 %1117  ;;  %v2656_v44 = vsel %vm487_vm1, %v2654_v2, %v2655_v11  ;;  %1450 = vst.msk [vmem:[#allocation2 + $0x248] sm:$0xff] %vm746_vm4, %v1378_v17 }
 0x1ad   : > { %1192 = vst.msk [vmem:[#allocation2 + $0x228] sm:$0xff] %vm1169_vm9, %v1118_v20 }
 0x1ae   : > { %2729 = vst.msk [vmem:[#allocation2 + $0x78] sm:$0xff] %vm566_vm0, %v2656_v44  ;;  %v1613_v61 = vpop.permute.xlu0 %1612  ;;  %v2937_v44 = vld [vmem:[#allocation3 + $0x9] sm:$0x7f] }
 0x1af   : > { %3230 = vrot.lane.b32.xlu1 %v3182_v45, %s5650_s26  ;;  %v1996_v26 = vld [vmem:[#allocation2 + $0x230] sm:$0xff]  ;;  %1679 = vst.msk [vmem:[#allocation2 + $0x248] sm:$0xfe] %vm1654_vm7, %v1613_v61 }
 0x1b0   : > { %v701_v24 = vpop.permute.xlu1 %700  ;;  %v2168_v6 = vpop.f32.mrb[10].mxu0  ;;  %2256 = vmatprep.mubr.f32.mxu0 %v1996_v26 }
 0x1b1   : > { %769 = vst.msk [vmem:[#allocation2 + $0x240] sm:$0xff] %vm746_vm4, %v701_v24  ;;  %v2169_v19 = vadd.f32 %v7057_v38, %v2168_v6  ;;  %v2170_v12 = vpop.f32.mrb[11].mxu0 }
 0x1b2   : > { %v7309_v62 = vld [vmem:[#allocation3 + $0x20] sm:$0xff] }
 0x1b3   : > { %v7311_v2 = vld [vmem:[#allocation3 + $0x20] sm:$0xff]  ;;  %v2394_v13 = vadd.f32 %v6780_v58, %v2169_v19  ;;  %2816 = vrot.lane.b32.xlu1 %v7173_v49, %s5651_s27  ;;  %v7317_v40 = vrot.slane %v7309_v62, 7  ;;  %v1794_v58 = vpop.permute.xlu0 %1793  ;;  %v7330_v49 = vpop.f32.mrb[16].mxu1 }
 0x1b4   : > { %3392 = vst.msk [vmem:[#allocation2 + $0x68] sm:$0xff] %vm566_vm0, %v7311_v2  ;;  %v2657_v3 = vrot.slane %v7311_v2, 7  ;;  %v882_v63 = vpop.permute.xlu1 %881  ;;  %v1995_v5 = vld [vmem:[#allocation2 + $0x228] sm:$0xff]  ;;  %v7333_v8 = vpop.f32.mrb[17].mxu1 }
 0x1b5   : > { %v2532_v42 = vmax.f32 %v2394_v13, 0.0  ;;  %951 = vst.msk [vmem:[#allocation2 + $0x240] sm:$0xff] %vm927_vm8, %v882_v63  ;;  %2257 = vmatmul.mubr.f32.gmra.mrb[46].mxu0 %v1995_v5  ;;  %3722 = vrot.lane.b32.xlu0 %v7317_v40, %s5652_s25 }
 0x1b6   : > { %2730 = vst.msk [vmem:[#allocation2 + $0x90] sm:$0xfe] %vm564_vm2, %v2657_v3 }
 0x1b7   : > { %2564 = vst.msk [vmem:[#allocation3 + $0x28] sm:$0xff] %vm566_vm0, %v2532_v42  ;;  %2996 = vrot.lane.b32.xlu1 %v7225_v22, %s5652_s25  ;;  %v1380_v50 = vpop.permute.xlu0 %1379 }
 0x1b8   : > { %1859 = vst.msk [vmem:[#allocation2 + $0x248] sm:$0xff] %vm1169_vm9, %v1794_v58  ;;  %v1120_v4 = vpop.permute.xlu1 %1119 }
 0x1b9   : > { %1193 = vst.msk [vmem:[#allocation2 + $0x240] sm:$0xfe] %vm1167_vm6, %v1120_v4  ;;  %3902 = vrot.lane.b32.xlu0 %v7309_v62, %s5650_s26 }
 0x1ba   : > { %1451 = vst.msk [vmem:[#allocation2 + $0x260] sm:$0x7f] %vm1426_vm5, %v1380_v50 }
 0x1bb   : > { %3232 = vrot.lane.b32.xlu1 %v7257_v59, %s5650_s26  ;;  %v1615_v34 = vpop.permute.xlu0 %1614 }
 0x1bc   : > { %v703_v22 = vpop.permute.xlu1 %702  ;;  %v2173_v55 = vpop.f32.mrb[12].mxu0  ;;  %1680 = vst.msk [vmem:[#allocation2 + $0x260] sm:$0xff] %vm927_vm8, %v1615_v34 }
 0x1bd   : > { %770 = vst.msk [vmem:[#allocation2 + $0x258] sm:$0xff] %vm746_vm4, %v703_v22  ;;  %v2174_v31 = vadd.f32 %v7057_v38, %v2173_v55  ;;  %v2175_v47 = vpop.f32.mrb[13].mxu0  ;;  %3490 = vrot.lane.b32.xlu0 %v3423_v60, %s5651_s27 }
 0x1be   : > { %v7344_v25 = vld [vmem:[#allocation3 + $0x21] sm:$0xff]  ;;  %v4021_v30 = vld [vmem:[#allocation3 + $0x29] sm:$0x7f] }
 0x1bf   : > { %v3616_v41 = vld [vmem:[#allocation3 + $0x28] sm:$0x7f]  ;;  %4050 = vst.msk [vmem:[#allocation2 + $0x40] sm:$0xff] %vm566_vm0, %v7344_v25  ;;  %v2399_v32 = vadd.f32 %v6822_v53, %v2174_v31  ;;  %2818 = vrot.lane.b32.xlu1 %v7207_v27, %s5651_s27  ;;  %v3184_v27 = vrot.slane %v3119_v39, 7  ;;  %v1796_v17 = vpop.permute.xlu0 %1795 }
 0x1c0   : > { %4051 = vst.msk [vmem:[#allocation2 + $0x58] sm:$0x7f] %vm1896_vm3, %v4021_v30  ;;  %v1999_v15 = vld [vmem:[#allocation2 + $0x248] sm:$0xff]  ;;  %v3677_v1 = vrot.slane %v3616_v41, 7  ;;  %v884_v21 = vpop.permute.xlu1 %883  ;;  %v1998_v33 = vld [vmem:[#allocation2 + $0x240] sm:$0xff] }
 0x1c1   : > { %2261 = vmatprep.mubr.f32.mxu0 %v1999_v15  ;;  %v2533_v11 = vmax.f32 %v2399_v32, 0.0  ;;  %952 = vst.msk [vmem:[#allocation2 + $0x258] sm:$0x7f] %vm929_vm10, %v884_v21  ;;  %v3361_v53 = vld [vmem:[#allocation3 + $0x28] sm:$0xff]  ;;  %v3185_v12 = vsel %vm487_vm1, %v7257_v59, %v3184_v27 }
 0x1c2   : > { %2262 = vmatmul.mubr.f32.gmra.mrb[48].mxu0 %v1998_v33  ;;  %v3678_v51 = vsel %vm487_vm1, %v7317_v40, %v3677_v1  ;;  %v2596_v20 = vld [vmem:[#allocation3 + $0x28] sm:$0x7f]  ;;  %3393 = vst.msk [vmem:[#allocation2 + $0x80] sm:$0xff] %vm566_vm0, %v3361_v53 }
 0x1c3   : > { %3724 = vrot.lane.b32.xlu0 %v3678_v51, %s5652_s25  ;;  %v2658_v45 = vrot.slane %v2596_v20, 7  ;;  %2565 = vst.msk [vmem:[#allocation3 + $0x30] sm:$0xff] %vm566_vm0, %v2533_v11  ;;  %2998 = vrot.lane.b32.xlu1 %v2937_v44, %s5652_s25  ;;  %v7363_v19 = vld [vmem:[#allocation3 + $0x28] sm:$0xff]  ;;  %v1382_v2 = vpop.permute.xlu0 %1381 }
 0x1c4   : > { %1860 = vst.msk [vmem:[#allocation2 + $0x260] sm:$0xff] %vm1169_vm9, %v1796_v17  ;;  %v1122_v24 = vpop.permute.xlu1 %1121  ;;  %v3425_v15 = vld [vmem:[#allocation3 + $0x29] sm:$0x7f] }
 0x1c5   : > { %v2659_v6 = vsel %vm487_vm1, %v2657_v3, %v2658_v45  ;;  %1194 = vst.msk [vmem:[#allocation2 + $0x258] sm:$0xff] %vm1169_vm9, %v1122_v24  ;;  %v3121_v20 = vld [vmem:[#allocation3 + $0x28] sm:$0x7f] }
 0x1c6   : > { %2731 = vst.msk [vmem:[#allocation2 + $0xa8] sm:$0xff] %vm566_vm0, %v2659_v6  ;;  %v3187_v6 = vrot.slane %v3121_v20, 7 }
 0x1c7   : > { %3904 = vrot.lane.b32.xlu0 %v7363_v19, %s5650_s26  ;;  %3234 = vrot.lane.b32.xlu1 %v3185_v12, %s5650_s26  ;;  %1452 = vst.msk [vmem:[#allocation2 + $0x278] sm:$0xff] %vm746_vm4, %v1382_v2  ;;  %v1617_v42 = vpop.permute.xlu0 %1616 }
 0x1c8   : > { %v705_v13 = vpop.permute.xlu1 %704  ;;  %v2178_v61 = vpop.f32.mrb[14].mxu0  ;;  %1681 = vst.msk [vmem:[#allocation2 + $0x278] sm:$0xfe] %vm1654_vm7, %v1617_v42 }
 0x1c9   : > { %771 = vst.msk [vmem:[#allocation2 + $0x270] sm:$0xff] %vm746_vm4, %v705_v13  ;;  %v2179_v26 = vadd.f32 %v7057_v38, %v2178_v61  ;;  %v2180_v3 = vpop.f32.mrb[15].mxu0 }
 0x1ca   : > { %v7376_v63 = vld [vmem:[#allocation3 + $0x30] sm:$0xff]  ;;  %v3188_v3 = vsel %vm487_vm1, %v7317_v40, %v3187_v6 }
 0x1cb   : > { %3492 = vrot.lane.b32.xlu0 %v7344_v25, %s5651_s27  ;;  %v7378_v5 = vld [vmem:[#allocation3 + $0x30] sm:$0xff]  ;;  %v2404_v59 = vadd.f32 %v6820_v48, %v2179_v26  ;;  %2820 = vrot.lane.b32.xlu1 %v7249_v56, %s5651_s27  ;;  %v2002_v58 = vld [vmem:[#allocation2 + $0x260] sm:$0xff]  ;;  %v7384_v4 = vrot.slane %v7376_v63, 7  ;;  %v1798_v48 = vpop.permute.xlu0 %1797  ;;  %v7397_v56 = vpop.f32.mrb[18].mxu1 }
 0x1cc   : > { %3394 = vst.msk [vmem:[#allocation2 + $0x98] sm:$0xff] %vm566_vm0, %v7378_v5  ;;  %v2660_v50 = vrot.slane %v7378_v5, 7  ;;  %v886_v22 = vpop.permute.xlu1 %885  ;;  %2266 = vmatprep.mubr.f32.mxu0 %v2002_v58  ;;  %v2001_v55 = vld [vmem:[#allocation2 + $0x258] sm:$0xff]  ;;  %v7400_v47 = vpop.f32.mrb[19].mxu1 }
 0x1cd   : > { %v2534_v60 = vmax.f32 %v2404_v59, 0.0  ;;  %953 = vst.msk [vmem:[#allocation2 + $0x270] sm:$0xff] %vm927_vm8, %v886_v22  ;;  %2267 = vmatmul.mubr.f32.gmra.mrb[50].mxu0 %v2001_v55 }
 0x1ce   : > { %2732 = vst.msk [vmem:[#allocation2 + $0xc0] sm:$0xfe] %vm564_vm2, %v2660_v50 }
 0x1cf   : > { %3726 = vrot.lane.b32.xlu0 %v7384_v4, %s5652_s25  ;;  %2566 = vst.msk [vmem:[#allocation3 + $0x38] sm:$0xff] %vm566_vm0, %v2534_v60  ;;  %3000 = vrot.lane.b32.xlu1 %v7281_v9, %s5652_s25  ;;  %v1384_v30 = vpop.permute.xlu0 %1383 }
 0x1d0   : > { %1861 = vst.msk [vmem:[#allocation2 + $0x278] sm:$0xff] %vm1169_vm9, %v1798_v48  ;;  %v1124_v31 = vpop.permute.xlu1 %1123 }
 0x1d1   : > { %1195 = vst.msk [vmem:[#allocation2 + $0x270] sm:$0xfe] %vm1167_vm6, %v1124_v31 }
 0x1d2   : > { %1453 = vst.msk [vmem:[#allocation2 + $0x290] sm:$0x7f] %vm1426_vm5, %v1384_v30 }
 0x1d3   : > { %3906 = vrot.lane.b32.xlu0 %v7376_v63, %s5650_s26  ;;  %3236 = vrot.lane.b32.xlu1 %v7317_v40, %s5650_s26  ;;  %v1619_v11 = vpop.permute.xlu0 %1618 }
 0x1d4   : > { %v707_v9 = vpop.permute.xlu1 %706  ;;  %v2183_v41 = vpop.f32.mrb[16].mxu0  ;;  %1682 = vst.msk [vmem:[#allocation2 + $0x290] sm:$0xff] %vm927_vm8, %v1619_v11 }
 0x1d5   : > { %772 = vst.msk [vmem:[#allocation2 + $0x288] sm:$0xff] %vm746_vm4, %v707_v9  ;;  %v2184_v32 = vadd.f32 %v7057_v38, %v2183_v41  ;;  %v2185_v34 = vpop.f32.mrb[17].mxu0 }
 0x1d6   : > { %v7410_v1 = vld [vmem:[#allocation3 + $0x31] sm:$0xff]  ;;  %v4023_v39 = vld [vmem:[#allocation3 + $0x39] sm:$0x7f] }
 0x1d7   : > { %3494 = vrot.lane.b32.xlu0 %v3425_v15, %s5651_s27  ;;  %v3618_v21 = vld [vmem:[#allocation3 + $0x38] sm:$0x7f]  ;;  %4052 = vst.msk [vmem:[#allocation2 + $0x70] sm:$0xff] %vm566_vm0, %v7410_v1  ;;  %v2409_v33 = vadd.f32 %v6880_v43, %v2184_v32  ;;  %2822 = vrot.lane.b32.xlu1 %v7283_v7, %s5651_s27  ;;  %v1800_v2 = vpop.permute.xlu0 %1799 }
 0x1d8   : > { %4053 = vst.msk [vmem:[#allocation2 + $0x88] sm:$0x7f] %vm1896_vm3, %v4023_v39  ;;  %v2005_v51 = vld [vmem:[#allocation2 + $0x278] sm:$0xff]  ;;  %v3680_v53 = vrot.slane %v3618_v21, 7  ;;  %v888_v44 = vpop.permute.xlu1 %887  ;;  %v2004_v27 = vld [vmem:[#allocation2 + $0x270] sm:$0xff] }
 0x1d9   : > { %2271 = vmatprep.mubr.f32.mxu0 %v2005_v51  ;;  %v2535_v45 = vmax.f32 %v2409_v33, 0.0  ;;  %954 = vst.msk [vmem:[#allocation2 + $0x288] sm:$0x7f] %vm929_vm10, %v888_v44  ;;  %v3363_v43 = vld [vmem:[#allocation3 + $0x38] sm:$0xff] }
 0x1da   : > { %2272 = vmatmul.mubr.f32.gmra.mrb[52].mxu0 %v2004_v27  ;;  %v3681_v17 = vsel %vm487_vm1, %v7384_v4, %v3680_v53  ;;  %v2598_v24 = vld [vmem:[#allocation3 + $0x38] sm:$0x7f]  ;;  %3395 = vst.msk [vmem:[#allocation2 + $0xb0] sm:$0xff] %vm566_vm0, %v3363_v43 }
 0x1db   : > { %3728 = vrot.lane.b32.xlu0 %v3681_v17, %s5652_s25  ;;  %v2939_v7 = vld [vmem:[#allocation3 + $0x19] sm:$0x7f]  ;;  %v2661_v12 = vrot.slane %v2598_v24, 7  ;;  %2567 = vst.msk [vmem:[#allocation3 + $0x40] sm:$0xff] %vm566_vm0, %v2535_v45  ;;  %v1386_v5 = vpop.permute.xlu0 %1385 }
 0x1dc   : > { %3002 = vrot.lane.b32.xlu1 %v2939_v7, %s5652_s25  ;;  %1862 = vst.msk [vmem:[#allocation2 + $0x290] sm:$0xff] %vm1169_vm9, %v1800_v2  ;;  %v1126_v13 = vpop.permute.xlu1 %1125  ;;  %v7430_v26 = vld [vmem:[#allocation3 + $0x38] sm:$0xff] }
 0x1dd   : > { %v2662_v61 = vsel %vm487_vm1, %v2660_v50, %v2661_v12  ;;  %1196 = vst.msk [vmem:[#allocation2 + $0x288] sm:$0xff] %vm1169_vm9, %v1126_v13  ;;  %v3427_v51 = vld [vmem:[#allocation3 + $0x39] sm:$0x7f] }
 0x1de   : > { %2733 = vst.msk [vmem:[#allocation2 + $0xd8] sm:$0xff] %vm566_vm0, %v2662_v61  ;;  %v3123_v24 = vld [vmem:[#allocation3 + $0x38] sm:$0x7f] }
 0x1df   : > { %3908 = vrot.lane.b32.xlu0 %v7430_v26, %s5650_s26  ;;  %1454 = vst.msk [vmem:[#allocation2 + $0x2a8] sm:$0xff] %vm746_vm4, %v1386_v5  ;;  %v1621_v60 = vpop.permute.xlu0 %1620  ;;  %v3190_v61 = vrot.slane %v3123_v24, 7 }
 0x1e0   : > { %3238 = vrot.lane.b32.xlu1 %v3188_v3, %s5650_s26  ;;  %v709_v59 = vpop.permute.xlu1 %708  ;;  %v2188_v42 = vpop.f32.mrb[18].mxu0  ;;  %1683 = vst.msk [vmem:[#allocation2 + $0x2a8] sm:$0xfe] %vm1654_vm7, %v1621_v60 }
 0x1e1   : > { %773 = vst.msk [vmem:[#allocation2 + $0x2a0] sm:$0xff] %vm746_vm4, %v709_v59  ;;  %v2189_v58 = vadd.f32 %v7057_v38, %v2188_v42  ;;  %v2190_v50 = vpop.f32.mrb[19].mxu0 }
 0x1e2   : > { %v7443_v22 = vld [vmem:[#allocation3 + $0x40] sm:$0xff]  ;;  %v3191_v50 = vsel %vm487_vm1, %v7384_v4, %v3190_v61 }
 0x1e3   : > { %3496 = vrot.lane.b32.xlu0 %v7410_v1, %s5651_s27  ;;  %v7445_v55 = vld [vmem:[#allocation3 + $0x40] sm:$0xff]  ;;  %v2414_v40 = vadd.f32 %v6877_v16, %v2189_v58  ;;  %v2008_v48 = vld [vmem:[#allocation2 + $0x290] sm:$0xff]  ;;  %v7451_v31 = vrot.slane %v7443_v22, 7  ;;  %v1802_v16 = vpop.permute.xlu0 %1801 }
 0x1e4   : > { %2824 = vrot.lane.b32.xlu1 %v7309_v62, %s5651_s27  ;;  %3396 = vst.msk [vmem:[#allocation2 + $0xc8] sm:$0xff] %vm566_vm0, %v7445_v55  ;;  %v2663_v30 = vrot.slane %v7445_v55, 7  ;;  %v890_v9 = vpop.permute.xlu1 %889  ;;  %2276 = vmatprep.mubr.f32.mxu0 %v2008_v48  ;;  %v2007_v41 = vld [vmem:[#allocation2 + $0x288] sm:$0xff]  ;;  %v7464_v62 = vpop.f32.mrb[20].mxu1 }
 0x1e5   : > { %v2536_v32 = vmax.f32 %v2414_v40, 0.0  ;;  %955 = vst.msk [vmem:[#allocation2 + $0x2a0] sm:$0xff] %vm927_vm8, %v890_v9  ;;  %2277 = vmatmul.mubr.f32.gmra.mrb[54].mxu0 %v2007_v41  ;;  %v7467_v15 = vpop.f32.mrb[21].mxu1 }
 0x1e6   : > { %2734 = vst.msk [vmem:[#allocation2 + $0xf0] sm:$0xfe] %vm564_vm2, %v2663_v30 }
 0x1e7   : > { %3730 = vrot.lane.b32.xlu0 %v7451_v31, %s5652_s25  ;;  %2568 = vst.msk [vmem:[#allocation3 + $0x48] sm:$0xff] %vm566_vm0, %v2536_v32  ;;  %v1388_v39 = vpop.permute.xlu0 %1387 }
 0x1e8   : > { %3004 = vrot.lane.b32.xlu1 %v7344_v25, %s5652_s25  ;;  %1863 = vst.msk [vmem:[#allocation2 + $0x2a8] sm:$0xff] %vm1169_vm9, %v1802_v16  ;;  %v1128_v34 = vpop.permute.xlu1 %1127 }
 0x1e9   : > { %1197 = vst.msk [vmem:[#allocation2 + $0x2a0] sm:$0xfe] %vm1167_vm6, %v1128_v34 }
 0x1ea   : > { %1455 = vst.msk [vmem:[#allocation2 + $0x2c0] sm:$0x7f] %vm1426_vm5, %v1388_v39 }
 0x1eb   : > { %3910 = vrot.lane.b32.xlu0 %v7443_v22, %s5650_s26  ;;  %v1623_v45 = vpop.permute.xlu0 %1622 }
 0x1ec   : > { %3240 = vrot.lane.b32.xlu1 %v7384_v4, %s5650_s26  ;;  %v711_v25 = vpop.permute.xlu1 %710  ;;  %v2193_v21 = vpop.f32.mrb[20].mxu0  ;;  %1684 = vst.msk [vmem:[#allocation2 + $0x2c0] sm:$0xff] %vm927_vm8, %v1623_v45  ;;  %v7546_v45 = vld [vmem:[%s8787_s2] ss:$0 sm:$0xff] }
 0x1ed   : > { %774 = vst.msk [vmem:[#allocation2 + $0x2b8] sm:$0xff] %vm746_vm4, %v711_v25  ;;  %v2194_v33 = vadd.f32 %v7057_v38, %v2193_v21  ;;  %v2195_v11 = vpop.f32.mrb[21].mxu0 }
 0x1ee   : > { %v7477_v53 = vld [vmem:[#allocation3 + $0x41] sm:$0xff]  ;;  %v4025_v20 = vld [vmem:[#allocation3 + $0x49] sm:$0x7f] }
 0x1ef   : > { %3498 = vrot.lane.b32.xlu0 %v3427_v51, %s5651_s27  ;;  %v3620_v44 = vld [vmem:[#allocation3 + $0x48] sm:$0x7f]  ;;  %4054 = vst.msk [vmem:[#allocation2 + $0xa0] sm:$0xff] %vm566_vm0, %v7477_v53  ;;  %v2419_v27 = vadd.f32 %v6981_v14, %v2194_v33  ;;  %v1804_v5 = vpop.permute.xlu0 %1803 }
 0x1f0   : > { %4055 = vst.msk [vmem:[#allocation2 + $0xb8] sm:$0x7f] %vm1896_vm3, %v4025_v20  ;;  %2826 = vrot.lane.b32.xlu1 %v7363_v19, %s5651_s27  ;;  %v2011_v17 = vld [vmem:[#allocation2 + $0x2a8] sm:$0xff]  ;;  %v3683_v43 = vrot.slane %v3620_v44, 7  ;;  %v892_v7 = vpop.permute.xlu1 %891  ;;  %v2010_v6 = vld [vmem:[#allocation2 + $0x2a0] sm:$0xff] }
 0x1f1   : > { %2281 = vmatprep.mubr.f32.mxu0 %v2011_v17  ;;  %v2537_v12 = vmax.f32 %v2419_v27, 0.0  ;;  %956 = vst.msk [vmem:[#allocation2 + $0x2b8] sm:$0x7f] %vm929_vm10, %v892_v7  ;;  %v3365_v14 = vld [vmem:[#allocation3 + $0x48] sm:$0xff] }
 0x1f2   : > { %2282 = vmatmul.mubr.f32.gmra.mrb[56].mxu0 %v2010_v6  ;;  %v3684_v2 = vsel %vm487_vm1, %v7451_v31, %v3683_v43  ;;  %v2600_v13 = vld [vmem:[#allocation3 + $0x48] sm:$0x7f]  ;;  %3397 = vst.msk [vmem:[#allocation2 + $0xe0] sm:$0xff] %vm566_vm0, %v3365_v14 }
 0x1f3   : > { %3732 = vrot.lane.b32.xlu0 %v3684_v2, %s5652_s25  ;;  %v2941_v19 = vld [vmem:[#allocation3 + $0x29] sm:$0x7f]  ;;  %v2664_v3 = vrot.slane %v2600_v13, 7  ;;  %2569 = vst.msk [vmem:[#allocation3 + $0x50] sm:$0xff] %vm566_vm0, %v2537_v12  ;;  %v713_v55 = vpop.permute.xlu0 %712 }
 0x1f4   : > { %3006 = vrot.lane.b32.xlu1 %v2941_v19, %s5652_s25  ;;  %1864 = vst.msk [vmem:[#allocation2 + $0x2c0] sm:$0xff] %vm1169_vm9, %v1804_v5  ;;  %v1130_v59 = vpop.permute.xlu1 %1129  ;;  %v7497_v58 = vld [vmem:[#allocation3 + $0x48] sm:$0xff] }
 0x1f5   : > { %v2665_v42 = vsel %vm487_vm1, %v2663_v30, %v2664_v3  ;;  %1198 = vst.msk [vmem:[#allocation2 + $0x2b8] sm:$0xff] %vm1169_vm9, %v1130_v59  ;;  %v3429_v24 = vld [vmem:[#allocation3 + $0x49] sm:$0x7f] }
 0x1f6   : > { %2735 = vst.msk [vmem:[#allocation2 + $0x108] sm:$0xff] %vm566_vm0, %v2665_v42  ;;  %v3125_v19 = vld [vmem:[#allocation3 + $0x48] sm:$0x7f] }
 0x1f7   : > { %3912 = vrot.lane.b32.xlu0 %v7497_v58, %s5650_s26  ;;  %775 = vst.msk [vmem:[#allocation2 + $0x2d0] sm:$0xff] %vm746_vm4, %v713_v55  ;;  %v1390_v32 = vpop.permute.xlu0 %1389 }
 0x1f8   : > { %3242 = vrot.lane.b32.xlu1 %v3191_v50, %s5650_s26  ;;  %v894_v40 = vpop.permute.xlu1 %893  ;;  %v2198_v60 = vpop.f32.mrb[22].mxu0  ;;  %1456 = vst.msk [vmem:[#allocation2 + $0x2d8] sm:$0xff] %vm746_vm4, %v1390_v32  ;;  %v3193_v50 = vrot.slane %v3125_v19, 7 }
 0x1f9   : > { %957 = vst.msk [vmem:[#allocation2 + $0x2d0] sm:$0xff] %vm927_vm8, %v894_v40  ;;  %v2199_v48 = vadd.f32 %v7057_v38, %v2198_v60  ;;  %v2200_v30 = vpop.f32.mrb[23].mxu0 }
 0x1fa   : > { %v7510_v9 = vld [vmem:[#allocation3 + $0x50] sm:$0xff] }
 0x1fb   : > { %3500 = vrot.lane.b32.xlu0 %v7477_v53, %s5651_s27  ;;  %v7512_v41 = vld [vmem:[#allocation3 + $0x50] sm:$0xff]  ;;  %v2424_v4 = vadd.f32 %v6978_v36, %v2199_v48  ;;  %v2014_v16 = vld [vmem:[#allocation2 + $0x2c0] sm:$0xff]  ;;  %v7518_v34 = vrot.slane %v7510_v9, 7  ;;  %v715_v36 = vpop.permute.xlu0 %714 }
 0x1fc   : > { %2828 = vrot.lane.b32.xlu1 %v7376_v63, %s5651_s27  ;;  %3398 = vst.msk [vmem:[#allocation2 + $0xf8] sm:$0xff] %vm566_vm0, %v7512_v41  ;;  %v2666_v38 = vrot.slane %v7512_v41, 7  ;;  %v1132_v39 = vpop.permute.xlu1 %1131  ;;  %2286 = vmatprep.mubr.f32.mxu0 %v2014_v16  ;;  %v2013_v25 = vld [vmem:[#allocation2 + $0x2b8] sm:$0xff]  ;;  %v7531_v63 = vpop.f32.mrb[22].mxu1  ;;  %v4080_v48 = vld [vmem:[#allocation2 + $0x10] sm:$0xff]  ;;  %v3194_v41 = vsel %vm487_vm1, %v7451_v31, %v3193_v50  ;;  %v4083_v16 = vld [vmem:[#allocation2 + $0x28] sm:$0xff] }
 0x1fd   : > { %v2538_v21 = vmax.f32 %v2424_v4, 0.0  ;;  %1199 = vst.msk [vmem:[#allocation2 + $0x2d0] sm:$0xfe] %vm1167_vm6, %v1132_v39  ;;  %2287 = vmatmul.mubr.f32.gmra.mrb[58].mxu0 %v2013_v25  ;;  %v7534_v11 = vpop.f32.mrb[23].mxu1 }
 0x1fe   : > { %2736 = vst.msk [vmem:[#allocation2 + $0x120] sm:$0xfe] %vm564_vm2, %v2666_v38 }
 0x1ff   : > { %3734 = vrot.lane.b32.xlu0 %v7518_v34, %s5652_s25  ;;  %2570 = vst.msk [vmem:[#allocation3 + $0x58] sm:$0xff] %vm566_vm0, %v2538_v21  ;;  %v1392_v51 = vpop.permute.xlu0 %1391  ;;  %v2017_v20 = vld [vmem:[#allocation2 + $0x2d8] sm:$0xff]  ;;  %v4086_v21 = vld [vmem:[#allocation2 + $0x40] sm:$0xff] }
 0x200   : > { %3008 = vrot.lane.b32.xlu1 %v7410_v1, %s5652_s25  ;;  %776 = vst.msk [vmem:[#allocation2 + $0x2e8] sm:$0xff] %vm746_vm4, %v715_v36  ;;  %v896_v33 = vpop.permute.xlu1 %895  ;;  %2291 = vmatprep.mubr.f32.mxu0 %v2017_v20 }
 0x201   : > { %958 = vst.msk [vmem:[#allocation2 + $0x2e8] sm:$0x7f] %vm929_vm10, %v896_v33 }
 0x202   : > { %1457 = vst.msk [vmem:[#allocation2 + $0x2f0] sm:$0x7f] %vm1426_vm5, %v1392_v51 }
 0x203   : > { %3914 = vrot.lane.b32.xlu0 %v7510_v9, %s5650_s26  ;;  %v3485_v14 = vpop.permute.xlu0 %3484 }
 0x204   : > { %3244 = vrot.lane.b32.xlu1 %v7451_v31, %s5650_s26  ;;  %v1134_v1 = vpop.permute.xlu1 %1133  ;;  %v2203_v44 = vpop.f32.mrb[24].mxu0  ;;  %v2016_v27 = vld [vmem:[#allocation2 + $0x2d0] sm:$0xff]  ;;  %3580 = vst.msk [vmem:[#allocation2 + $0x8] sm:$0xff] %vm746_vm4, %v3485_v14 }
 0x205   : > { %1200 = vst.msk [vmem:[#allocation2 + $0x2e8] sm:$0xff] %vm1169_vm9, %v1134_v1  ;;  %v2204_v17 = vadd.f32 %v7546_v45, %v2203_v44  ;;  %v2205_v43 = vpop.f32.mrb[25].mxu0  ;;  %2292 = vmatmul.mubr.f32.gmra.mrb[60].mxu0 %v2016_v27  ;;  %v4089_v44 = vld [vmem:[#allocation2 + $0x58] sm:$0xff] }
 0x206   : > { %v7549_v7 = vld [vmem:[#allocation3 + $0x51] sm:$0xff]  ;;  %v4027_v6 = vld [vmem:[#allocation3 + $0x59] sm:$0x7f]  ;;  %v4095_v43 = vld [vmem:[#allocation2 + $0x88] sm:$0xff] }
 0x207   : > { %3502 = vrot.lane.b32.xlu0 %v3429_v24, %s5651_s27  ;;  %v3622_v12 = vld [vmem:[#allocation3 + $0x58] sm:$0x7f]  ;;  %4056 = vst.msk [vmem:[#allocation2 + $0xd0] sm:$0xff] %vm566_vm0, %v7549_v7  ;;  %v2429_v2 = vadd.f32 %v7150_v28, %v2204_v17  ;;  %v3899_v60 = vpop.permute.xlu0 %3898  ;;  %v4092_v17 = vld [vmem:[#allocation2 + $0x70] sm:$0xff] }
 0x208   : > { %4057 = vst.msk [vmem:[#allocation2 + $0xe8] sm:$0x7f] %vm1896_vm3, %v4027_v6  ;;  %2830 = vrot.lane.b32.xlu1 %v7430_v26, %s5651_s27  ;;  %v3686_v13 = vrot.slane %v3622_v12, 7  ;;  %v3367_v61 = vld [vmem:[#allocation3 + $0x58] sm:$0xff]  ;;  %v3719_v4 = vpop.permute.xlu1 %3718  ;;  %v4098_v12 = vld [vmem:[#allocation2 + $0xa0] sm:$0xff] }
 0x209   : > { %v2602_v3 = vld [vmem:[#allocation3 + $0x58] sm:$0x7f]  ;;  %v2539_v5 = vmax.f32 %v2429_v2, 0.0  ;;  %3399 = vst.msk [vmem:[#allocation2 + $0x110] sm:$0xff] %vm566_vm0, %v3367_v61  ;;  %v2020_v26 = vld [vmem:[#allocation2 + $0x2f0] sm:$0xff] }
 0x20a   : > { %v3687_v59 = vsel %vm487_vm1, %v7518_v34, %v3686_v13  ;;  %v2667_v42 = vrot.slane %v2602_v3, 7  ;;  %v2943_v28 = vld [vmem:[#allocation3 + $0x39] sm:$0x7f]  ;;  %2296 = vmatprep.mubr.f32.mxu0 %v2020_v26  ;;  %3808 = vst.msk [vmem:[#allocation2 + $0x8] sm:$0xfe] %vm1654_vm7, %v3719_v4 }
 0x20b   : > { %3736 = vrot.lane.b32.xlu0 %v3687_v59, %s5652_s25  ;;  %2571 = vst.msk [vmem:[#allocation3 + $0x60] sm:$0xff] %vm566_vm0, %v2539_v5  ;;  %v7567_v30 = vld [vmem:[#allocation3 + $0x58] sm:$0xff]  ;;  %v3487_v39 = vpop.permute.xlu0 %3486 }
 0x20c   : > { %3010 = vrot.lane.b32.xlu1 %v2943_v28, %s5652_s25  ;;  %v2668_v55 = vsel %vm487_vm1, %v2666_v38, %v2667_v42  ;;  %v2019_v40 = vld [vmem:[#allocation2 + $0x2e8] sm:$0xff]  ;;  %3988 = vst.msk [vmem:[#allocation2 + $0x8] sm:$0xff] %vm1169_vm9, %v3899_v60  ;;  %v3229_v51 = vpop.permute.xlu1 %3228  ;;  %v3431_v5 = vld [vmem:[#allocation3 + $0x59] sm:$0x7f] }
 0x20d   : > { %2737 = vst.msk [vmem:[#allocation2 + $0x138] sm:$0xff] %vm566_vm0, %v2668_v55  ;;  %2297 = vmatmul.mubr.f32.gmra.mrb[62].mxu0 %v2019_v40  ;;  %v3127_v55 = vld [vmem:[#allocation3 + $0x58] sm:$0x7f] }
 0x20e   : > { %5303 = vmatprep.mubr.f32.mxu0 %v4080_v48  ;;  %3581 = vst.msk [vmem:[#allocation2 + $0x20] sm:$0x7f] %vm1426_vm5, %v3487_v39  ;;  %v4104_v3 = vld [vmem:[#allocation2 + $0xd0] sm:$0xff] }
 0x20f   : > { %3916 = vrot.lane.b32.xlu0 %v7567_v30, %s5650_s26  ;;  %3324 = vst.msk [vmem:[#allocation2] sm:$0xfe] %vm1167_vm6, %v3229_v51  ;;  %v4107_v40 = vld [vmem:[#allocation2 + $0xe8] sm:$0xff] }
 0x210   : > { %3246 = vrot.lane.b32.xlu1 %v3194_v41, %s5650_s26  ;;  %v2208_v32 = vpop.f32.mrb[26].mxu0 }
 0x211   : > { %v2209_v38 = vadd.f32 %v7546_v45, %v2208_v32  ;;  %v2210_v25 = vpop.f32.mrb[27].mxu0  ;;  %5304 = vmatmul.mubr.f32.vlgmr.msra.gmra.mrb[64].mxu0 %v4083_v16 }
 0x212   : > { %5306 = vmatprep.mubr.f32.mxu0 %v4086_v21  ;;  %v7580_v31 = vld [vmem:[#allocation3 + $0x60] sm:$0xff] }
 0x213   : > { %3504 = vrot.lane.b32.xlu0 %v7549_v7, %s5651_s27  ;;  %v7582_v36 = vld [vmem:[#allocation3 + $0x60] sm:$0xff]  ;;  %v2434_v33 = vadd.f32 %v7145_v57, %v2209_v38  ;;  %v7588_v20 = vrot.slane %v7580_v31, 7  ;;  %v7602_v57 = vpop.f32.mrb[24].mxu1 }
 0x214   : > { %2832 = vrot.lane.b32.xlu1 %v7443_v22, %s5651_s27  ;;  %3400 = vst.msk [vmem:[#allocation2 + $0x128] sm:$0xff] %vm566_vm0, %v7582_v36  ;;  %v2669_v1 = vrot.slane %v7582_v36, 7  ;;  %v4079_v22 = vld [vmem:[#allocation2 + $0x8] sm:$0xff]  ;;  %v7604_v24 = vpop.f32.mrb[25].mxu1 }
 0x215   : > { %v2540_v27 = vmax.f32 %v2434_v33, 0.0  ;;  %5307 = vmatmul.mubr.f32.gmra.mrb[66].mxu0 %v4089_v44  ;;  %4293 = vmatprep.mubr.f32.mxu1 %v4079_v22 }
 0x216   : > { %2738 = vst.msk [vmem:[#allocation2 + $0x150] sm:$0xfe] %vm564_vm2, %v2669_v1  ;;  %5309 = vmatprep.mubr.f32.mxu0 %v4092_v17  ;;  %v4078_v2 = vld [vmem:[#allocation2] sm:$0xff] }
 0x217   : > { %3738 = vrot.lane.b32.xlu0 %v7588_v20, %s5652_s25  ;;  %2572 = vst.msk [vmem:[#allocation3 + $0x68] sm:$0xff] %vm566_vm0, %v2540_v27  ;;  %4294 = vmatmul.mubr.f32.vlgmr.msra.gmra.mrb[32].mxu1 %v4078_v2 }
 0x218   : > { %3012 = vrot.lane.b32.xlu1 %v7477_v53, %s5652_s25  ;;  %v4101_v53 = vld [vmem:[#allocation2 + $0xb8] sm:$0xff]  ;;  %5519 = vmatpush3.bf16.msra.mxu1 %v7001_v54 }
 0x219   : > { %5310 = vmatmul.mubr.f32.gmra.mrb[68].mxu0 %v4095_v43  ;;  %v3901_v6 = vpop.permute.xlu0 %3900  ;;  %5512 = vmatprep.subr.bf16.mxu1 %v7024_v29 }
 0x21a   : > { %5312 = vmatprep.mubr.f32.mxu0 %v4098_v12 }
 0x21b   : > { %3918 = vrot.lane.b32.xlu0 %v7580_v31, %s5650_s26 }
 0x21c   : > { %3248 = vrot.lane.b32.xlu1 %v7518_v34, %s5650_s26  ;;  %v2213_v14 = vpop.f32.mrb[28].mxu0  ;;  %5520 = vmatpush3.bf16.msra.mxu1 %v7024_v29 }
 0x21d   : > { %v2214_v13 = vadd.f32 %v7546_v45, %v2213_v14  ;;  %v3721_v19 = vpop.permute.xlu1 %3720  ;;  %v2215_v61 = vpop.f32.mrb[29].mxu0  ;;  %5313 = vmatmul.mubr.f32.gmra.mrb[70].mxu0 %v4101_v53  ;;  %5513 = vmatprep.subr.bf16.mxu1 %v7052_v35 }
 0x21e   : > { %v7612_v59 = vld [vmem:[#allocation3 + $0x61] sm:$0xff]  ;;  %v4029_v42 = vld [vmem:[#allocation3 + $0x69] sm:$0x7f]  ;;  %3809 = vst.msk [vmem:[#allocation2 + $0x20] sm:$0xff] %vm927_vm8, %v3721_v19  ;;  %v3489_v28 = vpop.permute.xlu0 %3488  ;;  %5315 = vmatprep.mubr.f32.mxu0 %v4104_v3 }
 0x21f   : > { %3506 = vrot.lane.b32.xlu0 %v3431_v5, %s5651_s27  ;;  %v3624_v50 = vld [vmem:[#allocation3 + $0x68] sm:$0x7f]  ;;  %4058 = vst.msk [vmem:[#allocation2 + $0x100] sm:$0xff] %vm566_vm0, %v7612_v59  ;;  %v2439_v54 = vadd.f32 %v7274_v0, %v2214_v13 }
 0x220   : > { %4059 = vst.msk [vmem:[#allocation2 + $0x118] sm:$0x7f] %vm1896_vm3, %v4029_v42  ;;  %2834 = vrot.lane.b32.xlu1 %v7497_v58, %s5651_s27  ;;  %v3689_v26 = vrot.slane %v3624_v50, 7  ;;  %v3369_v60 = vld [vmem:[#allocation3 + $0x68] sm:$0xff]  ;;  %v3196_v58 = vrot.slane %v3127_v55, 7  ;;  %5521 = vmatpush3.bf16.msra.mxu1 %v7052_v35 }
 0x221   : > { %3989 = vst.msk [vmem:[#allocation2 + $0x20] sm:$0xff] %vm1169_vm9, %v3901_v6  ;;  %v2604_v48 = vld [vmem:[#allocation3 + $0x68] sm:$0x7f]  ;;  %v2541_v41 = vmax.f32 %v2439_v54, 0.0  ;;  %v3231_v4 = vpop.permute.xlu1 %3230  ;;  %5316 = vmatmul.mubr.f32.gmra.mrb[72].mxu0 %v4107_v40  ;;  %5514 = vmatprep.subr.bf16.mxu1 %v7084_v52 }
 0x222   : > { %3582 = vst.msk [vmem:[#allocation2 + $0x38] sm:$0xff] %vm746_vm4, %v3489_v28  ;;  %v3690_v32 = vsel %vm487_vm1, %v7588_v20, %v3689_v26  ;;  %v2670_v16 = vrot.slane %v2604_v48, 7  ;;  %v2945_v0 = vld [vmem:[#allocation3 + $0x49] sm:$0x7f]  ;;  %v3197_v21 = vsel %vm487_vm1, %v7518_v34, %v3196_v58 }
 0x223   : > { %3401 = vst.msk [vmem:[#allocation2 + $0x140] sm:$0xff] %vm566_vm0, %v3369_v60  ;;  %3740 = vrot.lane.b32.xlu0 %v3690_v32, %s5652_s25  ;;  %2573 = vst.msk [vmem:[#allocation3 + $0x70] sm:$0xff] %vm566_vm0, %v2541_v41  ;;  %v7638_v29 = vld [vmem:[#allocation3 + $0x68] sm:$0xff] }
 0x224   : > { %3325 = vst.msk [vmem:[#allocation2 + $0x18] sm:$0xff] %vm1169_vm9, %v3231_v4  ;;  %3014 = vrot.lane.b32.xlu1 %v2945_v0, %s5652_s25  ;;  %v2671_v38 = vsel %vm487_vm1, %v2669_v1, %v2670_v16  ;;  %5522 = vmatpush3.bf16.msra.mxu1 %v7084_v52  ;;  %v3433_v42 = vld [vmem:[#allocation3 + $0x69] sm:$0x7f] }
 0x225   : > { %2739 = vst.msk [vmem:[#allocation2 + $0x168] sm:$0xff] %vm566_vm0, %v2671_v38  ;;  %v2817_v39 = vpop.permute.xlu1 %2816  ;;  %5515 = vmatprep.subr.bf16.mxu1 %v7110_v46  ;;  %v3129_v55 = vld [vmem:[#allocation3 + $0x68] sm:$0x7f] }
 0x226   : > { %v4110_v33 = vld [vmem:[#allocation2 + $0x100] sm:$0xff]  ;;  %2906 = vst.msk [vmem:[#allocation2 + $0x30] sm:$0xff] %vm746_vm4, %v2817_v39  ;;  %v3199_v16 = vrot.slane %v3129_v55, 7 }
 0x227   : > { %3920 = vrot.lane.b32.xlu0 %v7638_v29, %s5650_s26  ;;  %v4113_v51 = vld [vmem:[#allocation2 + $0x118] sm:$0xff]  ;;  %v3723_v36 = vpop.permute.xlu0 %3722  ;;  %5318 = vmatprep.mubr.f32.mxu0 %v4110_v33 }
 0x228   : > { %v4082_v25 = vld [vmem:[#allocation2 + $0x20] sm:$0xff]  ;;  %3250 = vrot.lane.b32.xlu1 %v3197_v21, %s5650_s26  ;;  %3810 = vst.msk [vmem:[#allocation2 + $0x38] sm:$0xfe] %vm1654_vm7, %v3723_v36  ;;  %v2218_v35 = vpop.f32.mrb[30].mxu0  ;;  %5319 = vmatmul.mubr.f32.gmra.mrb[74].mxu0 %v4113_v51  ;;  %v3200_v39 = vsel %vm487_vm1, %v7588_v20, %v3199_v16 }
 0x229   : > { %4298 = vmatprep.mubr.f32.mxu1 %v4082_v25  ;;  %v2219_v1 = vadd.f32 %v7546_v45, %v2218_v35  ;;  %v2997_v44 = vpop.permute.xlu1 %2996  ;;  %v2220_v27 = vpop.f32.mrb[31].mxu0  ;;  %5523 = vmatpush3.bf16.msra.mxu1 %v7110_v46 }
 0x22a   : > { %3086 = vst.msk [vmem:[#allocation2 + $0x30] sm:$0xff] %vm927_vm8, %v2997_v44  ;;  %v7654_v17 = vld [vmem:[#allocation3 + $0x70] sm:$0xff]  ;;  %5516 = vmatprep.subr.bf16.mxu1 %v7140_v10 }
 0x22b   : > { %v4081_v34 = vld [vmem:[#allocation2 + $0x18] sm:$0xff]  ;;  %3508 = vrot.lane.b32.xlu0 %v7612_v59, %s5651_s27  ;;  %v7656_v22 = vld [vmem:[#allocation3 + $0x70] sm:$0xff]  ;;  %v2444_v43 = vadd.f32 %v7271_v37, %v2219_v1  ;;  %v3903_v6 = vpop.permute.xlu0 %3902  ;;  %v7662_v12 = vrot.slane %v7654_v17, 7 }
 0x22c   : > { %4299 = vmatmul.mubr.f32.gmra.mrb[34].mxu1 %v4081_v34  ;;  %2836 = vrot.lane.b32.xlu1 %v7510_v9, %s5651_s27  ;;  %3402 = vst.msk [vmem:[#allocation2 + $0x158] sm:$0xff] %vm566_vm0, %v7656_v22  ;;  %v2672_v52 = vrot.slane %v7656_v22, 7  ;;  %v7680_v9 = vpop.f32.mrb[26].mxu1 }
 0x22d   : > { %3990 = vst.msk [vmem:[#allocation2 + $0x38] sm:$0xff] %vm1169_vm9, %v3903_v6  ;;  %v2542_v2 = vmax.f32 %v2444_v43, 0.0  ;;  %v3233_v14 = vpop.permute.xlu1 %3232  ;;  %v7683_v53 = vpop.f32.mrb[27].mxu1  ;;  %5524 = vmatpush3.bf16.msra.mxu1 %v7140_v10 }
 0x22e   : > { %2740 = vst.msk [vmem:[#allocation2 + $0x180] sm:$0xfe] %vm564_vm2, %v2672_v52  ;;  %5517 = vmatprep.subr.bf16.mxu1 %v7170_v23 }
 0x22f   : > { %3326 = vst.msk [vmem:[#allocation2 + $0x30] sm:$0xfe] %vm1167_vm6, %v3233_v14  ;;  %3742 = vrot.lane.b32.xlu0 %v7662_v12, %s5652_s25  ;;  %v3491_v37 = vpop.permute.xlu0 %3490 }
 0x230   : > { %2574 = vst.msk [vmem:[#allocation3 + $0x78] sm:$0xff] %vm566_vm0, %v2542_v2  ;;  %3016 = vrot.lane.b32.xlu1 %v7549_v7, %s5652_s25 }
 0x231   : > { %3583 = vst.msk [vmem:[#allocation2 + $0x50] sm:$0x7f] %vm1426_vm5, %v3491_v37  ;;  %v2819_v46 = vpop.permute.xlu1 %2818  ;;  %5525 = vmatpush3.bf16.msra.mxu1 %v7170_v23 }
 0x232   : > { %2907 = vst.msk [vmem:[#allocation2 + $0x48] sm:$0xff] %vm746_vm4, %v2819_v46  ;;  %5518 = vmatprep.subr.bf16.mxu1 %v7199_v18 }
 0x233   : > { %3922 = vrot.lane.b32.xlu0 %v7654_v17, %s5650_s26 }
 0x234   : > { %3252 = vrot.lane.b32.xlu1 %v7588_v20, %s5650_s26  ;;  %v4085_v7 = vld [vmem:[#allocation2 + $0x38] sm:$0xff]  ;;  %v2223_v13 = vpop.f32.mrb[32].mxu0 }
 0x235   : > { %4303 = vmatprep.mubr.f32.mxu1 %v4085_v7  ;;  %v3725_v19 = vpop.permute.xlu0 %3724  ;;  %v2224_v61 = vadd.f32 %v7546_v45, %v2223_v13  ;;  %v2999_v3 = vpop.permute.xlu1 %2998  ;;  %5526 = vmatpush3.bf16.msra.mxu1 %v7199_v18 }
 0x236   : > { %3811 = vst.msk [vmem:[#allocation2 + $0x50] sm:$0xff] %vm927_vm8, %v3725_v19  ;;  %v2225_v10 = vpop.f32.mrb[33].mxu0  ;;  %v4084_v5 = vld [vmem:[#allocation2 + $0x30] sm:$0xff] }
 0x237   : > { %v7695_v28 = vld [vmem:[#allocation3 + $0x71] sm:$0xff]  ;;  %v4031_v50 = vld [vmem:[#allocation3 + $0x79] sm:$0x7f]  ;;  %3087 = vst.msk [vmem:[#allocation2 + $0x48] sm:$0x7f] %vm929_vm10, %v2999_v3  ;;  %4304 = vmatmul.mubr.f32.gmra.mrb[36].mxu1 %v4084_v5  ;;  %3510 = vrot.lane.b32.xlu0 %v3433_v42, %s5651_s27  ;;  %v2449_v26 = vadd.f32 %v7333_v8, %v2224_v61 }
 0x238   : > { %v3626_v54 = vld [vmem:[#allocation3 + $0x78] sm:$0x7f]  ;;  %4060 = vst.msk [vmem:[#allocation2 + $0x130] sm:$0xff] %vm566_vm0, %v7695_v28  ;;  %2838 = vrot.lane.b32.xlu1 %v7567_v30, %s5651_s27 }
 0x239   : > { %4061 = vst.msk [vmem:[#allocation2 + $0x148] sm:$0x7f] %vm1896_vm3, %v4031_v50  ;;  %v3692_v23 = vrot.slane %v3626_v54, 7  ;;  %v3905_v40 = vpop.permute.xlu0 %3904  ;;  %v3371_v60 = vld [vmem:[#allocation3 + $0x78] sm:$0xff]  ;;  %v2543_v41 = vmax.f32 %v2449_v26, 0.0  ;;  %v3235_v4 = vpop.permute.xlu1 %3234 }
 0x23a   : > { %v2606_v48 = vld [vmem:[#allocation3 + $0x78] sm:$0x7f]  ;;  %3991 = vst.msk [vmem:[#allocation2 + $0x50] sm:$0xff] %vm1169_vm9, %v3905_v40  ;;  %3327 = vst.msk [vmem:[#allocation2 + $0x48] sm:$0xff] %vm1169_vm9, %v3235_v4 }
 0x23b   : > { %v3693_v32 = vsel %vm487_vm1, %v7662_v12, %v3692_v23  ;;  %3403 = vst.msk [vmem:[#allocation2 + $0x170] sm:$0xff] %vm566_vm0, %v3371_v60  ;;  %v2673_v8 = vrot.slane %v2606_v48, 7  ;;  %v2947_v30 = vld [vmem:[#allocation3 + $0x59] sm:$0x7f]  ;;  %2575 = vst.msk [vmem:[#allocation3 + $0x80] sm:$0xff] %vm566_vm0, %v2543_v41 }
 0x23c   : > { %3744 = vrot.lane.b32.xlu0 %v3693_v32, %s5652_s25  ;;  %3018 = vrot.lane.b32.xlu1 %v2947_v30, %s5652_s25  ;;  %v7720_v38 = vld [vmem:[#allocation3 + $0x78] sm:$0xff] }
 0x23d   : > { %v2674_v0 = vsel %vm487_vm1, %v2672_v52, %v2673_v8  ;;  %v3493_v58 = vpop.permute.xlu0 %3492  ;;  %v2821_v18 = vpop.permute.xlu1 %2820  ;;  %v3435_v10 = vld [vmem:[#allocation3 + $0x79] sm:$0x7f] }
 0x23e   : > { %2741 = vst.msk [vmem:[#allocation2 + $0x198] sm:$0xff] %vm566_vm0, %v2674_v0  ;;  %v3131_v55 = vld [vmem:[#allocation3 + $0x78] sm:$0x7f] }
 0x23f   : > { %3584 = vst.msk [vmem:[#allocation2 + $0x68] sm:$0xff] %vm746_vm4, %v3493_v58  ;;  %v4116_v25 = vld [vmem:[#allocation2 + $0x130] sm:$0xff]  ;;  %2908 = vst.msk [vmem:[#allocation2 + $0x60] sm:$0xff] %vm746_vm4, %v2821_v18 }
 0x240   : > { %3924 = vrot.lane.b32.xlu0 %v7720_v38, %s5650_s26  ;;  %v4119_v21 = vld [vmem:[#allocation2 + $0x148] sm:$0xff]  ;;  %3254 = vrot.lane.b32.xlu1 %v3200_v39, %s5650_s26  ;;  %v2228_v33 = vpop.f32.mrb[34].mxu0 }
 0x241   : > { %5321 = vmatprep.mubr.f32.mxu0 %v4116_v25  ;;  %v3727_v51 = vpop.permute.xlu0 %3726  ;;  %v4088_v36 = vld [vmem:[#allocation2 + $0x50] sm:$0xff]  ;;  %v2229_v35 = vadd.f32 %v7546_v45, %v2228_v33  ;;  %v3001_v1 = vpop.permute.xlu1 %3000  ;;  %v4087_v27 = vld [vmem:[#allocation2 + $0x48] sm:$0xff] }
 0x242   : > { %5322 = vmatmul.mubr.f32.gmra.mrb[76].mxu0 %v4119_v21  ;;  %3812 = vst.msk [vmem:[#allocation2 + $0x68] sm:$0xfe] %vm1654_vm7, %v3727_v51  ;;  %v2230_v44 = vpop.f32.mrb[35].mxu0  ;;  %4308 = vmatprep.mubr.f32.mxu1 %v4088_v36  ;;  %v7733_v20 = vld [vmem:[#allocation3 + $0x80] sm:$0xff] }
 0x243   : > { %3088 = vst.msk [vmem:[#allocation2 + $0x60] sm:$0xff] %vm927_vm8, %v3001_v1  ;;  %4309 = vmatmul.mubr.f32.gmra.mrb[38].mxu1 %v4087_v27  ;;  %v3372_v34 = vld [vmem:[#allocation3 + $0x80] sm:$0xff]  ;;  %v2454_v22 = vadd.f32 %v7330_v49, %v2229_v35  ;;  %v7739_v43 = vrot.slane %v7733_v20, 7 }
 0x244   : > { %3512 = vrot.lane.b32.xlu0 %v7695_v28, %s5651_s27  ;;  %2840 = vrot.lane.b32.xlu1 %v7580_v31, %s5651_s27  ;;  %3404 = vst.msk [vmem:[#allocation2 + $0x188] sm:$0xff] %vm566_vm0, %v3372_v34  ;;  %v2675_v6 = vrot.slane %v3372_v34, 7  ;;  %v7750_v31 = vpop.f32.mrb[28].mxu1 }
 0x245   : > { %v3907_v52 = vpop.permute.xlu0 %3906  ;;  %v2544_v2 = vmax.f32 %v2454_v22, 0.0  ;;  %v3237_v14 = vpop.permute.xlu1 %3236 }
 0x246   : > { %3992 = vst.msk [vmem:[#allocation2 + $0x68] sm:$0xff] %vm1169_vm9, %v3907_v52  ;;  %v7753_v46 = vpop.f32.mrb[29].mxu1 }
 0x247   : > { %2742 = vst.msk [vmem:[#allocation2 + $0x1b0] sm:$0xfe] %vm564_vm2, %v2675_v6 }
 0x248   : > { %3328 = vst.msk [vmem:[#allocation2 + $0x60] sm:$0xfe] %vm1167_vm6, %v3237_v14  ;;  %3746 = vrot.lane.b32.xlu0 %v7739_v43, %s5652_s25  ;;  %3020 = vrot.lane.b32.xlu1 %v7612_v59, %s5652_s25 }
 0x249   : > { %2576 = vst.msk [vmem:[#allocation3 + $0x88] sm:$0xff] %vm566_vm0, %v2544_v2  ;;  %v3495_v49 = vpop.permute.xlu0 %3494  ;;  %v2823_v37 = vpop.permute.xlu1 %2822 }
 0x24a   : > { %3585 = vst.msk [vmem:[#allocation2 + $0x80] sm:$0x7f] %vm1426_vm5, %v3495_v49  ;;  %v7806_v49 = vpop.f32.mrb[30].mxu1 }
 0x24b   : > { %2909 = vst.msk [vmem:[#allocation2 + $0x78] sm:$0xff] %vm746_vm4, %v2823_v37 }
 0x24c   : > { %3926 = vrot.lane.b32.xlu0 %v7733_v20, %s5650_s26  ;;  %3256 = vrot.lane.b32.xlu1 %v7662_v12, %s5650_s26  ;;  %v2233_v7 = vpop.f32.mrb[36].mxu0 }
 0x24d   : > { %v3729_v13 = vpop.permute.xlu0 %3728  ;;  %v4091_v19 = vld [vmem:[#allocation2 + $0x68] sm:$0xff]  ;;  %v2234_v59 = vadd.f32 %v7546_v45, %v2233_v7  ;;  %v2235_v3 = vpop.f32.mrb[37].mxu0 }
 0x24e   : > { %3813 = vst.msk [vmem:[#allocation2 + $0x80] sm:$0xff] %vm927_vm8, %v3729_v13  ;;  %v3003_v61 = vpop.permute.xlu1 %3002  ;;  %4313 = vmatprep.mubr.f32.mxu1 %v4091_v19 }
 0x24f   : > { %v4090_v5 = vld [vmem:[#allocation2 + $0x60] sm:$0xff]  ;;  %3089 = vst.msk [vmem:[#allocation2 + $0x78] sm:$0x7f] %vm929_vm10, %v3003_v61  ;;  %v2459_v26 = vadd.f32 %v7400_v47, %v2234_v59  ;;  %v2949_v47 = vld [vmem:[#allocation3 + $0x69] sm:$0x7f] }
 0x250   : > { %v7762_v42 = vld [vmem:[#allocation3 + $0x81] sm:$0xff]  ;;  %v4033_v50 = vld [vmem:[#allocation3 + $0x89] sm:$0x7f]  ;;  %3514 = vrot.lane.b32.xlu0 %v3435_v10, %s5651_s27  ;;  %4314 = vmatmul.mubr.f32.gmra.mrb[40].mxu1 %v4090_v5 }
 0x251   : > { %v3628_v54 = vld [vmem:[#allocation3 + $0x88] sm:$0x7f]  ;;  %4062 = vst.msk [vmem:[#allocation2 + $0x160] sm:$0xff] %vm566_vm0, %v7762_v42  ;;  %2842 = vrot.lane.b32.xlu1 %v7638_v29, %s5651_s27  ;;  %v3909_v40 = vpop.permute.xlu0 %3908  ;;  %v2545_v41 = vmax.f32 %v2459_v26, 0.0  ;;  %v3202_v29 = vrot.slane %v3131_v55, 7 }
 0x252   : > { %4063 = vst.msk [vmem:[#allocation2 + $0x178] sm:$0x7f] %vm1896_vm3, %v4033_v50  ;;  %v3695_v23 = vrot.slane %v3628_v54, 7  ;;  %v3373_v60 = vld [vmem:[#allocation3 + $0x88] sm:$0xff]  ;;  %v3239_v4 = vpop.permute.xlu1 %3238 }
 0x253   : > { %v2608_v48 = vld [vmem:[#allocation3 + $0x88] sm:$0x7f]  ;;  %3993 = vst.msk [vmem:[#allocation2 + $0x80] sm:$0xff] %vm1169_vm9, %v3909_v40  ;;  %3329 = vst.msk [vmem:[#allocation2 + $0x78] sm:$0xff] %vm1169_vm9, %v3239_v4  ;;  %v3203_v18 = vsel %vm487_vm1, %v7662_v12, %v3202_v29 }
 0x254   : > { %v3696_v32 = vsel %vm487_vm1, %v7739_v43, %v3695_v23  ;;  %3405 = vst.msk [vmem:[#allocation2 + $0x1a0] sm:$0xff] %vm566_vm0, %v3373_v60  ;;  %v2676_v8 = vrot.slane %v2608_v48, 7  ;;  %2577 = vst.msk [vmem:[#allocation3 + $0x90] sm:$0xff] %vm566_vm0, %v2545_v41  ;;  %v7783_v58 = vld [vmem:[#allocation3 + $0x88] sm:$0xff] }
 0x255   : > { %3748 = vrot.lane.b32.xlu0 %v3696_v32, %s5652_s25  ;;  %3022 = vrot.lane.b32.xlu1 %v2949_v47, %s5652_s25  ;;  %v3497_v16 = vpop.permute.xlu0 %3496  ;;  %v3437_v3 = vld [vmem:[#allocation3 + $0x89] sm:$0x7f] }
 0x256   : > { %v2677_v30 = vsel %vm487_vm1, %v2675_v6, %v2676_v8  ;;  %3586 = vst.msk [vmem:[#allocation2 + $0x98] sm:$0xff] %vm746_vm4, %v3497_v16  ;;  %v2825_v0 = vpop.permute.xlu1 %2824  ;;  %v3133_v55 = vld [vmem:[#allocation3 + $0x88] sm:$0x7f] }
 0x257   : > { %2743 = vst.msk [vmem:[#allocation2 + $0x1c8] sm:$0xff] %vm566_vm0, %v2677_v30 }
 0x258   : > { %v4122_v39 = vld [vmem:[#allocation2 + $0x160] sm:$0xff]  ;;  %2910 = vst.msk [vmem:[#allocation2 + $0x90] sm:$0xff] %vm746_vm4, %v2825_v0  ;;  %v2238_v21 = vpop.f32.mrb[38].mxu0 }
 0x259   : > { %3928 = vrot.lane.b32.xlu0 %v7783_v58, %s5650_s26  ;;  %v4125_v25 = vld [vmem:[#allocation2 + $0x178] sm:$0xff]  ;;  %3258 = vrot.lane.b32.xlu1 %v3203_v18, %s5650_s26  ;;  %v3731_v33 = vpop.permute.xlu0 %3730  ;;  %v2239_v36 = vadd.f32 %v7546_v45, %v2238_v21  ;;  %v2240_v1 = vpop.f32.mrb[39].mxu0 }
 0x25a   : > { %5324 = vmatprep.mubr.f32.mxu0 %v4122_v39  ;;  %v4094_v51 = vld [vmem:[#allocation2 + $0x80] sm:$0xff]  ;;  %3814 = vst.msk [vmem:[#allocation2 + $0x98] sm:$0xfe] %vm1654_vm7, %v3731_v33  ;;  %v3005_v35 = vpop.permute.xlu1 %3004  ;;  %v4093_v44 = vld [vmem:[#allocation2 + $0x78] sm:$0xff] }
 0x25b   : > { %5325 = vmatmul.mubr.f32.gmra.mrb[78].mxu0 %v4125_v25  ;;  %4318 = vmatprep.mubr.f32.mxu1 %v4094_v51  ;;  %3090 = vst.msk [vmem:[#allocation2 + $0x90] sm:$0xff] %vm927_vm8, %v3005_v35  ;;  %v7796_v12 = vld [vmem:[#allocation3 + $0x90] sm:$0xff]  ;;  %v2464_v34 = vadd.f32 %v7397_v56, %v2239_v36  ;;  %v7812_v56 = vpop.f32.mrb[31].mxu1 }
 0x25c   : > { %4319 = vmatmul.mubr.f32.gmra.mrb[42].mxu1 %v4093_v44  ;;  %v3374_v27 = vld [vmem:[#allocation3 + $0x90] sm:$0xff]  ;;  %v7802_v22 = vrot.slane %v7796_v12, 7 }
 0x25d   : > { %3516 = vrot.lane.b32.xlu0 %v7762_v42, %s5651_s27  ;;  %2844 = vrot.lane.b32.xlu1 %v7654_v17, %s5651_s27  ;;  %3406 = vst.msk [vmem:[#allocation2 + $0x1b8] sm:$0xff] %vm566_vm0, %v3374_v27  ;;  %v2678_v6 = vrot.slane %v3374_v27, 7  ;;  %v3911_v52 = vpop.permute.xlu0 %3910  ;;  %v2546_v2 = vmax.f32 %v2464_v34, 0.0 }
 0x25e   : > { %3994 = vst.msk [vmem:[#allocation2 + $0x98] sm:$0xff] %vm1169_vm9, %v3911_v52  ;;  %v3241_v14 = vpop.permute.xlu1 %3240 }
 0x25f   : > { %2744 = vst.msk [vmem:[#allocation2 + $0x1e0] sm:$0xfe] %vm564_vm2, %v2678_v6 }
 0x260   : > { %3330 = vst.msk [vmem:[#allocation2 + $0x90] sm:$0xfe] %vm1167_vm6, %v3241_v14 }
 0x261   : > { %3750 = vrot.lane.b32.xlu0 %v7802_v22, %s5652_s25  ;;  %2578 = vst.msk [vmem:[#allocation3 + $0x98] sm:$0xff] %vm566_vm0, %v2546_v2  ;;  %3024 = vrot.lane.b32.xlu1 %v7695_v28, %s5652_s25  ;;  %v3499_v17 = vpop.permute.xlu0 %3498 }
 0x262   : > { %3587 = vst.msk [vmem:[#allocation2 + $0xb0] sm:$0x7f] %vm1426_vm5, %v3499_v17  ;;  %v2827_v37 = vpop.permute.xlu1 %2826 }
 0x263   : > { %2911 = vst.msk [vmem:[#allocation2 + $0xa8] sm:$0xff] %vm746_vm4, %v2827_v37 }
 0x264   : > { %v2243_v7 = vpop.f32.mrb[40].mxu0 }
 0x265   : > { %3930 = vrot.lane.b32.xlu0 %v7796_v12, %s5650_s26  ;;  %3260 = vrot.lane.b32.xlu1 %v7739_v43, %s5650_s26  ;;  %v3733_v13 = vpop.permute.xlu0 %3732  ;;  %v4097_v19 = vld [vmem:[#allocation2 + $0x98] sm:$0xff]  ;;  %v2244_v59 = vadd.f32 %v7546_v45, %v2243_v7  ;;  %v2245_v61 = vpop.f32.mrb[41].mxu0 }
 0x266   : > { %3815 = vst.msk [vmem:[#allocation2 + $0xb0] sm:$0xff] %vm927_vm8, %v3733_v13  ;;  %v3007_v28 = vpop.permute.xlu1 %3006  ;;  %4323 = vmatprep.mubr.f32.mxu1 %v4097_v19 }
 0x267   : > { %v4096_v10 = vld [vmem:[#allocation2 + $0x90] sm:$0xff]  ;;  %3091 = vst.msk [vmem:[#allocation2 + $0xa8] sm:$0x7f] %vm929_vm10, %v3007_v28  ;;  %v2469_v26 = vadd.f32 %v7467_v15, %v2244_v59  ;;  %v2951_v15 = vld [vmem:[#allocation3 + $0x79] sm:$0x7f] }
 0x268   : > { %v7825_v5 = vld [vmem:[#allocation3 + $0x91] sm:$0xff]  ;;  %v4035_v50 = vld [vmem:[#allocation3 + $0x99] sm:$0x7f]  ;;  %4324 = vmatmul.mubr.f32.gmra.mrb[44].mxu1 %v4096_v10 }
 0x269   : > { %3518 = vrot.lane.b32.xlu0 %v3437_v3, %s5651_s27  ;;  %v3630_v54 = vld [vmem:[#allocation3 + $0x98] sm:$0x7f]  ;;  %4064 = vst.msk [vmem:[#allocation2 + $0x190] sm:$0xff] %vm566_vm0, %v7825_v5  ;;  %2846 = vrot.lane.b32.xlu1 %v7720_v38, %s5651_s27  ;;  %v3913_v40 = vpop.permute.xlu0 %3912  ;;  %v2547_v41 = vmax.f32 %v2469_v26, 0.0  ;;  %v3205_v38 = vrot.slane %v3133_v55, 7 }
 0x26a   : > { %4065 = vst.msk [vmem:[#allocation2 + $0x1a8] sm:$0x7f] %vm1896_vm3, %v4035_v50  ;;  %v3698_v23 = vrot.slane %v3630_v54, 7  ;;  %v3375_v60 = vld [vmem:[#allocation3 + $0x98] sm:$0xff]  ;;  %v3243_v4 = vpop.permute.xlu1 %3242 }
 0x26b   : > { %v2610_v48 = vld [vmem:[#allocation3 + $0x98] sm:$0x7f]  ;;  %3995 = vst.msk [vmem:[#allocation2 + $0xb0] sm:$0xff] %vm1169_vm9, %v3913_v40  ;;  %3331 = vst.msk [vmem:[#allocation2 + $0xa8] sm:$0xff] %vm1169_vm9, %v3243_v4  ;;  %v3206_v0 = vsel %vm487_vm1, %v7739_v43, %v3205_v38 }
 0x26c   : > { %v3699_v32 = vsel %vm487_vm1, %v7802_v22, %v3698_v23  ;;  %3407 = vst.msk [vmem:[#allocation2 + $0x1d0] sm:$0xff] %vm566_vm0, %v3375_v60  ;;  %v2679_v8 = vrot.slane %v2610_v48, 7  ;;  %2579 = vst.msk [vmem:[#allocation3 + $0xa0] sm:$0xff] %vm566_vm0, %v2547_v41  ;;  %v7846_v16 = vld [vmem:[#allocation3 + $0x98] sm:$0xff] }
 0x26d   : > { %3752 = vrot.lane.b32.xlu0 %v3699_v32, %s5652_s25  ;;  %3026 = vrot.lane.b32.xlu1 %v2951_v15, %s5652_s25  ;;  %v3501_v29 = vpop.permute.xlu0 %3500  ;;  %v3439_v59 = vld [vmem:[#allocation3 + $0x99] sm:$0x7f] }
 0x26e   : > { %v2680_v47 = vsel %vm487_vm1, %v2678_v6, %v2679_v8  ;;  %3588 = vst.msk [vmem:[#allocation2 + $0xc8] sm:$0xff] %vm746_vm4, %v3501_v29  ;;  %v2829_v30 = vpop.permute.xlu1 %2828  ;;  %v3135_v26 = vld [vmem:[#allocation3 + $0x98] sm:$0x7f] }
 0x26f   : > { %2745 = vst.msk [vmem:[#allocation2 + $0x1f8] sm:$0xff] %vm566_vm0, %v2680_v47 }
 0x270   : > { %v4128_v18 = vld [vmem:[#allocation2 + $0x190] sm:$0xff]  ;;  %2912 = vst.msk [vmem:[#allocation2 + $0xc0] sm:$0xff] %vm746_vm4, %v2829_v30  ;;  %v2248_v25 = vpop.f32.mrb[42].mxu0 }
 0x271   : > { %3932 = vrot.lane.b32.xlu0 %v7846_v16, %s5650_s26  ;;  %v4131_v39 = vld [vmem:[#allocation2 + $0x1a8] sm:$0xff]  ;;  %3262 = vrot.lane.b32.xlu1 %v3206_v0, %s5650_s26  ;;  %v3735_v21 = vpop.permute.xlu0 %3734  ;;  %v2249_v51 = vadd.f32 %v7546_v45, %v2248_v25  ;;  %v2250_v35 = vpop.f32.mrb[43].mxu0 }
 0x272   : > { %5327 = vmatprep.mubr.f32.mxu0 %v4128_v18  ;;  %v4100_v33 = vld [vmem:[#allocation2 + $0xb0] sm:$0xff]  ;;  %3816 = vst.msk [vmem:[#allocation2 + $0xc8] sm:$0xfe] %vm1654_vm7, %v3735_v21  ;;  %v3009_v36 = vpop.permute.xlu1 %3008  ;;  %v4099_v1 = vld [vmem:[#allocation2 + $0xa8] sm:$0xff] }
 0x273   : > { %5328 = vmatmul.mubr.f32.gmra.mrb[80].mxu0 %v4131_v39  ;;  %4328 = vmatprep.mubr.f32.mxu1 %v4100_v33  ;;  %3092 = vst.msk [vmem:[#allocation2 + $0xc0] sm:$0xff] %vm927_vm8, %v3009_v36  ;;  %v7859_v43 = vld [vmem:[#allocation3 + $0xa0] sm:$0xff]  ;;  %v2474_v27 = vadd.f32 %v7464_v62, %v2249_v51 }
 0x274   : > { %4329 = vmatmul.mubr.f32.gmra.mrb[46].mxu1 %v4099_v1  ;;  %v3376_v44 = vld [vmem:[#allocation3 + $0xa0] sm:$0xff]  ;;  %v7865_v34 = vrot.slane %v7859_v43, 7 }
 0x275   : > { %3520 = vrot.lane.b32.xlu0 %v7825_v5, %s5651_s27  ;;  %2848 = vrot.lane.b32.xlu1 %v7733_v20, %s5651_s27  ;;  %3408 = vst.msk [vmem:[#allocation2 + $0x1e8] sm:$0xff] %vm566_vm0, %v3376_v44  ;;  %v2681_v6 = vrot.slane %v3376_v44, 7  ;;  %v3915_v52 = vpop.permute.xlu0 %3914  ;;  %v2548_v2 = vmax.f32 %v2474_v27, 0.0 }
 0x276   : > { %3996 = vst.msk [vmem:[#allocation2 + $0xc8] sm:$0xff] %vm1169_vm9, %v3915_v52  ;;  %v3245_v14 = vpop.permute.xlu1 %3244 }
 0x277   : > { %2746 = vst.msk [vmem:[#allocation2 + $0x210] sm:$0xfe] %vm564_vm2, %v2681_v6 }
 0x278   : > { %3332 = vst.msk [vmem:[#allocation2 + $0xc0] sm:$0xfe] %vm1167_vm6, %v3245_v14 }
 0x279   : > { %3754 = vrot.lane.b32.xlu0 %v7865_v34, %s5652_s25  ;;  %2580 = vst.msk [vmem:[#allocation3 + $0xa8] sm:$0xff] %vm566_vm0, %v2548_v2  ;;  %3028 = vrot.lane.b32.xlu1 %v7762_v42, %s5652_s25  ;;  %v3503_v62 = vpop.permute.xlu0 %3502 }
 0x27a   : > { %3589 = vst.msk [vmem:[#allocation2 + $0xe0] sm:$0x7f] %vm1426_vm5, %v3503_v62  ;;  %v2831_v20 = vpop.permute.xlu1 %2830  ;;  %v7944_v62 = vld [vmem:[%s8787_s2] ss:$0 sm:$0xff] }
 0x27b   : > { %2913 = vst.msk [vmem:[#allocation2 + $0xd8] sm:$0xff] %vm746_vm4, %v2831_v20 }
 0x27c   : > { %v2253_v17 = vpop.f32.mrb[44].mxu0 }
 0x27d   : > { %3934 = vrot.lane.b32.xlu0 %v7859_v43, %s5650_s26  ;;  %3264 = vrot.lane.b32.xlu1 %v7802_v22, %s5650_s26  ;;  %v3737_v37 = vpop.permute.xlu0 %3736  ;;  %v4103_v7 = vld [vmem:[#allocation2 + $0xc8] sm:$0xff]  ;;  %v2254_v13 = vadd.f32 %v7546_v45, %v2253_v17  ;;  %v2255_v19 = vpop.f32.mrb[45].mxu0 }
 0x27e   : > { %3817 = vst.msk [vmem:[#allocation2 + $0xe0] sm:$0xff] %vm927_vm8, %v3737_v37  ;;  %v3011_v42 = vpop.permute.xlu1 %3010  ;;  %4333 = vmatprep.mubr.f32.mxu1 %v4103_v7 }
 0x27f   : > { %v4102_v28 = vld [vmem:[#allocation2 + $0xc0] sm:$0xff]  ;;  %3093 = vst.msk [vmem:[#allocation2 + $0xd8] sm:$0x7f] %vm929_vm10, %v3011_v42  ;;  %v2479_v50 = vadd.f32 %v7534_v11, %v2254_v13  ;;  %v2953_v11 = vld [vmem:[#allocation3 + $0x89] sm:$0x7f] }
 0x280   : > { %v7884_v61 = vld [vmem:[#allocation3 + $0xa1] sm:$0xff]  ;;  %v4037_v3 = vld [vmem:[#allocation3 + $0xa9] sm:$0x7f]  ;;  %4334 = vmatmul.mubr.f32.gmra.mrb[48].mxu1 %v4102_v28 }
 0x281   : > { %3522 = vrot.lane.b32.xlu0 %v3439_v59, %s5651_s27  ;;  %v3632_v10 = vld [vmem:[#allocation3 + $0xa8] sm:$0x7f]  ;;  %4066 = vst.msk [vmem:[#allocation2 + $0x1c0] sm:$0xff] %vm566_vm0, %v7884_v61  ;;  %2850 = vrot.lane.b32.xlu1 %v7783_v58, %s5651_s27  ;;  %v3917_v23 = vpop.permute.xlu0 %3916  ;;  %v2549_v60 = vmax.f32 %v2479_v50, 0.0  ;;  %v3208_v58 = vrot.slane %v3135_v26, 7 }
 0x282   : > { %4067 = vst.msk [vmem:[#allocation2 + $0x1d8] sm:$0x7f] %vm1896_vm3, %v4037_v3  ;;  %v3701_v54 = vrot.slane %v3632_v10, 7  ;;  %v3377_v55 = vld [vmem:[#allocation3 + $0xa8] sm:$0xff]  ;;  %v3247_v48 = vpop.permute.xlu1 %3246 }
 0x283   : > { %v2612_v40 = vld [vmem:[#allocation3 + $0xa8] sm:$0x7f]  ;;  %3997 = vst.msk [vmem:[#allocation2 + $0xe0] sm:$0xff] %vm1169_vm9, %v3917_v23  ;;  %3333 = vst.msk [vmem:[#allocation2 + $0xd8] sm:$0xff] %vm1169_vm9, %v3247_v48  ;;  %v3209_v47 = vsel %vm487_vm1, %v7802_v22, %v3208_v58 }
 0x284   : > { %v3702_v41 = vsel %vm487_vm1, %v7865_v34, %v3701_v54  ;;  %3409 = vst.msk [vmem:[#allocation2 + $0x200] sm:$0xff] %vm566_vm0, %v3377_v55  ;;  %v2682_v4 = vrot.slane %v2612_v40, 7  ;;  %2581 = vst.msk [vmem:[#allocation3 + $0xb0] sm:$0xff] %vm566_vm0, %v2549_v60  ;;  %v7905_v38 = vld [vmem:[#allocation3 + $0xa8] sm:$0xff] }
 0x285   : > { %3756 = vrot.lane.b32.xlu0 %v3702_v41, %s5652_s25  ;;  %3030 = vrot.lane.b32.xlu1 %v2953_v11, %s5652_s25  ;;  %v3505_v8 = vpop.permute.xlu0 %3504  ;;  %v3441_v37 = vld [vmem:[#allocation3 + $0xa9] sm:$0x7f] }
 0x286   : > { %v2683_v32 = vsel %vm487_vm1, %v2681_v6, %v2682_v4  ;;  %3590 = vst.msk [vmem:[#allocation2 + $0xf8] sm:$0xff] %vm746_vm4, %v3505_v8  ;;  %v2833_v15 = vpop.permute.xlu1 %2832  ;;  %v3137_v10 = vld [vmem:[#allocation3 + $0xa8] sm:$0x7f] }
 0x287   : > { %2747 = vst.msk [vmem:[#allocation2 + $0x228] sm:$0xff] %vm566_vm0, %v2683_v32  ;;  %v3211_v40 = vrot.slane %v3137_v10, 7 }
 0x288   : > { %v4134_v29 = vld [vmem:[#allocation2 + $0x1c0] sm:$0xff]  ;;  %2914 = vst.msk [vmem:[#allocation2 + $0xf0] sm:$0xff] %vm746_vm4, %v2833_v15  ;;  %v2258_v0 = vpop.f32.mrb[46].mxu0 }
 0x289   : > { %3936 = vrot.lane.b32.xlu0 %v7905_v38, %s5650_s26  ;;  %v4137_v30 = vld [vmem:[#allocation2 + $0x1d8] sm:$0xff]  ;;  %3266 = vrot.lane.b32.xlu1 %v3209_v47, %s5650_s26  ;;  %v3739_v18 = vpop.permute.xlu0 %3738  ;;  %v2259_v25 = vadd.f32 %v7546_v45, %v2258_v0  ;;  %v2260_v33 = vpop.f32.mrb[47].mxu0  ;;  %v3212_v4 = vsel %vm487_vm1, %v7865_v34, %v3211_v40 }
 0x28a   : > { %5330 = vmatprep.mubr.f32.mxu0 %v4134_v29  ;;  %v4106_v39 = vld [vmem:[#allocation2 + $0xe0] sm:$0xff]  ;;  %3818 = vst.msk [vmem:[#allocation2 + $0xf8] sm:$0xfe] %vm1654_vm7, %v3739_v18  ;;  %v3013_v21 = vpop.permute.xlu1 %3012  ;;  %v4105_v51 = vld [vmem:[#allocation2 + $0xd8] sm:$0xff] }
 0x28b   : > { %5331 = vmatmul.mubr.f32.gmra.mrb[82].mxu0 %v4137_v30  ;;  %4338 = vmatprep.mubr.f32.mxu1 %v4106_v39  ;;  %3094 = vst.msk [vmem:[#allocation2 + $0xf0] sm:$0xff] %vm927_vm8, %v3013_v21  ;;  %v7918_v22 = vld [vmem:[#allocation3 + $0xb0] sm:$0xff]  ;;  %v2484_v35 = vadd.f32 %v7531_v63, %v2259_v25 }
 0x28c   : > { %4339 = vmatmul.mubr.f32.gmra.mrb[50].mxu1 %v4105_v51  ;;  %v3378_v36 = vld [vmem:[#allocation3 + $0xb0] sm:$0xff]  ;;  %v7924_v45 = vrot.slane %v7918_v22, 7 }
 0x28d   : > { %3524 = vrot.lane.b32.xlu0 %v7884_v61, %s5651_s27  ;;  %2852 = vrot.lane.b32.xlu1 %v7796_v12, %s5651_s27  ;;  %3410 = vst.msk [vmem:[#allocation2 + $0x218] sm:$0xff] %vm566_vm0, %v3378_v36  ;;  %v2684_v1 = vrot.slane %v3378_v36, 7  ;;  %v3919_v44 = vpop.permute.xlu0 %3918  ;;  %v2550_v27 = vmax.f32 %v2484_v35, 0.0 }
 0x28e   : > { %3998 = vst.msk [vmem:[#allocation2 + $0xf8] sm:$0xff] %vm1169_vm9, %v3919_v44  ;;  %v3249_v6 = vpop.permute.xlu1 %3248 }
 0x28f   : > { %2748 = vst.msk [vmem:[#allocation2 + $0x240] sm:$0xfe] %vm564_vm2, %v2684_v1 }
 0x290   : > { %3334 = vst.msk [vmem:[#allocation2 + $0xf0] sm:$0xfe] %vm1167_vm6, %v3249_v6 }
 0x291   : > { %3758 = vrot.lane.b32.xlu0 %v7924_v45, %s5652_s25  ;;  %2582 = vst.msk [vmem:[#allocation3 + $0xb8] sm:$0xff] %vm566_vm0, %v2550_v27  ;;  %3032 = vrot.lane.b32.xlu1 %v7825_v5, %s5652_s25  ;;  %v3507_v63 = vpop.permute.xlu0 %3506 }
 0x292   : > { %3591 = vst.msk [vmem:[#allocation2 + $0x110] sm:$0x7f] %vm1426_vm5, %v3507_v63  ;;  %v2835_v12 = vpop.permute.xlu1 %2834 }
 0x293   : > { %2915 = vst.msk [vmem:[#allocation2 + $0x108] sm:$0xff] %vm746_vm4, %v2835_v12 }
 0x295   : > { %3938 = vrot.lane.b32.xlu0 %v7918_v22, %s5650_s26  ;;  %3268 = vrot.lane.b32.xlu1 %v7865_v34, %s5650_s26  ;;  %v2263_v52 = vpop.f32.mrb[48].mxu0  ;;  %v3741_v2 = vpop.permute.xlu0 %3740  ;;  %v4109_v14 = vld [vmem:[#allocation2 + $0xf8] sm:$0xff] }
 0x296   : > { %v2264_v5 = vadd.f32 %v7944_v62, %v2263_v52  ;;  %3819 = vst.msk [vmem:[#allocation2 + $0x110] sm:$0xff] %vm927_vm8, %v3741_v2  ;;  %v3015_v20 = vpop.permute.xlu1 %3014  ;;  %v2265_v17 = vpop.f32.mrb[49].mxu0  ;;  %4343 = vmatprep.mubr.f32.mxu1 %v4109_v14 }
 0x297   : > { %v4108_v7 = vld [vmem:[#allocation2 + $0xf0] sm:$0xff]  ;;  %3095 = vst.msk [vmem:[#allocation2 + $0x108] sm:$0x7f] %vm929_vm10, %v3015_v20 }
 0x298   : > { %v7948_v13 = vld [vmem:[#allocation3 + $0xb1] sm:$0xff]  ;;  %v4039_v42 = vld [vmem:[#allocation3 + $0xb9] sm:$0x7f]  ;;  %4344 = vmatmul.mubr.f32.gmra.mrb[52].mxu1 %v4108_v7  ;;  %v2489_v59 = vadd.f32 %v7604_v24, %v2264_v5 }
 0x299   : > { %3526 = vrot.lane.b32.xlu0 %v3441_v37, %s5651_s27  ;;  %v3634_v19 = vld [vmem:[#allocation3 + $0xb8] sm:$0x7f]  ;;  %4068 = vst.msk [vmem:[#allocation2 + $0x1f0] sm:$0xff] %vm566_vm0, %v7948_v13  ;;  %2854 = vrot.lane.b32.xlu1 %v7846_v16, %s5651_s27  ;;  %v3921_v50 = vpop.permute.xlu0 %3920 }
 0x29a   : > { %4069 = vst.msk [vmem:[#allocation2 + $0x208] sm:$0x7f] %vm1896_vm3, %v4039_v42  ;;  %v3704_v28 = vrot.slane %v3634_v19, 7  ;;  %v7958_v3 = vld [vmem:[#allocation3 + $0xb8] sm:$0xff]  ;;  %v2551_v26 = vmax.f32 %v2489_v59, 0.0  ;;  %v3251_v23 = vpop.permute.xlu1 %3250 }
 0x29b   : > { %3411 = vst.msk [vmem:[#allocation2 + $0x230] sm:$0xff] %vm566_vm0, %v7958_v3  ;;  %v2614_v54 = vld [vmem:[#allocation3 + $0xb8] sm:$0x7f] }
 0x29c   : > { %3999 = vst.msk [vmem:[#allocation2 + $0x110] sm:$0xff] %vm1169_vm9, %v3921_v50  ;;  %v3705_v55 = vsel %vm487_vm1, %v7924_v45, %v3704_v28  ;;  %v2685_v24 = vrot.slane %v2614_v54, 7  ;;  %3335 = vst.msk [vmem:[#allocation2 + $0x108] sm:$0xff] %vm1169_vm9, %v3251_v23  ;;  %v2955_v16 = vld [vmem:[#allocation3 + $0x99] sm:$0x7f] }
 0x29d   : > { %3760 = vrot.lane.b32.xlu0 %v3705_v55, %s5652_s25  ;;  %2583 = vst.msk [vmem:[#allocation3 + $0xc0] sm:$0xff] %vm566_vm0, %v2551_v26  ;;  %3034 = vrot.lane.b32.xlu1 %v2955_v16, %s5652_s25  ;;  %v3509_v48 = vpop.permute.xlu0 %3508  ;;  %v3443_v63 = vld [vmem:[#allocation3 + $0xb9] sm:$0x7f] }
 0x29e   : > { %v2686_v60 = vsel %vm487_vm1, %v2684_v1, %v2685_v24  ;;  %3592 = vst.msk [vmem:[#allocation2 + $0x128] sm:$0xff] %vm746_vm4, %v3509_v48  ;;  %v2837_v41 = vpop.permute.xlu1 %2836  ;;  %v3139_v37 = vld [vmem:[#allocation3 + $0xb8] sm:$0x7f] }
 0x29f   : > { %2749 = vst.msk [vmem:[#allocation2 + $0x258] sm:$0xff] %vm566_vm0, %v2686_v60  ;;  %v3214_v10 = vrot.slane %v3139_v37, 7 }
 0x2a0   : > { %v4140_v11 = vld [vmem:[#allocation2 + $0x1f0] sm:$0xff]  ;;  %2916 = vst.msk [vmem:[#allocation2 + $0x120] sm:$0xff] %vm746_vm4, %v2837_v41  ;;  %v2268_v32 = vpop.f32.mrb[50].mxu0 }
 0x2a1   : > { %3940 = vrot.lane.b32.xlu0 %v7958_v3, %s5650_s26  ;;  %v4143_v58 = vld [vmem:[#allocation2 + $0x208] sm:$0xff]  ;;  %3270 = vrot.lane.b32.xlu1 %v3212_v4, %s5650_s26  ;;  %v3743_v8 = vpop.permute.xlu0 %3742  ;;  %v2269_v47 = vadd.f32 %v7944_v62, %v2268_v32  ;;  %v2270_v30 = vpop.f32.mrb[51].mxu0  ;;  %v3215_v23 = vsel %vm487_vm1, %v7924_v45, %v3214_v10 }
 0x2a2   : > { %5333 = vmatprep.mubr.f32.mxu0 %v4140_v11  ;;  %3820 = vst.msk [vmem:[#allocation2 + $0x128] sm:$0xfe] %vm1654_vm7, %v3743_v8  ;;  %v3017_v29 = vpop.permute.xlu1 %3016 }
 0x2a3   : > { %5334 = vmatmul.mubr.f32.gmra.mrb[84].mxu0 %v4143_v58  ;;  %v4112_v15 = vld [vmem:[#allocation2 + $0x110] sm:$0xff]  ;;  %v4111_v0 = vld [vmem:[#allocation2 + $0x108] sm:$0xff]  ;;  %3096 = vst.msk [vmem:[#allocation2 + $0x120] sm:$0xff] %vm927_vm8, %v3017_v29  ;;  %v2494_v39 = vadd.f32 %v7602_v57, %v2269_v47 }
 0x2a4   : > { %4348 = vmatprep.mubr.f32.mxu1 %v4112_v15  ;;  %v7983_v34 = vld [vmem:[#allocation3 + $0xc0] sm:$0xff] }
 0x2a5   : > { %3528 = vrot.lane.b32.xlu0 %v7948_v13, %s5651_s27  ;;  %4349 = vmatmul.mubr.f32.gmra.mrb[54].mxu1 %v4111_v0  ;;  %v2615_v18 = vld [vmem:[#allocation3 + $0xc0] sm:$0xff]  ;;  %v7989_v25 = vrot.slane %v7983_v34, 7  ;;  %3412 = vst.msk [vmem:[#allocation2 + $0x248] sm:$0xff] %vm566_vm0, %v7983_v34  ;;  %v3923_v33 = vpop.permute.xlu0 %3922  ;;  %v2552_v51 = vmax.f32 %v2494_v39, 0.0 }
 0x2a6   : > { %2856 = vrot.lane.b32.xlu1 %v7859_v43, %s5651_s27  ;;  %v2687_v21 = vrot.slane %v2615_v18, 7  ;;  %4000 = vst.msk [vmem:[#allocation2 + $0x128] sm:$0xff] %vm1169_vm9, %v3923_v33  ;;  %v3253_v36 = vpop.permute.xlu1 %3252 }
 0x2a7   : > { %3336 = vst.msk [vmem:[#allocation2 + $0x120] sm:$0xfe] %vm1167_vm6, %v3253_v36 }
 0x2a8   : > { %2750 = vst.msk [vmem:[#allocation2 + $0x270] sm:$0xfe] %vm564_vm2, %v2687_v21 }
 0x2a9   : > { %3762 = vrot.lane.b32.xlu0 %v7989_v25, %s5652_s25  ;;  %2584 = vst.msk [vmem:[#allocation3 + $0xc8] sm:$0xff] %vm566_vm0, %v2552_v51  ;;  %v3511_v57 = vpop.permute.xlu0 %3510 }
 0x2aa   : > { %3036 = vrot.lane.b32.xlu1 %v7884_v61, %s5652_s25  ;;  %3593 = vst.msk [vmem:[#allocation2 + $0x140] sm:$0x7f] %vm1426_vm5, %v3511_v57  ;;  %v2839_v43 = vpop.permute.xlu1 %2838 }
 0x2ab   : > { %2917 = vst.msk [vmem:[#allocation2 + $0x138] sm:$0xff] %vm746_vm4, %v2839_v43 }
 0x2ad   : > { %3942 = vrot.lane.b32.xlu0 %v7983_v34, %s5650_s26  ;;  %v2273_v35 = vpop.f32.mrb[52].mxu0  ;;  %v4115_v44 = vld [vmem:[#allocation2 + $0x128] sm:$0xff] }
 0x2ae   : > { %3272 = vrot.lane.b32.xlu1 %v7924_v45, %s5650_s26  ;;  %v3745_v1 = vpop.permute.xlu0 %3744  ;;  %v2274_v27 = vadd.f32 %v7944_v62, %v2273_v35  ;;  %v3019_v61 = vpop.permute.xlu1 %3018  ;;  %4353 = vmatprep.mubr.f32.mxu1 %v4115_v44  ;;  %v4114_v12 = vld [vmem:[#allocation2 + $0x120] sm:$0xff] }
 0x2af   : > { %3821 = vst.msk [vmem:[#allocation2 + $0x140] sm:$0xff] %vm927_vm8, %v3745_v1  ;;  %v2275_v6 = vpop.f32.mrb[53].mxu0  ;;  %4354 = vmatmul.mubr.f32.gmra.mrb[56].mxu1 %v4114_v12 }
 0x2b0   : > { %v8009_v52 = vld [vmem:[#allocation3 + $0xc1] sm:$0xff]  ;;  %v4041_v2 = vld [vmem:[#allocation3 + $0xc9] sm:$0x7f]  ;;  %3097 = vst.msk [vmem:[#allocation2 + $0x138] sm:$0x7f] %vm929_vm10, %v3019_v61  ;;  %v2499_v5 = vadd.f32 %v7683_v53, %v2274_v27 }
 0x2b1   : > { %3530 = vrot.lane.b32.xlu0 %v3443_v63, %s5651_s27  ;;  %v3636_v14 = vld [vmem:[#allocation3 + $0xc8] sm:$0x7f]  ;;  %4070 = vst.msk [vmem:[#allocation2 + $0x220] sm:$0xff] %vm566_vm0, %v8009_v52 }
 0x2b2   : > { %4071 = vst.msk [vmem:[#allocation2 + $0x238] sm:$0x7f] %vm1896_vm3, %v4041_v2  ;;  %2858 = vrot.lane.b32.xlu1 %v7905_v38, %s5651_s27  ;;  %v3707_v20 = vrot.slane %v3636_v14, 7  ;;  %v8019_v17 = vld [vmem:[#allocation3 + $0xc8] sm:$0xff]  ;;  %v3925_v7 = vpop.permute.xlu0 %3924  ;;  %v2553_v19 = vmax.f32 %v2499_v5, 0.0  ;;  %v3255_v59 = vpop.permute.xlu1 %3254 }
 0x2b3   : > { %3413 = vst.msk [vmem:[#allocation2 + $0x260] sm:$0xff] %vm566_vm0, %v8019_v17  ;;  %v2616_v42 = vld [vmem:[#allocation3 + $0xc8] sm:$0x7f] }
 0x2b4   : > { %4001 = vst.msk [vmem:[#allocation2 + $0x140] sm:$0xff] %vm1169_vm9, %v3925_v7  ;;  %v3708_v28 = vsel %vm487_vm1, %v7989_v25, %v3707_v20  ;;  %v2688_v53 = vrot.slane %v2616_v42, 7  ;;  %3337 = vst.msk [vmem:[#allocation2 + $0x138] sm:$0xff] %vm1169_vm9, %v3255_v59  ;;  %v2957_v38 = vld [vmem:[#allocation3 + $0xa9] sm:$0x7f] }
 0x2b5   : > { %3764 = vrot.lane.b32.xlu0 %v3708_v28, %s5652_s25  ;;  %2585 = vst.msk [vmem:[#allocation3 + $0xd0] sm:$0xff] %vm566_vm0, %v2553_v19  ;;  %v3445_v51 = vld [vmem:[#allocation3 + $0xc9] sm:$0x7f] }
 0x2b6   : > { %3038 = vrot.lane.b32.xlu1 %v2957_v38, %s5652_s25  ;;  %v2689_v50 = vsel %vm487_vm1, %v2687_v21, %v2688_v53  ;;  %v3513_v54 = vpop.permute.xlu0 %3512  ;;  %v2841_v26 = vpop.permute.xlu1 %2840  ;;  %v3141_v61 = vld [vmem:[#allocation3 + $0xc8] sm:$0x7f] }
 0x2b7   : > { %2751 = vst.msk [vmem:[#allocation2 + $0x288] sm:$0xff] %vm566_vm0, %v2689_v50  ;;  %v3217_v5 = vrot.slane %v3141_v61, 7 }
 0x2b8   : > { %3594 = vst.msk [vmem:[#allocation2 + $0x158] sm:$0xff] %vm746_vm4, %v3513_v54  ;;  %v4146_v55 = vld [vmem:[#allocation2 + $0x220] sm:$0xff]  ;;  %2918 = vst.msk [vmem:[#allocation2 + $0x150] sm:$0xff] %vm746_vm4, %v2841_v26  ;;  %v2278_v16 = vpop.f32.mrb[54].mxu0 }
 0x2b9   : > { %3944 = vrot.lane.b32.xlu0 %v8019_v17, %s5650_s26  ;;  %v4149_v24 = vld [vmem:[#allocation2 + $0x238] sm:$0xff]  ;;  %5336 = vmatprep.mubr.f32.mxu0 %v4146_v55  ;;  %v2279_v48 = vadd.f32 %v7944_v62, %v2278_v16  ;;  %v2280_v4 = vpop.f32.mrb[55].mxu0  ;;  %v3218_v42 = vsel %vm487_vm1, %v7989_v25, %v3217_v5 }
 0x2ba   : > { %3274 = vrot.lane.b32.xlu1 %v3215_v23, %s5650_s26  ;;  %5337 = vmatmul.mubr.f32.gmra.mrb[86].mxu0 %v4149_v24  ;;  %v3747_v40 = vpop.permute.xlu0 %3746  ;;  %v3021_v41 = vpop.permute.xlu1 %3020 }
 0x2bb   : > { %v4118_v60 = vld [vmem:[#allocation2 + $0x140] sm:$0xff]  ;;  %3822 = vst.msk [vmem:[#allocation2 + $0x158] sm:$0xfe] %vm1654_vm7, %v3747_v40  ;;  %v4117_v11 = vld [vmem:[#allocation2 + $0x138] sm:$0xff]  ;;  %v2504_v32 = vadd.f32 %v7680_v9, %v2279_v48 }
 0x2bc   : > { %4358 = vmatprep.mubr.f32.mxu1 %v4118_v60  ;;  %3098 = vst.msk [vmem:[#allocation2 + $0x150] sm:$0xff] %vm927_vm8, %v3021_v41  ;;  %v8044_v45 = vld [vmem:[#allocation3 + $0xd0] sm:$0xff] }
 0x2bd   : > { %3532 = vrot.lane.b32.xlu0 %v8009_v52, %s5651_s27  ;;  %4359 = vmatmul.mubr.f32.gmra.mrb[58].mxu1 %v4117_v11  ;;  %v2617_v58 = vld [vmem:[#allocation3 + $0xd0] sm:$0xff]  ;;  %v8050_v8 = vrot.slane %v8044_v45, 7  ;;  %3414 = vst.msk [vmem:[#allocation2 + $0x278] sm:$0xff] %vm566_vm0, %v8044_v45  ;;  %v2554_v29 = vmax.f32 %v2504_v32, 0.0 }
 0x2be   : > { %2860 = vrot.lane.b32.xlu1 %v7918_v22, %s5651_s27  ;;  %v2690_v15 = vrot.slane %v2617_v58, 7  ;;  %v3927_v47 = vpop.permute.xlu0 %3926  ;;  %v3257_v30 = vpop.permute.xlu1 %3256 }
 0x2bf   : > { %4002 = vst.msk [vmem:[#allocation2 + $0x158] sm:$0xff] %vm1169_vm9, %v3927_v47 }
 0x2c0   : > { %2752 = vst.msk [vmem:[#allocation2 + $0x2a0] sm:$0xfe] %vm564_vm2, %v2690_v15 }
 0x2c1   : > { %3338 = vst.msk [vmem:[#allocation2 + $0x150] sm:$0xfe] %vm1167_vm6, %v3257_v30  ;;  %3766 = vrot.lane.b32.xlu0 %v8050_v8, %s5652_s25 }
 0x2c2   : > { %2586 = vst.msk [vmem:[#allocation3 + $0xd8] sm:$0xff] %vm566_vm0, %v2554_v29  ;;  %3040 = vrot.lane.b32.xlu1 %v7948_v13, %s5652_s25  ;;  %v3515_v9 = vpop.permute.xlu0 %3514 }
 0x2c3   : > { %3595 = vst.msk [vmem:[#allocation2 + $0x170] sm:$0x7f] %vm1426_vm5, %v3515_v9  ;;  %v2843_v22 = vpop.permute.xlu1 %2842 }
 0x2c4   : > { %2919 = vst.msk [vmem:[#allocation2 + $0x168] sm:$0xff] %vm746_vm4, %v2843_v22 }
 0x2c5   : > { %3946 = vrot.lane.b32.xlu0 %v8044_v45, %s5650_s26  ;;  %v2283_v0 = vpop.f32.mrb[56].mxu0 }
 0x2c6   : > { %3276 = vrot.lane.b32.xlu1 %v7989_v25, %s5650_s26  ;;  %v4121_v39 = vld [vmem:[#allocation2 + $0x158] sm:$0xff]  ;;  %v2284_v21 = vadd.f32 %v7944_v62, %v2283_v0  ;;  %v2285_v33 = vpop.f32.mrb[57].mxu0 }
 0x2c7   : > { %v3749_v18 = vpop.permute.xlu0 %3748  ;;  %v3023_v13 = vpop.permute.xlu1 %3022  ;;  %4363 = vmatprep.mubr.f32.mxu1 %v4121_v39 }
 0x2c8   : > { %3823 = vst.msk [vmem:[#allocation2 + $0x170] sm:$0xff] %vm927_vm8, %v3749_v18  ;;  %v4120_v36 = vld [vmem:[#allocation2 + $0x150] sm:$0xff]  ;;  %v2509_v1 = vadd.f32 %v7753_v46, %v2284_v21 }
 0x2c9   : > { %v8070_v57 = vld [vmem:[#allocation3 + $0xd1] sm:$0xff]  ;;  %v4043_v43 = vld [vmem:[#allocation3 + $0xd9] sm:$0x7f]  ;;  %3099 = vst.msk [vmem:[#allocation2 + $0x168] sm:$0x7f] %vm929_vm10, %v3023_v13  ;;  %3534 = vrot.lane.b32.xlu0 %v3445_v51, %s5651_s27  ;;  %4364 = vmatmul.mubr.f32.gmra.mrb[60].mxu1 %v4120_v36 }
 0x2ca   : > { %v3638_v35 = vld [vmem:[#allocation3 + $0xd8] sm:$0x7f]  ;;  %4072 = vst.msk [vmem:[#allocation2 + $0x250] sm:$0xff] %vm566_vm0, %v8070_v57  ;;  %2862 = vrot.lane.b32.xlu1 %v7958_v3, %s5651_s27  ;;  %v2555_v12 = vmax.f32 %v2509_v1, 0.0  ;;  %v2961_v51 = vld [vmem:[#allocation3 + $0xc9] sm:$0x7f] }
 0x2cb   : > { %4073 = vst.msk [vmem:[#allocation2 + $0x268] sm:$0x7f] %vm1896_vm3, %v4043_v43  ;;  %v3710_v44 = vrot.slane %v3638_v35, 7  ;;  %v8080_v27 = vld [vmem:[#allocation3 + $0xd8] sm:$0xff]  ;;  %v3929_v6 = vpop.permute.xlu0 %3928  ;;  %v3259_v2 = vpop.permute.xlu1 %3258 }
 0x2cc   : > { %3415 = vst.msk [vmem:[#allocation2 + $0x290] sm:$0xff] %vm566_vm0, %v8080_v27  ;;  %v2618_v63 = vld [vmem:[#allocation3 + $0xd8] sm:$0x7f]  ;;  %2587 = vst.msk [vmem:[#allocation3 + $0xe0] sm:$0xff] %vm566_vm0, %v2555_v12 }
 0x2cd   : > { %4003 = vst.msk [vmem:[#allocation2 + $0x170] sm:$0xff] %vm1169_vm9, %v3929_v6  ;;  %v3711_v14 = vsel %vm487_vm1, %v8050_v8, %v3710_v44  ;;  %v2691_v46 = vrot.slane %v2618_v63, 7  ;;  %3339 = vst.msk [vmem:[#allocation2 + $0x168] sm:$0xff] %vm1169_vm9, %v3259_v2  ;;  %v2959_v3 = vld [vmem:[#allocation3 + $0xb9] sm:$0x7f] }
 0x2ce   : > { %3768 = vrot.lane.b32.xlu0 %v3711_v14, %s5652_s25  ;;  %3042 = vrot.lane.b32.xlu1 %v2959_v3, %s5652_s25  ;;  %v3447_v58 = vld [vmem:[#allocation3 + $0xd9] sm:$0x7f] }
 0x2cf   : > { %v2692_v20 = vsel %vm487_vm1, %v2690_v15, %v2691_v46  ;;  %v3517_v37 = vpop.permute.xlu0 %3516  ;;  %v2845_v7 = vpop.permute.xlu1 %2844  ;;  %v3143_v9 = vld [vmem:[#allocation3 + $0xd8] sm:$0x7f] }
 0x2d0   : > { %2753 = vst.msk [vmem:[#allocation2 + $0x2b8] sm:$0xff] %vm566_vm0, %v2692_v20  ;;  %v2288_v19 = vpop.f32.mrb[58].mxu0  ;;  %v3220_v36 = vrot.slane %v3143_v9, 7 }
 0x2d1   : > { %3596 = vst.msk [vmem:[#allocation2 + $0x188] sm:$0xff] %vm746_vm4, %v3517_v37  ;;  %2920 = vst.msk [vmem:[#allocation2 + $0x180] sm:$0xff] %vm746_vm4, %v2845_v7  ;;  %v2289_v53 = vadd.f32 %v7944_v62, %v2288_v19  ;;  %v2290_v10 = vpop.f32.mrb[59].mxu0  ;;  %v8189_v19 = vld [vmem:[%s8789_s4] ss:$0 sm:$0xff] }
 0x2d2   : > { %3948 = vrot.lane.b32.xlu0 %v8080_v27, %s5650_s26  ;;  %3278 = vrot.lane.b32.xlu1 %v3218_v42, %s5650_s26 }
 0x2d3   : > { %v3751_v59 = vpop.permute.xlu0 %3750  ;;  %v3025_v38 = vpop.permute.xlu1 %3024  ;;  %v8105_v25 = vld [vmem:[#allocation3 + $0xe0] sm:$0xff]  ;;  %v2514_v54 = vadd.f32 %v7750_v31, %v2289_v53 }
 0x2d4   : > { %v4124_v28 = vld [vmem:[#allocation2 + $0x170] sm:$0xff]  ;;  %3824 = vst.msk [vmem:[#allocation2 + $0x188] sm:$0xfe] %vm1654_vm7, %v3751_v59  ;;  %v4123_v50 = vld [vmem:[#allocation2 + $0x168] sm:$0xff]  ;;  %v8111_v26 = vrot.slane %v8105_v25, 7 }
 0x2d5   : > { %4368 = vmatprep.mubr.f32.mxu1 %v4124_v28  ;;  %3100 = vst.msk [vmem:[#allocation2 + $0x180] sm:$0xff] %vm927_vm8, %v3025_v38  ;;  %v2556_v55 = vmax.f32 %v2514_v54, 0.0 }
 0x2d6   : > { %3536 = vrot.lane.b32.xlu0 %v8070_v57, %s5651_s27  ;;  %4369 = vmatmul.mubr.f32.gmra.mrb[62].mxu1 %v4123_v50  ;;  %3416 = vst.msk [vmem:[#allocation2 + $0x2a8] sm:$0xff] %vm566_vm0, %v8105_v25 }
 0x2d7   : > { %2864 = vrot.lane.b32.xlu1 %v7983_v34, %s5651_s27  ;;  %v3931_v23 = vpop.permute.xlu0 %3930  ;;  %v3261_v24 = vpop.permute.xlu1 %3260  ;;  %2754 = vst.msk [vmem:[#allocation2 + $0x2d0] sm:$0xfe] %vm564_vm2, %v8111_v26 }
 0x2d8   : > { %4004 = vst.msk [vmem:[#allocation2 + $0x188] sm:$0xff] %vm1169_vm9, %v3931_v23  ;;  %v2293_v31 = vpop.f32.mrb[60].mxu0 }
 0x2d9   : > { %3340 = vst.msk [vmem:[#allocation2 + $0x180] sm:$0xfe] %vm1167_vm6, %v3261_v24  ;;  %v2294_v16 = vadd.f32 %v7944_v62, %v2293_v31  ;;  %v2295_v60 = vpop.f32.mrb[61].mxu0 }
 0x2da   : > { %3770 = vrot.lane.b32.xlu0 %v8111_v26, %s5652_s25  ;;  %2588 = vst.msk [vmem:[#allocation3 + $0xe8] sm:$0xff] %vm566_vm0, %v2556_v55 }
 0x2db   : > { %3044 = vrot.lane.b32.xlu1 %v8009_v52, %s5652_s25  ;;  %v3519_v34 = vpop.permute.xlu0 %3518  ;;  %v2847_v40 = vpop.permute.xlu1 %2846  ;;  %v2519_v48 = vadd.f32 %v7812_v56, %v2294_v16 }
 0x2dc   : > { %3597 = vst.msk [vmem:[#allocation2 + $0x1a0] sm:$0x7f] %vm1426_vm5, %v3519_v34 }
 0x2dd   : > { %2921 = vst.msk [vmem:[#allocation2 + $0x198] sm:$0xff] %vm746_vm4, %v2847_v40  ;;  %v2557_v4 = vmax.f32 %v2519_v48, 0.0 }
 0x2de   : > { %3950 = vrot.lane.b32.xlu0 %v8105_v25, %s5650_s26 }
 0x2df   : > { %3280 = vrot.lane.b32.xlu1 %v8050_v8, %s5650_s26  ;;  %v3753_v41 = vpop.permute.xlu0 %3752  ;;  %v4127_v52 = vld [vmem:[#allocation2 + $0x188] sm:$0xff]  ;;  %v3027_v11 = vpop.permute.xlu1 %3026  ;;  %2589 = vst.msk [vmem:[#allocation3 + $0xf0] sm:$0xff] %vm566_vm0, %v2557_v4 }
 0x2e0   : > { %3825 = vst.msk [vmem:[#allocation2 + $0x1a0] sm:$0xff] %vm927_vm8, %v3753_v41  ;;  %4373 = vmatprep.mubr.f32.mxu1 %v4127_v52  ;;  %v4126_v32 = vld [vmem:[#allocation2 + $0x180] sm:$0xff]  ;;  %v2298_v22 = vpop.f32.mrb[62].mxu0 }
 0x2e1   : > { %v8133_v15 = vld [vmem:[#allocation3 + $0xe1] sm:$0xff]  ;;  %v4045_v47 = vld [vmem:[#allocation3 + $0xe9] sm:$0x7f]  ;;  %3101 = vst.msk [vmem:[#allocation2 + $0x198] sm:$0x7f] %vm929_vm10, %v3027_v11  ;;  %4374 = vmatmul.mubr.f32.gmra.mrb[64].mxu1 %v4126_v32  ;;  %v2299_v39 = vadd.f32 %v7944_v62, %v2298_v22  ;;  %v2300_v33 = vpop.f32.mrb[63].mxu0 }
 0x2e2   : > { %3538 = vrot.lane.b32.xlu0 %v3447_v58, %s5651_s27  ;;  %v3640_v29 = vld [vmem:[#allocation3 + $0xe8] sm:$0x7f]  ;;  %4074 = vst.msk [vmem:[#allocation2 + $0x280] sm:$0xff] %vm566_vm0, %v8133_v15 }
 0x2e3   : > { %4075 = vst.msk [vmem:[#allocation2 + $0x298] sm:$0x7f] %vm1896_vm3, %v4045_v47  ;;  %2866 = vrot.lane.b32.xlu1 %v8019_v17, %s5651_s27  ;;  %v3713_v56 = vrot.slane %v3640_v29, 7  ;;  %v8143_v30 = vld [vmem:[#allocation3 + $0xe8] sm:$0xff]  ;;  %v3933_v0 = vpop.permute.xlu0 %3932  ;;  %v3263_v21 = vpop.permute.xlu1 %3262  ;;  %v2524_v43 = vadd.f32 %v7806_v49, %v2299_v39  ;;  %v3221_v49 = vsel %vm487_vm1, %v8050_v8, %v3220_v36  ;;  %v2963_v47 = vld [vmem:[#allocation3 + $0xd9] sm:$0x7f] }
 0x2e4   : > { %3417 = vst.msk [vmem:[#allocation2 + $0x2c0] sm:$0xff] %vm566_vm0, %v8143_v30  ;;  %v2620_v18 = vld [vmem:[#allocation3 + $0xe8] sm:$0x7f]  ;;  %v8157_v35 = vpop.f32.mrb[64].mxu0 }
 0x2e5   : > { %4005 = vst.msk [vmem:[#allocation2 + $0x1a0] sm:$0xff] %vm1169_vm9, %v3933_v0  ;;  %v3714_v13 = vsel %vm487_vm1, %v8111_v26, %v3713_v56  ;;  %v2694_v17 = vrot.slane %v2620_v18, 7  ;;  %3341 = vst.msk [vmem:[#allocation2 + $0x198] sm:$0xff] %vm1169_vm9, %v3263_v21  ;;  %v2558_v44 = vmax.f32 %v2524_v43, 0.0  ;;  %v4520_v6 = vpop.f32.mrb[65].mxu0 }
 0x2e6   : > { %3772 = vrot.lane.b32.xlu0 %v3714_v13, %s5652_s25  ;;  %v3641_v63 = vld [vmem:[#allocation3 + $0xf0] sm:$0xff]  ;;  %v3449_v60 = vld [vmem:[#allocation3 + $0xe9] sm:$0x7f] }
 0x2e7   : > { %3046 = vrot.lane.b32.xlu1 %v2961_v51, %s5652_s25  ;;  %v2695_v62 = vsel %vm487_vm1, %v8111_v26, %v2694_v17  ;;  %v3521_v1 = vpop.permute.xlu0 %3520  ;;  %v2849_v61 = vpop.permute.xlu1 %2848  ;;  %2590 = vst.msk [vmem:[#allocation3 + $0xf8] sm:$0xff] %vm566_vm0, %v2558_v44  ;;  %3418 = vst.msk [vmem:[#allocation2 + $0x2d8] sm:$0xff] %vm566_vm0, %v3641_v63  ;;  %v8181_v37 = vrot.slane %v3641_v63, 7  ;;  %v3145_v4 = vld [vmem:[#allocation3 + $0xe8] sm:$0x7f] }
 0x2e8   : > { %2755 = vst.msk [vmem:[#allocation2 + $0x2e8] sm:$0xff] %vm566_vm0, %v2695_v62  ;;  %v8169_v12 = vpop.f32.mrb[66].mxu0  ;;  %v3223_v29 = vrot.slane %v3145_v4, 7 }
 0x2e9   : > { %3598 = vst.msk [vmem:[#allocation2 + $0x1b8] sm:$0xff] %vm746_vm4, %v3521_v1  ;;  %2922 = vst.msk [vmem:[#allocation2 + $0x1b0] sm:$0xff] %vm746_vm4, %v2849_v61  ;;  %v8172_v3 = vpop.f32.mrb[67].mxu0 }
 0x2ea   : > { %3952 = vrot.lane.b32.xlu0 %v8143_v30, %s5650_s26  ;;  %v3224_v39 = vsel %vm487_vm1, %v8111_v26, %v3223_v29 }
 0x2eb   : > { %3282 = vrot.lane.b32.xlu1 %v3221_v49, %s5650_s26  ;;  %v3755_v2 = vpop.permute.xlu0 %3754  ;;  %v3029_v46 = vpop.permute.xlu1 %3028 }
 0x2ec   : > { %v4130_v14 = vld [vmem:[#allocation2 + $0x1a0] sm:$0xff]  ;;  %3826 = vst.msk [vmem:[#allocation2 + $0x1b8] sm:$0xfe] %vm1654_vm7, %v3755_v2  ;;  %v4129_v8 = vld [vmem:[#allocation2 + $0x198] sm:$0xff]  ;;  %v8179_v5 = vpop.f32.mrb[68].mxu0 }
 0x2ed   : > { %4378 = vmatprep.mubr.f32.mxu1 %v4130_v14  ;;  %3102 = vst.msk [vmem:[#allocation2 + $0x1b0] sm:$0xff] %vm927_vm8, %v3029_v46  ;;  %v8184_v42 = vpop.f32.mrb[69].mxu0 }
 0x2ee   : > { %3540 = vrot.lane.b32.xlu0 %v8133_v15, %s5651_s27  ;;  %4379 = vmatmul.mubr.f32.gmra.mrb[66].mxu1 %v4129_v8  ;;  %v8191_v59 = vld [vmem:[#allocation3 + $0xf1] sm:$0xff]  ;;  %v4047_v28 = vld [vmem:[#allocation3 + $0xf9] sm:$0x7f] }
 0x2ef   : > { %2868 = vrot.lane.b32.xlu1 %v8044_v45, %s5651_s27  ;;  %v3935_v20 = vpop.permute.xlu0 %3934  ;;  %v3265_v7 = vpop.permute.xlu1 %3264  ;;  %4076 = vst.msk [vmem:[#allocation2 + $0x2b0] sm:$0xff] %vm566_vm0, %v8191_v59  ;;  %v3867_v53 = vld [vmem:[#allocation3 + $0xf8] sm:$0xff] }
 0x2f0   : > { %4006 = vst.msk [vmem:[#allocation2 + $0x1b8] sm:$0xff] %vm1169_vm9, %v3935_v20  ;;  %v4295_v45 = vpop.f32.mrb[32].mxu1  ;;  %v8202_v50 = vpop.f32.mrb[70].mxu0 }
 0x2f1   : > { %3342 = vst.msk [vmem:[#allocation2 + $0x1b0] sm:$0xfe] %vm1167_vm6, %v3265_v7  ;;  %v4296_v38 = vadd.f32 %v8189_v19, %v4295_v45  ;;  %v4297_v10 = vpop.f32.mrb[33].mxu1  ;;  %v8209_v24 = vpop.f32.mrb[71].mxu0 }
 0x2f2   : > { %3774 = vrot.lane.b32.xlu0 %v8181_v37, %s5652_s25  ;;  %4077 = vst.msk [vmem:[#allocation2 + $0x2c8] sm:$0x7f] %vm1896_vm3, %v4047_v28 }
 0x2f3   : > { %3048 = vrot.lane.b32.xlu1 %v8070_v57, %s5652_s25  ;;  %3419 = vst.msk [vmem:[#allocation2 + $0x2f0] sm:$0xff] %vm566_vm0, %v3867_v53  ;;  %v3523_v54 = vpop.permute.xlu0 %3522  ;;  %v2851_v23 = vpop.permute.xlu1 %2850  ;;  %v8205_v55 = vadd.f32 %v4520_v6, %v4296_v38  ;;  %v3642_v57 = vld [vmem:[#allocation3 + $0xf8] sm:$0x7f] }
 0x2f4   : > { %3599 = vst.msk [vmem:[#allocation2 + $0x1d0] sm:$0x7f] %vm1426_vm5, %v3523_v54  ;;  %v8214_v31 = vpop.f32.mrb[72].mxu0  ;;  %v3716_v41 = vrot.slane %v3642_v57, 7 }
 0x2f5   : > { %2923 = vst.msk [vmem:[#allocation2 + $0x1c8] sm:$0xff] %vm746_vm4, %v2851_v23  ;;  %v8218_v52 = vpop.f32.mrb[73].mxu0 }
 0x2f6   : > { %3954 = vrot.lane.b32.xlu0 %v3641_v63, %s5650_s26  ;;  %v3717_v32 = vsel %vm487_vm1, %v8181_v37, %v3716_v41  ;;  %v3451_v63 = vld [vmem:[#allocation3 + $0xf9] sm:$0x7f] }
 0x2f7   : > { %3284 = vrot.lane.b32.xlu1 %v8111_v26, %s5650_s26  ;;  %v4133_v34 = vld [vmem:[#allocation2 + $0x1b8] sm:$0xff]  ;;  %v3757_v16 = vpop.permute.xlu0 %3756  ;;  %v3031_v40 = vpop.permute.xlu1 %3030 }
 0x2f8   : > { %4383 = vmatprep.mubr.f32.mxu1 %v4133_v34  ;;  %v4132_v48 = vld [vmem:[#allocation2 + $0x1b0] sm:$0xff]  ;;  %3827 = vst.msk [vmem:[#allocation2 + $0x1d0] sm:$0xff] %vm927_vm8, %v3757_v16 }
 0x2f9   : > { %3103 = vst.msk [vmem:[#allocation2 + $0x1c8] sm:$0x7f] %vm929_vm10, %v3031_v40  ;;  %4384 = vmatmul.mubr.f32.gmra.mrb[68].mxu1 %v4132_v48 }
 0x2fa   : > { %3542 = vrot.lane.b32.xlu0 %v3449_v60, %s5651_s27 }
 0x2fb   : > { %2870 = vrot.lane.b32.xlu1 %v8080_v27, %s5651_s27  ;;  %v3937_v11 = vpop.permute.xlu0 %3936  ;;  %v3267_v58 = vpop.permute.xlu1 %3266 }
 0x2fc   : > { %4007 = vst.msk [vmem:[#allocation2 + $0x1d0] sm:$0xff] %vm1169_vm9, %v3937_v11  ;;  %3343 = vst.msk [vmem:[#allocation2 + $0x1c8] sm:$0xff] %vm1169_vm9, %v3267_v58  ;;  %v8229_v56 = vpop.f32.mrb[74].mxu0 }
 0x2fd   : > { %v8231_v27 = vpop.f32.mrb[75].mxu0 }
 0x2fe   : > { %3776 = vrot.lane.b32.xlu0 %v3717_v32, %s5652_s25 }
 0x2ff   : > { %3050 = vrot.lane.b32.xlu1 %v2963_v47, %s5652_s25  ;;  %v4300_v9 = vpop.f32.mrb[34].mxu1  ;;  %v3525_v0 = vpop.permute.xlu0 %3524 }
 0x300   : > { %v4301_v22 = vadd.f32 %v8189_v19, %v4300_v9  ;;  %v2853_v18 = vpop.permute.xlu1 %2852  ;;  %3600 = vst.msk [vmem:[#allocation2 + $0x1e8] sm:$0xff] %vm746_vm4, %v3525_v0  ;;  %v4302_v21 = vpop.f32.mrb[35].mxu1 }
 0x301   : > { %2924 = vst.msk [vmem:[#allocation2 + $0x1e0] sm:$0xff] %vm746_vm4, %v2853_v18 }
 0x302   : > { %3956 = vrot.lane.b32.xlu0 %v3867_v53, %s5650_s26  ;;  %v8241_v13 = vadd.f32 %v8157_v35, %v4301_v22 }
 0x303   : > { %3286 = vrot.lane.b32.xlu1 %v3224_v39, %s5650_s26  ;;  %v4136_v33 = vld [vmem:[#allocation2 + $0x1d0] sm:$0xff]  ;;  %v4135_v17 = vld [vmem:[#allocation2 + $0x1c8] sm:$0xff]  ;;  %v3759_v51 = vpop.permute.xlu0 %3758 }
 0x304   : > { %v3033_v36 = vpop.permute.xlu1 %3032  ;;  %4388 = vmatprep.mubr.f32.mxu1 %v4136_v33  ;;  %3828 = vst.msk [vmem:[#allocation2 + $0x1e8] sm:$0xfe] %vm1654_vm7, %v3759_v51 }
 0x305   : > { %3104 = vst.msk [vmem:[#allocation2 + $0x1e0] sm:$0xff] %vm927_vm8, %v3033_v36  ;;  %4389 = vmatmul.mubr.f32.gmra.mrb[70].mxu1 %v4135_v17 }
 0x306   : > { %2872 = vrot.lane.b32.xlu0 %v8105_v25, %s5651_s27  ;;  %v3147_v25 = vld [vmem:[#allocation3 + $0xf8] sm:$0x7f] }
 0x307   : > { %3052 = vrot.lane.b32.xlu1 %v8133_v15, %s5652_s25  ;;  %v3939_v26 = vpop.permute.xlu0 %3938  ;;  %v2965_v15 = vld [vmem:[#allocation3 + $0xe9] sm:$0x7f]  ;;  %v3226_v61 = vrot.slane %v3147_v25, 7 }
 0x308   : > { %v3269_v43 = vpop.permute.xlu1 %3268  ;;  %4008 = vst.msk [vmem:[#allocation2 + $0x1e8] sm:$0xff] %vm1169_vm9, %v3939_v26 }
 0x309   : > { %3344 = vst.msk [vmem:[#allocation2 + $0x1e0] sm:$0xfe] %vm1167_vm6, %v3269_v43 }
 0x30a   : > { %3544 = vrot.lane.b32.xlu0 %v8191_v59, %s5651_s27  ;;  %v4305_v62 = vpop.f32.mrb[36].mxu1 }
 0x30b   : > { %3288 = vrot.lane.b32.xlu1 %v8181_v37, %s5650_s26  ;;  %v4306_v35 = vadd.f32 %v8189_v19, %v4305_v62  ;;  %v3527_v1 = vpop.permute.xlu0 %3526  ;;  %v4307_v6 = vpop.f32.mrb[37].mxu1 }
 0x30c   : > { %v2855_v44 = vpop.permute.xlu1 %2854  ;;  %3601 = vst.msk [vmem:[#allocation2 + $0x200] sm:$0x7f] %vm1426_vm5, %v3527_v1 }
 0x30d   : > { %2925 = vst.msk [vmem:[#allocation2 + $0x1f8] sm:$0xff] %vm746_vm4, %v2855_v44  ;;  %v8262_v49 = vadd.f32 %v8172_v3, %v4306_v35 }
 0x30e   : > { %2874 = vrot.lane.b32.xlu0 %v8143_v30, %s5651_s27  ;;  %v3227_v30 = vsel %vm487_vm1, %v8181_v37, %v3226_v61 }
 0x30f   : > { %3054 = vrot.lane.b32.xlu1 %v2965_v15, %s5652_s25  ;;  %v3761_v2 = vpop.permute.xlu0 %3760  ;;  %v4139_v46 = vld [vmem:[#allocation2 + $0x1e8] sm:$0xff] }
 0x310   : > { %v3035_v14 = vpop.permute.xlu1 %3034  ;;  %v4138_v8 = vld [vmem:[#allocation2 + $0x1e0] sm:$0xff]  ;;  %3829 = vst.msk [vmem:[#allocation2 + $0x200] sm:$0xff] %vm927_vm8, %v3761_v2  ;;  %4393 = vmatprep.mubr.f32.mxu1 %v4139_v46 }
 0x311   : > { %3105 = vst.msk [vmem:[#allocation2 + $0x1f8] sm:$0x7f] %vm929_vm10, %v3035_v14  ;;  %4394 = vmatmul.mubr.f32.gmra.mrb[72].mxu1 %v4138_v8 }
 0x312   : > { %3546 = vrot.lane.b32.xlu0 %v3451_v63, %s5651_s27  ;;  %s4926_s27 = sshll.u32 %s8637_s16, 4  ;;  %s8712_s27 = int_to_ptr.vmem [resolvable:$true] %s4926_s27 }
 0x313   : > { %3290 = vrot.lane.b32.xlu1 %v3227_v30, %s5650_s26  ;;  %v3941_v3 = vpop.permute.xlu0 %3940  ;;  %s5094_s26 = sshll.u32 %s5728_s13, 12  ;;  %s8744_s13 = scalar_lea.sflag [#allocation5], %s323_s29 }
 0x314   : > { %v3271_v20 = vpop.permute.xlu1 %3270  ;;  %4009 = vst.msk [vmem:[#allocation2 + $0x200] sm:$0xff] %vm1169_vm9, %v3941_v3  ;;  %s8708_s17 = scalar_lea.hbm %s8794_s9, %s5094_s26  ;;  %s5584_s22 = scalar_lea.vmem %s8712_s27, 4096 }
 0x315   : > { %3345 = vst.msk [vmem:[#allocation2 + $0x1f8] sm:$0xff] %vm1169_vm9, %v3271_v20  ;;  %v8272_v7 = vpop.f32.mrb[76].mxu0  ;;  %p5585_p11 = scmp.ne.s32.totalorder %s8712_s27, %s5584_s22  ;;  %p5591_p0 = scmp.lt.s32.totalorder %s8712_s27, %s5589_s24 }
 0x316   : > { %v8274_v59 = vpop.f32.mrb[77].mxu0  ;;  %v4310_v37 = vpop.f32.mrb[38].mxu1  ;;  %p5592_p1 = scmp.lt.s32.totalorder %s5590_s28, %s5584_s22 }
 0x317   : > { %v3529_v28 = vpop.permute.xlu0 %3528  ;;  %v4311_v53 = vadd.f32 %v8189_v19, %v4310_v37  ;;  %v4312_v38 = vpop.f32.mrb[39].mxu1  ;;  %p5586_p12 = pnand %p5585_p11, %p5745_p5 }
 0x318   : > { %v2857_v45 = vpop.permute.xlu1 %2856  ;;  %3602 = vst.msk [vmem:[#allocation2 + $0x218] sm:$0xff] %vm746_vm4, %v3529_v28  ;;  %p5593_p2 = por %p5592_p1, %p5591_p0 }
 0x319   : > { %2926 = vst.msk [vmem:[#allocation2 + $0x210] sm:$0xff] %vm746_vm4, %v2857_v45  ;;  %v8280_v10 = vadd.f32 %v8169_v12, %v4311_v53  ;;  %p5587_p13 = pneg %p5586_p12 }
 0x31b   : > { %v3763_v54 = vpop.permute.xlu0 %3762  ;;  %v4142_v57 = vld [vmem:[#allocation2 + $0x200] sm:$0xff]  ;;  %p5594_p3 = pnand %p5593_p2, %p5587_p13 }
 0x31c   : > { %v3037_v23 = vpop.permute.xlu1 %3036  ;;  %v4141_v34 = vld [vmem:[#allocation2 + $0x1f8] sm:$0xff]  ;;  %3830 = vst.msk [vmem:[#allocation2 + $0x218] sm:$0xfe] %vm1654_vm7, %v3763_v54  ;;  %4398 = vmatprep.mubr.f32.mxu1 %v4142_v57 }
 0x31d   : > { %3106 = vst.msk [vmem:[#allocation2 + $0x210] sm:$0xff] %vm927_vm8, %v3037_v23  ;;  %4399 = vmatmul.mubr.f32.gmra.mrb[74].mxu1 %v4141_v34 }
 0x31f   : > { %v3943_v16 = vpop.permute.xlu0 %3942 }
 0x320   : > { %v3273_v40 = vpop.permute.xlu1 %3272  ;;  %4010 = vst.msk [vmem:[#allocation2 + $0x218] sm:$0xff] %vm1169_vm9, %v3943_v16 }
 0x321   : > { %3346 = vst.msk [vmem:[#allocation2 + $0x210] sm:$0xfe] %vm1167_vm6, %v3273_v40 }
 0x323   : > { %v4315_v60 = vpop.f32.mrb[40].mxu1  ;;  %v3531_v48 = vpop.permute.xlu0 %3530 }
 0x324   : > { %v2859_v12 = vpop.permute.xlu1 %2858  ;;  %v4316_v41 = vadd.f32 %v8189_v19, %v4315_v60  ;;  %3603 = vst.msk [vmem:[#allocation2 + $0x230] sm:$0x7f] %vm1426_vm5, %v3531_v48  ;;  %v4317_v4 = vpop.f32.mrb[41].mxu1 }
 0x325   : > { %2927 = vst.msk [vmem:[#allocation2 + $0x228] sm:$0xff] %vm746_vm4, %v2859_v12 }
 0x326   : > { %v8290_v11 = vadd.f32 %v8184_v42, %v4316_v41 }
 0x327   : > { %v3765_v58 = vpop.permute.xlu0 %3764  ;;  %v4145_v47 = vld [vmem:[#allocation2 + $0x218] sm:$0xff] }
 0x328   : > { %v3039_v32 = vpop.permute.xlu1 %3038  ;;  %v4144_v29 = vld [vmem:[#allocation2 + $0x210] sm:$0xff]  ;;  %3831 = vst.msk [vmem:[#allocation2 + $0x230] sm:$0xff] %vm927_vm8, %v3765_v58  ;;  %4403 = vmatprep.mubr.f32.mxu1 %v4145_v47 }
 0x329   : > { %3107 = vst.msk [vmem:[#allocation2 + $0x228] sm:$0x7f] %vm929_vm10, %v3039_v32  ;;  %4404 = vmatmul.mubr.f32.gmra.mrb[76].mxu1 %v4144_v29 }
 0x32b   : > { %v3945_v9 = vpop.permute.xlu0 %3944 }
 0x32c   : > { %v3275_v22 = vpop.permute.xlu1 %3274  ;;  %4011 = vst.msk [vmem:[#allocation2 + $0x230] sm:$0xff] %vm1169_vm9, %v3945_v9 }
 0x32d   : > { %3347 = vst.msk [vmem:[#allocation2 + $0x228] sm:$0xff] %vm1169_vm9, %v3275_v22 }
 0x32e   : > { %v8296_v0 = vpop.f32.mrb[78].mxu0 }
 0x32f   : > { %v8298_v42 = vpop.f32.mrb[79].mxu0  ;;  %v4320_v18 = vpop.f32.mrb[42].mxu1 }
 0x330   : > { %v3533_v39 = vpop.permute.xlu0 %3532  ;;  %v2861_v21 = vpop.permute.xlu1 %2860  ;;  %v4321_v33 = vadd.f32 %v8189_v19, %v4320_v18 }
 0x331   : > { %3604 = vst.msk [vmem:[#allocation2 + $0x248] sm:$0xff] %vm746_vm4, %v3533_v39  ;;  %v4322_v17 = vpop.f32.mrb[43].mxu1  ;;  %2928 = vst.msk [vmem:[#allocation2 + $0x240] sm:$0xff] %vm746_vm4, %v2861_v21 }
 0x332   : > { %v8304_v51 = vadd.f32 %v8179_v5, %v4321_v33 }
 0x333   : > { %v4148_v43 = vld [vmem:[#allocation2 + $0x230] sm:$0xff] }
 0x334   : > { %v3767_v36 = vpop.permute.xlu0 %3766  ;;  %v3041_v26 = vpop.permute.xlu1 %3040  ;;  %v4147_v25 = vld [vmem:[#allocation2 + $0x228] sm:$0xff]  ;;  %4408 = vmatprep.mubr.f32.mxu1 %v4148_v43 }
 0x335   : > { %3832 = vst.msk [vmem:[#allocation2 + $0x248] sm:$0xfe] %vm1654_vm7, %v3767_v36  ;;  %4409 = vmatmul.mubr.f32.gmra.mrb[78].mxu1 %v4147_v25 }
 0x336   : > { %3108 = vst.msk [vmem:[#allocation2 + $0x240] sm:$0xff] %vm927_vm8, %v3041_v26 }
 0x338   : > { %v3947_v62 = vpop.permute.xlu0 %3946  ;;  %v3277_v35 = vpop.permute.xlu1 %3276 }
 0x339   : > { %4012 = vst.msk [vmem:[#allocation2 + $0x248] sm:$0xff] %vm1169_vm9, %v3947_v62 }
 0x33a   : > { %3348 = vst.msk [vmem:[#allocation2 + $0x240] sm:$0xfe] %vm1167_vm6, %v3277_v35 }
 0x33b   : > { %v4325_v1 = vpop.f32.mrb[44].mxu1 }
 0x33c   : > { %v3535_v44 = vpop.permute.xlu0 %3534  ;;  %v2863_v5 = vpop.permute.xlu1 %2862  ;;  %v4326_v15 = vadd.f32 %v8189_v19, %v4325_v1 }
 0x33d   : > { %3605 = vst.msk [vmem:[#allocation2 + $0x260] sm:$0x7f] %vm1426_vm5, %v3535_v44  ;;  %v4327_v61 = vpop.f32.mrb[45].mxu1 }
 0x33e   : > { %2929 = vst.msk [vmem:[#allocation2 + $0x258] sm:$0xff] %vm746_vm4, %v2863_v5  ;;  %v8314_v6 = vadd.f32 %v8209_v24, %v4326_v15 }
 0x340   : > { %v3769_v63 = vpop.permute.xlu0 %3768  ;;  %v3043_v2 = vpop.permute.xlu1 %3042  ;;  %v4151_v14 = vld [vmem:[#allocation2 + $0x248] sm:$0xff] }
 0x341   : > { %v4150_v46 = vld [vmem:[#allocation2 + $0x240] sm:$0xff]  ;;  %3833 = vst.msk [vmem:[#allocation2 + $0x260] sm:$0xff] %vm927_vm8, %v3769_v63  ;;  %4413 = vmatprep.mubr.f32.mxu1 %v4151_v14 }
 0x342   : > { %3109 = vst.msk [vmem:[#allocation2 + $0x258] sm:$0x7f] %vm929_vm10, %v3043_v2  ;;  %4414 = vmatmul.mubr.f32.gmra.mrb[80].mxu1 %v4150_v46 }
 0x344   : > { %v3949_v30 = vpop.permute.xlu0 %3948  ;;  %v3279_v8 = vpop.permute.xlu1 %3278 }
 0x345   : > { %4013 = vst.msk [vmem:[#allocation2 + $0x260] sm:$0xff] %vm1169_vm9, %v3949_v30  ;;  %3349 = vst.msk [vmem:[#allocation2 + $0x258] sm:$0xff] %vm1169_vm9, %v3279_v8 }
 0x346   : > { %v8320_v3 = vpop.f32.mrb[80].mxu0 }
 0x347   : > { %v8322_v24 = vpop.f32.mrb[81].mxu0  ;;  %v4330_v20 = vpop.f32.mrb[46].mxu1 }
 0x348   : > { %v3537_v37 = vpop.permute.xlu0 %3536  ;;  %v4331_v45 = vadd.f32 %v8189_v19, %v4330_v20  ;;  %v4332_v53 = vpop.f32.mrb[47].mxu1 }
 0x349   : > { %v2865_v28 = vpop.permute.xlu1 %2864  ;;  %3606 = vst.msk [vmem:[#allocation2 + $0x278] sm:$0xff] %vm746_vm4, %v3537_v37 }
 0x34a   : > { %2930 = vst.msk [vmem:[#allocation2 + $0x270] sm:$0xff] %vm746_vm4, %v2865_v28  ;;  %v8328_v38 = vadd.f32 %v8202_v50, %v4331_v45 }
 0x34c   : > { %v3771_v54 = vpop.permute.xlu0 %3770  ;;  %v4154_v57 = vld [vmem:[#allocation2 + $0x260] sm:$0xff]  ;;  %v4153_v34 = vld [vmem:[#allocation2 + $0x258] sm:$0xff] }
 0x34d   : > { %v3045_v23 = vpop.permute.xlu1 %3044  ;;  %3834 = vst.msk [vmem:[#allocation2 + $0x278] sm:$0xfe] %vm1654_vm7, %v3771_v54  ;;  %4418 = vmatprep.mubr.f32.mxu1 %v4154_v57 }
 0x34e   : > { %3110 = vst.msk [vmem:[#allocation2 + $0x270] sm:$0xff] %vm927_vm8, %v3045_v23  ;;  %4419 = vmatmul.mubr.f32.gmra.mrb[82].mxu1 %v4153_v34 }
 0x350   : > { %v3951_v16 = vpop.permute.xlu0 %3950 }
 0x351   : > { %v3281_v40 = vpop.permute.xlu1 %3280  ;;  %4014 = vst.msk [vmem:[#allocation2 + $0x278] sm:$0xff] %vm1169_vm9, %v3951_v16 }
 0x352   : > { %3350 = vst.msk [vmem:[#allocation2 + $0x270] sm:$0xfe] %vm1167_vm6, %v3281_v40 }
 0x353   : > { %v4335_v60 = vpop.f32.mrb[48].mxu1 }
 0x354   : > { %v3539_v48 = vpop.permute.xlu0 %3538  ;;  %v4336_v12 = vadd.f32 %v8189_v19, %v4335_v60  ;;  %v4337_v41 = vpop.f32.mrb[49].mxu1 }
 0x355   : > { %v2867_v50 = vpop.permute.xlu1 %2866  ;;  %3607 = vst.msk [vmem:[#allocation2 + $0x290] sm:$0x7f] %vm1426_vm5, %v3539_v48 }
 0x356   : > { %2931 = vst.msk [vmem:[#allocation2 + $0x288] sm:$0xff] %vm746_vm4, %v2867_v50  ;;  %v8338_v4 = vadd.f32 %v8218_v52, %v4336_v12 }
 0x358   : > { %v3773_v58 = vpop.permute.xlu0 %3772  ;;  %v4157_v47 = vld [vmem:[#allocation2 + $0x278] sm:$0xff] }
 0x359   : > { %v3047_v32 = vpop.permute.xlu1 %3046  ;;  %v4156_v29 = vld [vmem:[#allocation2 + $0x270] sm:$0xff]  ;;  %3835 = vst.msk [vmem:[#allocation2 + $0x290] sm:$0xff] %vm927_vm8, %v3773_v58  ;;  %4423 = vmatprep.mubr.f32.mxu1 %v4157_v47 }
 0x35a   : > { %3111 = vst.msk [vmem:[#allocation2 + $0x288] sm:$0x7f] %vm929_vm10, %v3047_v32  ;;  %4424 = vmatmul.mubr.f32.gmra.mrb[84].mxu1 %v4156_v29 }
 0x35c   : > { %v3953_v9 = vpop.permute.xlu0 %3952 }
 0x35d   : > { %v3283_v22 = vpop.permute.xlu1 %3282  ;;  %4015 = vst.msk [vmem:[#allocation2 + $0x290] sm:$0xff] %vm1169_vm9, %v3953_v9 }
 0x35e   : > { %3351 = vst.msk [vmem:[#allocation2 + $0x288] sm:$0xff] %vm1169_vm9, %v3283_v22  ;;  %v8344_v18 = vpop.f32.mrb[82].mxu0 }
 0x35f   : > { %v8346_v52 = vpop.f32.mrb[83].mxu0  ;;  %v4340_v39 = vpop.f32.mrb[50].mxu1 }
 0x360   : > { %v3541_v21 = vpop.permute.xlu0 %3540  ;;  %v4341_v17 = vadd.f32 %v8189_v19, %v4340_v39  ;;  %v4342_v36 = vpop.f32.mrb[51].mxu1 }
 0x361   : > { %v2869_v33 = vpop.permute.xlu1 %2868  ;;  %3608 = vst.msk [vmem:[#allocation2 + $0x2a8] sm:$0xff] %vm746_vm4, %v3541_v21 }
 0x362   : > { %2932 = vst.msk [vmem:[#allocation2 + $0x2a0] sm:$0xff] %vm746_vm4, %v2869_v33  ;;  %v8352_v26 = vadd.f32 %v8214_v31, %v4341_v17  ;;  %v4152_v17 = vld [vmem:[#allocation2 + $0x250] sm:$0xff] }
 0x364   : > { %v3775_v43 = vpop.permute.xlu0 %3774  ;;  %v4160_v62 = vld [vmem:[#allocation2 + $0x290] sm:$0xff] }
 0x365   : > { %v3049_v25 = vpop.permute.xlu1 %3048  ;;  %v4159_v35 = vld [vmem:[#allocation2 + $0x288] sm:$0xff]  ;;  %3836 = vst.msk [vmem:[#allocation2 + $0x2a8] sm:$0xfe] %vm1654_vm7, %v3775_v43  ;;  %4428 = vmatprep.mubr.f32.mxu1 %v4160_v62 }
 0x366   : > { %3112 = vst.msk [vmem:[#allocation2 + $0x2a0] sm:$0xff] %vm927_vm8, %v3049_v25  ;;  %4429 = vmatmul.mubr.f32.gmra.mrb[86].mxu1 %v4159_v35  ;;  %v4155_v35 = vld [vmem:[#allocation2 + $0x268] sm:$0xff] }
 0x368   : > { %v3955_v1 = vpop.permute.xlu0 %3954 }
 0x369   : > { %v3285_v44 = vpop.permute.xlu1 %3284  ;;  %4016 = vst.msk [vmem:[#allocation2 + $0x2a8] sm:$0xff] %vm1169_vm9, %v3955_v1 }
 0x36a   : > { %3352 = vst.msk [vmem:[#allocation2 + $0x2a0] sm:$0xfe] %vm1167_vm6, %v3285_v44  ;;  %v4161_v44 = vld [vmem:[#allocation2 + $0x298] sm:$0xff] }
 0x36b   : > { %v4345_v5 = vpop.f32.mrb[52].mxu1 }
 0x36c   : > { %v3543_v15 = vpop.permute.xlu0 %3542  ;;  %v4346_v61 = vadd.f32 %v8189_v19, %v4345_v5  ;;  %v4347_v63 = vpop.f32.mrb[53].mxu1  ;;  %v4164_v5 = vld [vmem:[#allocation2 + $0x2b0] sm:$0xff] }
 0x36d   : > { %v2871_v31 = vpop.permute.xlu1 %2870  ;;  %3609 = vst.msk [vmem:[#allocation2 + $0x2c0] sm:$0x7f] %vm1426_vm5, %v3543_v15  ;;  %v4167_v15 = vld [vmem:[#allocation2 + $0x2c8] sm:$0xff] }
 0x36e   : > { %2933 = vst.msk [vmem:[#allocation2 + $0x2b8] sm:$0xff] %vm746_vm4, %v2871_v31  ;;  %v8362_v2 = vadd.f32 %v8231_v27, %v4346_v61  ;;  %v5583_v61 = vld [vmem:[#allocation2 + $0x2e0] sm:$0xff] }
 0x370   : > { %v3777_v14 = vpop.permute.xlu0 %3776  ;;  %v4163_v30 = vld [vmem:[#allocation2 + $0x2a8] sm:$0xff] }
 0x371   : > { %v3051_v46 = vpop.permute.xlu1 %3050  ;;  %v4162_v8 = vld [vmem:[#allocation2 + $0x2a0] sm:$0xff]  ;;  %3837 = vst.msk [vmem:[#allocation2 + $0x2c0] sm:$0xff] %vm927_vm8, %v3777_v14  ;;  %4433 = vmatprep.mubr.f32.mxu1 %v4163_v30 }
 0x372   : > { %3113 = vst.msk [vmem:[#allocation2 + $0x2b8] sm:$0x7f] %vm929_vm10, %v3051_v46  ;;  %4434 = vmatmul.mubr.f32.gmra.mrb[88].mxu1 %v4162_v8 }
 0x374   : > { %v3957_v20 = vpop.permute.xlu0 %3956 }
 0x375   : > { %v3287_v37 = vpop.permute.xlu1 %3286  ;;  %4017 = vst.msk [vmem:[#allocation2 + $0x2c0] sm:$0xff] %vm1169_vm9, %v3957_v20 }
 0x376   : > { %3353 = vst.msk [vmem:[#allocation2 + $0x2b8] sm:$0xff] %vm1169_vm9, %v3287_v37  ;;  %v8368_v28 = vpop.f32.mrb[84].mxu0 }
 0x377   : > { %v8370_v27 = vpop.f32.mrb[85].mxu0 }
 0x378   : > { %v4350_v45 = vpop.f32.mrb[54].mxu1  ;;  %v2873_v53 = vpop.permute.xlu0 %2872 }
 0x379   : > { %v3053_v54 = vpop.permute.xlu1 %3052  ;;  %v4351_v23 = vadd.f32 %v8189_v19, %v4350_v45  ;;  %2934 = vst.msk [vmem:[#allocation2 + $0x2d0] sm:$0xff] %vm746_vm4, %v2873_v53  ;;  %v4352_v57 = vpop.f32.mrb[55].mxu1 }
 0x37a   : > { %3114 = vst.msk [vmem:[#allocation2 + $0x2d0] sm:$0xff] %vm927_vm8, %v3053_v54 }
 0x37b   : > { %v8376_v34 = vadd.f32 %v8229_v56, %v4351_v23 }
 0x37c   : > { %v3545_v16 = vpop.permute.xlu0 %3544  ;;  %v4166_v60 = vld [vmem:[#allocation2 + $0x2c0] sm:$0xff] }
 0x37d   : > { %v3289_v40 = vpop.permute.xlu1 %3288  ;;  %v4165_v48 = vld [vmem:[#allocation2 + $0x2b8] sm:$0xff]  ;;  %3610 = vst.msk [vmem:[#allocation2 + $0x2d8] sm:$0xff] %vm746_vm4, %v3545_v16  ;;  %4438 = vmatprep.mubr.f32.mxu1 %v4166_v60 }
 0x37e   : > { %3354 = vst.msk [vmem:[#allocation2 + $0x2d0] sm:$0xfe] %vm1167_vm6, %v3289_v40  ;;  %4439 = vmatmul.mubr.f32.gmra.mrb[90].mxu1 %v4165_v48 }
 0x380   : > { %v2875_v50 = vpop.permute.xlu0 %2874 }
 0x381   : > { %v3055_v12 = vpop.permute.xlu1 %3054  ;;  %2935 = vst.msk [vmem:[#allocation2 + $0x2e8] sm:$0xff] %vm746_vm4, %v2875_v50 }
 0x382   : > { %3115 = vst.msk [vmem:[#allocation2 + $0x2e8] sm:$0x7f] %vm929_vm10, %v3055_v12  ;;  %v4355_v41 = vpop.f32.mrb[56].mxu1 }
 0x383   : > { %v4356_v32 = vadd.f32 %v8189_v19, %v4355_v41  ;;  %v4357_v9 = vpop.f32.mrb[57].mxu1 }
 0x384   : > { %v3547_v58 = vpop.permute.xlu0 %3546  ;;  %v4169_v47 = vld [vmem:[#allocation2 + $0x2d8] sm:$0xff] }
 0x385   : > { %v3291_v56 = vpop.permute.xlu1 %3290  ;;  %v4168_v29 = vld [vmem:[#allocation2 + $0x2d0] sm:$0xff]  ;;  %3611 = vst.msk [vmem:[#allocation2 + $0x2f0] sm:$0x7f] %vm1426_vm5, %v3547_v58  ;;  %4443 = vmatprep.mubr.f32.mxu1 %v4169_v47  ;;  %v8386_v22 = vadd.f32 %v8274_v59, %v4356_v32  ;;  %v4158_v59 = vld [vmem:[#allocation2 + $0x280] sm:$0xff] }
 0x386   : > { %3355 = vst.msk [vmem:[#allocation2 + $0x2e8] sm:$0xff] %vm1169_vm9, %v3291_v56  ;;  %4444 = vmatmul.mubr.f32.gmra.mrb[92].mxu1 %v4168_v29 }
 0x38c   : > { %v4172_v39 = vld [vmem:[#allocation2 + $0x2f0] sm:$0xff] }
 0x38d   : > { %v4171_v21 = vld [vmem:[#allocation2 + $0x2e8] sm:$0xff]  ;;  %4448 = vmatprep.mubr.f32.mxu1 %v4172_v39  ;;  %v5338_v33 = vpop.f32.mrb[86].mxu0 }
 0x38e   : > { %4449 = vmatmul.mubr.f32.gmra.mrb[94].mxu1 %v4171_v21  ;;  %v4630_v36 = vpop.f32.mrb[87].mxu0 }
 0x38f   : > { %5339 = vmatprep.mubr.f32.mxu1 %v4152_v17 }
 0x390   : > { %v4360_v43 = vpop.f32.mrb[58].mxu1 }
 0x391   : > { %v4361_v25 = vadd.f32 %v8189_v19, %v4360_v43  ;;  %v4362_v62 = vpop.f32.mrb[59].mxu1 }
 0x392   : > { %5340 = vmatmul.mubr.f32.vlgmr.msra.gmra.mrb[96].mxu1 %v4155_v35 }
 0x393   : > { %v8390_v1 = vadd.f32 %v8272_v7, %v4361_v25  ;;  %5342 = vmatprep.mubr.f32.mxu1 %v4158_v59 }
 0x396   : > { %5343 = vmatmul.mubr.f32.gmra.mrb[98].mxu1 %v4161_v44 }
 0x397   : > { %5345 = vmatprep.mubr.f32.mxu1 %v4164_v5 }
 0x39a   : > { %5346 = vmatmul.mubr.f32.gmra.mrb[100].mxu1 %v4167_v15 }
 0x39b   : > { %5348 = vmatprep.mubr.f32.mxu1 %v5583_v61 }
 0x39c   : > { %v4365_v31 = vpop.f32.mrb[60].mxu1 }
 0x39d   : > { %v4366_v63 = vadd.f32 %v8189_v19, %v4365_v31  ;;  %v4367_v14 = vpop.f32.mrb[61].mxu1  ;;  %v4680_v31 = vsel %vm566_vm0, %v8241_v13, 0.0 }
 0x39e   : > { %5349 = vmatmul.mubr.f32.gmra.mrb[102].mxu1 %v5583_v61  ;;  %v4682_v14 = vsel %vm566_vm0, %v8262_v49, 0.0 }
 0x39f   : > { %v8394_v46 = vadd.f32 %v8298_v42, %v4366_v63 }
 0x3a9   : > { %v4370_v7 = vpop.f32.mrb[62].mxu1 }
 0x3aa   : > { %v4371_v30 = vadd.f32 %v8189_v19, %v4370_v7  ;;  %v4372_v8 = vpop.f32.mrb[63].mxu1  ;;  %v4684_v7 = vsel %vm566_vm0, %v8280_v10, 0.0 }
 0x3ab   : > { %v4686_v8 = vsel %vm566_vm0, %v8290_v11, 0.0 }
 0x3ac   : > { %v8398_v20 = vadd.f32 %v8296_v0, %v4371_v30 }
 0x3b4   : > { %v4375_v37 = vpop.f32.mrb[64].mxu1 }
 0x3b5   : > { %v4376_v45 = vadd.f32 %v8189_v19, %v4375_v37  ;;  %v4377_v53 = vpop.f32.mrb[65].mxu1 }
 0x3b7   : > { %v8402_v54 = vadd.f32 %v8322_v24, %v4376_v45  ;;  %v4688_v45 = vsel %vm566_vm0, %v8304_v51, 0.0 }
 0x3c1   : > { %v4380_v23 = vpop.f32.mrb[66].mxu1 }
 0x3c2   : > { %v4381_v57 = vadd.f32 %v8189_v19, %v4380_v23  ;;  %v4382_v42 = vpop.f32.mrb[67].mxu1  ;;  %v4690_v23 = vsel %vm566_vm0, %v8314_v6, 0.0 }
 0x3c3   : > { %v4692_v42 = vsel %vm566_vm0, %v8328_v38, 0.0 }
 0x3c4   : > { %v8406_v16 = vadd.f32 %v8320_v3, %v4381_v57 }
 0x3cc   : > { %v4385_v40 = vpop.f32.mrb[68].mxu1 }
 0x3cd   : > { %v4386_v60 = vadd.f32 %v8189_v19, %v4385_v40  ;;  %v4387_v48 = vpop.f32.mrb[69].mxu1 }
 0x3cf   : > { %v8410_v0 = vadd.f32 %v8346_v52, %v4386_v60 }
 0x3d8   : > { %v4390_v50 = vpop.f32.mrb[70].mxu1 }
 0x3d9   : > { %v4391_v12 = vadd.f32 %v8189_v19, %v4390_v50  ;;  %v4392_v41 = vpop.f32.mrb[71].mxu1  ;;  %v4694_v50 = vsel %vm566_vm0, %v8338_v4, 0.0 }
 0x3da   : > { %v4696_v41 = vsel %vm566_vm0, %v8352_v26, 0.0 }
 0x3db   : > { %v8414_v24 = vadd.f32 %v8344_v18, %v4391_v12 }
 0x3e4   : > { %v4395_v58 = vpop.f32.mrb[72].mxu1 }
 0x3e5   : > { %v4396_v56 = vadd.f32 %v8189_v19, %v4395_v58  ;;  %v4397_v32 = vpop.f32.mrb[73].mxu1 }
 0x3e7   : > { %v8418_v3 = vadd.f32 %v8370_v27, %v4396_v56  ;;  %v4698_v56 = vsel %vm566_vm0, %v8362_v2, 0.0 }
 0x3f0   : > { %v4400_v47 = vpop.f32.mrb[74].mxu1 }
 0x3f1   : > { %v4401_v29 = vadd.f32 %v8189_v19, %v4400_v47  ;;  %v4402_v9 = vpop.f32.mrb[75].mxu1  ;;  %v4700_v47 = vsel %vm566_vm0, %v8376_v34, 0.0 }
 0x3f2   : > { %v4702_v9 = vsel %vm566_vm0, %v8386_v22, 0.0 }
 0x3f3   : > { %v8422_v52 = vadd.f32 %v8368_v28, %v4401_v29 }
 0x3fc   : > { %v4405_v39 = vpop.f32.mrb[76].mxu1 }
 0x3fd   : > { %v4406_v21 = vadd.f32 %v8189_v19, %v4405_v39  ;;  %v4407_v17 = vpop.f32.mrb[77].mxu1 }
 0x3ff   : > { %v8425_v18 = vadd.f32 %v4630_v36, %v4406_v21  ;;  %v4679_v36 = vsel %vm566_vm0, %v8205_v55, 0.0  ;;  %v4704_v21 = vsel %vm566_vm0, %v8390_v1, 0.0 }
 0x408   : > { %v4410_v43 = vpop.f32.mrb[78].mxu1 }
 0x409   : > { %v4411_v25 = vadd.f32 %v8189_v19, %v4410_v43  ;;  %v4412_v62 = vpop.f32.mrb[79].mxu1 }
 0x40a   : > { %v4706_v62 = vsel %vm566_vm0, %v8394_v46, 0.0 }
 0x40b   : > { %v8428_v35 = vadd.f32 %v5338_v33, %v4411_v25  ;;  %v4681_v33 = vadd.f32 %v4680_v31, %v4679_v36  ;;  %v4710_v31 = vsel %vm566_vm0, %v8402_v54, 0.0  ;;  %v4712_v36 = vsel %vm566_vm0, %v8406_v16, 0.0 }
 0x40d   : > { %v4683_v30 = vadd.f32 %v4682_v14, %v4681_v33 }
 0x40f   : > { %v4685_v37 = vadd.f32 %v4684_v7, %v4683_v30  ;;  %v4714_v30 = vsel %vm566_vm0, %v8410_v0, 0.0 }
 0x411   : > { %v4687_v53 = vadd.f32 %v4686_v8, %v4685_v37  ;;  %v4716_v37 = vsel %vm566_vm0, %v8414_v24, 0.0 }
 0x413   : > { %v4689_v57 = vadd.f32 %v4688_v45, %v4687_v53  ;;  %v4718_v53 = vsel %vm566_vm0, %v8418_v3, 0.0 }
 0x415   : > { %v4415_v27 = vpop.f32.mrb[80].mxu1  ;;  %v4691_v60 = vadd.f32 %v4690_v23, %v4689_v57  ;;  %v4720_v57 = vsel %vm566_vm0, %v8422_v52, 0.0 }
 0x416   : > { %v4417_v59 = vpop.f32.mrb[81].mxu1 }
 0x417   : > { %v4693_v12 = vadd.f32 %v4692_v42, %v4691_v60 }
 0x419   : > { %v4695_v58 = vadd.f32 %v4694_v50, %v4693_v12  ;;  %v4722_v50 = vsel %vm566_vm0, %v8425_v18, 0.0 }
 0x41b   : > { %v4697_v32 = vadd.f32 %v4696_v41, %v4695_v58  ;;  %v4724_v58 = vsel %vm566_vm0, %v8428_v35, 0.0 }
 0x41d   : > { %v4699_v29 = vadd.f32 %v4698_v56, %v4697_v32  ;;  %v4416_v56 = vadd.f32 %v8189_v19, %v4415_v27 }
 0x41f   : > { %v4701_v39 = vadd.f32 %v4700_v47, %v4699_v29 }
 0x421   : > { %v4420_v44 = vpop.f32.mrb[82].mxu1  ;;  %v4703_v43 = vadd.f32 %v4702_v9, %v4701_v39 }
 0x422   : > { %v4422_v5 = vpop.f32.mrb[83].mxu1  ;;  %v4421_v41 = vadd.f32 %v8189_v19, %v4420_v44 }
 0x423   : > { %v4705_v59 = vadd.f32 %v4704_v21, %v4703_v43  ;;  %v4708_v5 = vsel %vm566_vm0, %v8398_v20, 0.0 }
 0x42d   : > { %v8430_v15 = vpop.f32.mrb[84].mxu1 }
 0x42e   : > { %v4427_v28 = vpop.f32.mrb[85].mxu1 }
 0x42f   : > { %v4707_v28 = vadd.f32 %v4706_v62, %v4705_v59 }
 0x439   : > { %v4430_v61 = vpop.f32.mrb[86].mxu1 }
 0x43a   : > { %v4432_v63 = vpop.f32.mrb[87].mxu1  ;;  %v4431_v21 = vadd.f32 %v8189_v19, %v4430_v61 }
 0x43b   : > { %v4709_v63 = vadd.f32 %v4708_v5, %v4707_v28 }
 0x43d   : > { %v4711_v33 = vadd.f32 %v4710_v31, %v4709_v63 }
 0x43f   : > { %v4713_v8 = vadd.f32 %v4712_v36, %v4711_v33 }
 0x441   : > { %v4715_v45 = vadd.f32 %v4714_v30, %v4713_v8 }
 0x443   : > { %v4717_v23 = vadd.f32 %v4716_v37, %v4715_v45 }
 0x445   : > { %v4435_v40 = vpop.f32.mrb[88].mxu1  ;;  %v4719_v60 = vadd.f32 %v4718_v53, %v4717_v23 }
 0x446   : > { %v4437_v48 = vpop.f32.mrb[89].mxu1  ;;  %v4436_v36 = vadd.f32 %v8189_v19, %v4435_v40 }
 0x447   : > { %v4721_v12 = vadd.f32 %v4720_v57, %v4719_v60 }
 0x449   : > { %v4723_v47 = vadd.f32 %v4722_v50, %v4721_v12 }
 0x44b   : > { %v4725_v43 = vadd.f32 %v4724_v58, %v4723_v47 }
 0x451   : > { %v4440_v17 = vpop.f32.mrb[90].mxu1 }
 0x452   : > { %v4442_v25 = vpop.f32.mrb[91].mxu1  ;;  %v4441_v63 = vadd.f32 %v8189_v19, %v4440_v17 }
 0x453   : > { %v4426_v25 = vadd.f32 %v8189_v19, %v8430_v15 }
 0x459   : > { %v4445_v14 = vpop.f32.mrb[92].mxu1 }
 0x45a   : > { %v4447_v7 = vpop.f32.mrb[93].mxu1  ;;  %v4446_v17 = vadd.f32 %v8189_v19, %v4445_v14 }
 0x461   : > { %v4450_v42 = vpop.f32.mrb[94].mxu1 }
 0x462   : > { %v4452_v48 = vpop.f32.mrb[95].mxu1  ;;  %v4451_v53 = vadd.f32 %v8189_v19, %v4450_v42 }
 0x465   : > { %v5341_v32 = vpop.f32.mrb[96].mxu1 }
 0x466   : > { %v8482_v29 = vadd.f32 %v5341_v32, %v4421_v41  ;;  %v4640_v9 = vpop.f32.mrb[97].mxu1 }
 0x467   : > { %v8484_v39 = vadd.f32 %v4640_v9, %v4416_v56 }
 0x468   : > { %v4728_v28 = vsel %vm566_vm0, %v8482_v29, 0.0 }
 0x469   : > { %v4726_v44 = vsel %vm566_vm0, %v8484_v39, 0.0  ;;  %v5344_v62 = vpop.f32.mrb[98].mxu1 }
 0x46a   : > { %v4727_v59 = vadd.f32 %v4726_v44, %v4725_v43  ;;  %v8491_v5 = vadd.f32 %v5344_v62, %v4431_v21  ;;  %v4650_v27 = vpop.f32.mrb[99].mxu1  ;;  %v4749_v44 = vld [vmem:[%s8790_s5] sm:$0x3] }
 0x46b   : > { %v8495_v31 = vadd.f32 %v4650_v27, %v4426_v25 }
 0x46c   : > { %v4729_v61 = vadd.f32 %v4728_v28, %v4727_v59  ;;  %v4732_v37 = vsel %vm566_vm0, %v8491_v5, 0.0  ;;  %v5653_v28 = vmov 0  }
 0x46d   : > { %v4730_v15 = vsel %vm566_vm0, %v8495_v31, 0.0  ;;  %v5347_v33 = vpop.f32.mrb[100].mxu1  ;;  %5574 = vset.pattern.permute.xlu1 %v5653_v28  ;;  %5575 = vset.pattern.permute.xlu0 %v5653_v28 }
 0x46e   : > { %v4731_v7 = vadd.f32 %v4730_v15, %v4729_v61  ;;  %v8501_v30 = vadd.f32 %v5347_v33, %v4441_v63  ;;  %v4660_v8 = vpop.f32.mrb[101].mxu1  ;;  %v4755_v63 = vld [vmem:[%s8791_s6] sm:$0x3] }
 0x46f   : > { %v8505_v45 = vadd.f32 %v4660_v8, %v4436_v36  ;;  %v4758_v33 = vld [vmem:[%s8792_s7] sm:$0x3] }
 0x470   : > { %v4733_v23 = vadd.f32 %v4732_v37, %v4731_v7  ;;  %v4736_v12 = vsel %vm566_vm0, %v8501_v30, 0.0 }
 0x471   : > { %v4734_v40 = vsel %vm566_vm0, %v8505_v45, 0.0  ;;  %v5350_v57 = vpop.f32.mrb[102].mxu1 }
 0x472   : > { %v4735_v60 = vadd.f32 %v4734_v40, %v4733_v23  ;;  %v8511_v48 = vadd.f32 %v5350_v57, %v4451_v53  ;;  %v4670_v50 = vpop.f32.mrb[103].mxu1 }
 0x473   : > { %v8515_v41 = vadd.f32 %v4670_v50, %v4446_v17 }
 0x474   : > { %v4737_v58 = vadd.f32 %v4736_v12, %v4735_v60  ;;  %v4740_v19 = vsel %vm566_vm0, %v8511_v48, 0.0  ;;  %v4772_v60 = vld [vmem:[%s8793_s8] sm:$0x1] }
 0x475   : > { %v4738_v42 = vsel %vm566_vm0, %v8515_v41, 0.0 }
 0x476   : > { %v4739_v56 = vadd.f32 %v4738_v42, %v4737_v58 }
 0x478   : > { %v4741_v14 = vadd.f32 %v4740_v19, %v4739_v56  ;;  %v4812_v19 = vlaneseq }
 0x47a   : > { %v4742_v32 = vrot.slane %v4741_v14, 4 }
 0x47c   : > { %v4743_v47 = vadd.f32 %v4742_v32, %v4741_v14  ;;  %v4813_v14 = vshrl.u32 %v4812_v19, 7  ;;  %v4800_v19 = vld [vmem:[%s5887_s21 + $0xa0] sm:$0xff] }
 0x47e   : > { %v4744_v9 = vrot.slane %v4743_v47, 2  ;;  %v4814_v32 = vsub.s32 0, %v4813_v14  ;;  %v4802_v14 = vld [vmem:[%s5887_s21 + $0xb0] sm:$0xff] }
 0x480   : > { %v4745_v21 = vadd.f32 %v4744_v9, %v4743_v47 }
 0x482   : > { %v4746_v43 = vrot.slane %v4745_v21, 1 }
 0x484   : > { %v4747_v25 = vadd.f32 %v4746_v43, %v4745_v21 }
 0x486   : > { %v4748_v62 = vmul.f32 0.00390625, %v4747_v25 }
 0x488   : > { %v4750_v59 = vmul.f32 %v4749_v44, %v4748_v62 }
 0x48a   : > { %v4752_v27 = vsel %vm4751_vm11, %v4750_v59, 0.0 }
 0x48b   : > { %4753 = vadd.xlane.f32.xlu0 %v4752_v27 }
 0x518   : > { %v4754_v61 = vpop.xlane.xlu0 %4753 }
 0x519   : > { %v4756_v36 = vadd.f32 %v4755_v63, %v4754_v61  ;;  %v4781_v63 = vld [vmem:[%s5887_s21 + $0x8] sm:$0xff]  ;;  %v4783_v61 = vld [vmem:[%s5887_s21 + $0x18] sm:$0xff] }
 0x51b   : > { %v4757_v15 = vmax.f32 %v4756_v36, 0.0  ;;  %v4786_v36 = vld [vmem:[%s5887_s21 + $0x30] sm:$0xff] }
 0x51d   : > { %4761 = vperm.xlu1 %5574, %v4757_v15  }
 0x59c   : > { %v4762_v7 = vpop.permute.xlu1 %4761 }
 0x59d   : > { %v4764_v8 = vmul.f32 %v4762_v7, %v4758_v33  ;;  %v4788_v33 = vld [vmem:[%s5887_s21 + $0x40] sm:$0xff]  ;;  %v4789_v7 = vld [vmem:[%s5887_s21 + $0x48] sm:$0xff] }
 0x59f   : > { %v4765_v37 = vsel %vm4751_vm11, %v4764_v8, 0.0  ;;  %v4790_v8 = vld [vmem:[%s5887_s21 + $0x50] sm:$0xff] }
 0x5a0   : > { %v4766_v53 = vrot.slane %v4765_v37, 4 }
 0x5a2   : > { %v4767_v23 = vadd.f32 %v4766_v53, %v4765_v37  ;;  %v4792_v53 = vld [vmem:[%s5887_s21 + $0x60] sm:$0xff] }
 0x5a4   : > { %v4768_v17 = vrot.slane %v4767_v23, 2 }
 0x5a6   : > { %v4769_v40 = vadd.f32 %v4768_v17, %v4767_v23  ;;  %v4793_v23 = vld [vmem:[%s5887_s21 + $0x68] sm:$0xff] }
 0x5a8   : > { %v4770_v57 = vrot.slane %v4769_v40, 1 }
 0x5aa   : > { %v4771_v50 = vadd.f32 %v4770_v57, %v4769_v40  ;;  %v4795_v40 = vld [vmem:[%s5887_s21 + $0x78] sm:$0xff]  ;;  %v4796_v57 = vld [vmem:[%s5887_s21 + $0x80] sm:$0xff] }
 0x5ac   : > { %v4773_v12 = vadd.f32 %v4772_v60, %v4771_v50  ;;  %v4798_v50 = vld [vmem:[%s5887_s21 + $0x90] sm:$0xff] }
 0x5ae   : > { %v5087_v58 = vmul.f32 -1.442695, %v4773_v12  ;;  %v4799_v12 = vld [vmem:[%s5887_s21 + $0x98] sm:$0xff] }
 0x5b0   : > { %5576 = vpow2.f32 %v5087_v58 }
 0x5ba   : > { %v5577_v42 = vpop.eup %5576 }
 0x5bb   : > { %v4777_v56 = vadd.f32 1.0, %v5577_v42 }
 0x5bd   : > { %5578 = vrcp.f32 %v4777_v56 }
 0x5c7   : > { %v5579_v47 = vpop.eup %5578 }
 0x5c8   : > { %v4815_v9 = vrot.slane %v5579_v47, %v4814_v32 }
 0x5ca   : > { %v4816_v21 = vmul.f32 %v4815_v9, %v8205_v55  ;;  %v4817_v43 = vmul.f32 %v4815_v9, %v8241_v13  ;;  %v4818_v25 = vmul.f32 %v4815_v9, %v8262_v49  ;;  %v4819_v44 = vmul.f32 %v4815_v9, %v8280_v10 }
 0x5cb   : > { %v4820_v62 = vmul.f32 %v4815_v9, %v8290_v11  ;;  %v4821_v59 = vmul.f32 %v4815_v9, %v8304_v51  ;;  %v4822_v27 = vmul.f32 %v4815_v9, %v8314_v6  ;;  %v4823_v28 = vmul.f32 %v4815_v9, %v8328_v38  ;;  %v4780_v11 = vld [vmem:[%s5887_s21] sm:$0xff]  ;;  %v4782_v51 = vld [vmem:[%s5887_s21 + $0x10] sm:$0xff] }
 0x5cc   : > { %v4824_v55 = vmul.f32 %v4815_v9, %v8338_v4  ;;  %v4825_v13 = vmul.f32 %v4815_v9, %v8352_v26  ;;  %v4826_v49 = vmul.f32 %v4815_v9, %v8362_v2  ;;  %v4827_v10 = vmul.f32 %v4815_v9, %v8376_v34  ;;  %v4784_v2 = vld [vmem:[%s5887_s21 + $0x20] sm:$0xff]  ;;  %v4785_v34 = vld [vmem:[%s5887_s21 + $0x28] sm:$0xff] }
 0x5cd   : > { %v8551_v6 = vmul.f32 %v4815_v9, %v8386_v22  ;;  %v8554_v38 = vmul.f32 %v4815_v9, %v8390_v1  ;;  %v8557_v4 = vmul.f32 %v4815_v9, %v8394_v46  ;;  %v8560_v26 = vmul.f32 %v4815_v9, %v8398_v20  ;;  %v4787_v22 = vld [vmem:[%s5887_s21 + $0x38] sm:$0xff] }
 0x5ce   : > { %v8571_v15 = vmul.f32 %v4815_v9, %v8402_v54  ;;  %v8574_v1 = vmul.f32 %v4815_v9, %v8406_v16  ;;  %v8577_v46 = vmul.f32 %v4815_v9, %v8410_v0  ;;  %v8580_v20 = vmul.f32 %v4815_v9, %v8414_v24  ;;  %v4791_v24 = vld [vmem:[%s5887_s21 + $0x58] sm:$0xff] }
 0x5cf   : > { %v8586_v37 = vmul.f32 %v4815_v9, %v8418_v3  ;;  %v8589_v54 = vmul.f32 %v4815_v9, %v8422_v52  ;;  %v8592_v16 = vmul.f32 %v4815_v9, %v8425_v18  ;;  %v8595_v0 = vmul.f32 %v4815_v9, %v8428_v35  ;;  %v4794_v35 = vld [vmem:[%s5887_s21 + $0x70] sm:$0xff] }
 0x5d0   : > { %v8601_v17 = vmul.f32 %v4815_v9, %v8484_v39  ;;  %v8604_v3 = vmul.f32 %v4815_v9, %v8482_v29  ;;  %v8607_v52 = vmul.f32 %v4815_v9, %v8495_v31  ;;  %v8610_v18 = vmul.f32 %v4815_v9, %v8491_v5  ;;  %v4797_v5 = vld [vmem:[%s5887_s21 + $0x88] sm:$0xff] }
 0x5d1   : > { %v8616_v60 = vmul.f32 %v4815_v9, %v8505_v45  ;;  %v8619_v39 = vmul.f32 %v4815_v9, %v8501_v30  ;;  %v8622_v29 = vmul.f32 %v4815_v9, %v8515_v41  ;;  %v8625_v31 = vmul.f32 %v4815_v9, %v8511_v48  ;;  %v4801_v30 = vld [vmem:[%s5887_s21 + $0xa8] sm:$0xff]  ;;  %v4803_v9 = vld [vmem:[%s5887_s21 + $0xb8] sm:$0xff] }
 0x5d2   : > { %v4848_v58 = vadd.f32 %v4816_v21, %v4780_v11  ;;  %v4849_v42 = vadd.f32 %v4817_v43, %v4781_v63  ;;  %v4850_v56 = vadd.f32 %v4818_v25, %v4782_v51  ;;  %v4851_v45 = vadd.f32 %v4819_v44, %v4783_v61  ;;  %v4807_v25 = vld [vmem:[%s5887_s21 + $0xd8] sm:$0xff]  ;;  %v4806_v44 = vld [vmem:[%s5887_s21 + $0xd0] sm:$0xff] }
 0x5d3   : > { %8797 = vst [vmem:[#allocation7_spill] sm:$0xff] %v8616_v60  ;;  %8798 = vst [vmem:[#allocation8_spill] sm:$0xff] %v8619_v39  ;;  %v4852_v32 = vadd.f32 %v4820_v62, %v4784_v2  ;;  %v4853_v41 = vadd.f32 %v4821_v59, %v4785_v34  ;;  %v4854_v47 = vadd.f32 %v4822_v27, %v4786_v36  ;;  %v4809_v62 = vld [vmem:[%s5887_s21 + $0xe8] sm:$0xff] }
 0x5d4   : > { %8799 = vst [vmem:[#allocation9_spill] sm:$0xff] %v8622_v29  ;;  %8800 = vst [vmem:[#allocation10_spill] sm:$0xff] %v8625_v31  ;;  %v4855_v48 = vadd.f32 %v4823_v28, %v4787_v22  ;;  %v4805_v31 = vld [vmem:[%s5887_s21 + $0xc8] sm:$0xff]  ;;  %v4804_v29 = vld [vmem:[%s5887_s21 + $0xc0] sm:$0xff]  ;;  %v4856_v39 = vadd.f32 %v4824_v55, %v4788_v33  ;;  %v4857_v60 = vadd.f32 %v4825_v13, %v4789_v7 }
 0x5d5   : > { %v4858_v21 = vadd.f32 %v4826_v49, %v4790_v8  ;;  %v4859_v43 = vadd.f32 %v4827_v10, %v4791_v24  ;;  %4880 = vst.msk [vmem:[%s8637_s16] sm:$0xff] %vm566_vm0, %v4848_v58  ;;  %4881 = vst.msk [vmem:[%s8637_s16 + $0x8] sm:$0xff] %vm566_vm0, %v4849_v42  ;;  %v4860_v59 = vadd.f32 %v8551_v6, %v4792_v53  ;;  %v4808_v13 = vld [vmem:[%s5887_s21 + $0xe0] sm:$0xff]  ;;  %v4811_v49 = vld [vmem:[%s5887_s21 + $0xf8] sm:$0xff] }
 0x5d6   : > { %4882 = vst.msk [vmem:[%s8637_s16 + $0x10] sm:$0xff] %vm566_vm0, %v4850_v56  ;;  %4883 = vst.msk [vmem:[%s8637_s16 + $0x18] sm:$0xff] %vm566_vm0, %v4851_v45  ;;  %v4861_v27 = vadd.f32 %v8554_v38, %v4793_v23  ;;  %v4862_v28 = vadd.f32 %v8557_v4, %v4794_v35  ;;  %v4863_v55 = vadd.f32 %v8560_v26, %v4795_v40  ;;  %v4810_v10 = vld [vmem:[%s5887_s21 + $0xf0] sm:$0xff] }
 0x5d7   : > { %4884 = vst.msk [vmem:[%s8637_s16 + $0x20] sm:$0xff] %vm566_vm0, %v4852_v32  ;;  %4885 = vst.msk [vmem:[%s8637_s16 + $0x28] sm:$0xff] %vm566_vm0, %v4853_v41  ;;  %v4864_v11 = vadd.f32 %v8571_v15, %v4796_v57  ;;  %v4865_v63 = vadd.f32 %v8574_v1, %v4797_v5  ;;  %v4866_v51 = vadd.f32 %v8577_v46, %v4798_v50 }
 0x5d8   : > { %4886 = vst.msk [vmem:[%s8637_s16 + $0x30] sm:$0xff] %vm566_vm0, %v4854_v47  ;;  %4887 = vst.msk [vmem:[%s8637_s16 + $0x38] sm:$0xff] %vm566_vm0, %v4855_v48  ;;  %v4867_v61 = vadd.f32 %v8580_v20, %v4799_v12  ;;  %v4868_v6 = vadd.f32 %v8586_v37, %v4800_v19  ;;  %v4869_v38 = vadd.f32 %v8589_v54, %v4801_v30 }
 0x5d9   : > { %4888 = vst.msk [vmem:[%s8637_s16 + $0x40] sm:$0xff] %vm566_vm0, %v4856_v39  ;;  %4889 = vst.msk [vmem:[%s8637_s16 + $0x48] sm:$0xff] %vm566_vm0, %v4857_v60  ;;  %v4870_v4 = vadd.f32 %v8592_v16, %v4802_v14  ;;  %v4871_v26 = vadd.f32 %v8595_v0, %v4803_v9  ;;  %v4872_v2 = vadd.f32 %v8601_v17, %v4804_v29 }
 0x5da   : > { %4890 = vst.msk [vmem:[%s8637_s16 + $0x50] sm:$0xff] %vm566_vm0, %v4858_v21  ;;  %4891 = vst.msk [vmem:[%s8637_s16 + $0x58] sm:$0xff] %vm566_vm0, %v4859_v43  ;;  %v4873_v34 = vadd.f32 %v8604_v3, %v4805_v31  ;;  %v4874_v36 = vadd.f32 %v8607_v52, %v4806_v44  ;;  %v4875_v22 = vadd.f32 %v8610_v18, %v4807_v25  ;;  %v8801_v15 = vld [vmem:[#allocation7_spill] sm:$0xff]  ;;  %v8802_v46 = vld [vmem:[#allocation8_spill] sm:$0xff] }
 0x5db   : > { %4892 = vst.msk [vmem:[%s8637_s16 + $0x60] sm:$0xff] %vm566_vm0, %v4860_v59  ;;  %4893 = vst.msk [vmem:[%s8637_s16 + $0x68] sm:$0xff] %vm566_vm0, %v4861_v27  ;;  %v4876_v1 = vadd.f32 %v8801_v15, %v4808_v13  ;;  %v4877_v20 = vadd.f32 %v8802_v46, %v4809_v62  ;;  %v8803_v33 = vld [vmem:[#allocation9_spill] sm:$0xff]  ;;  %v8804_v8 = vld [vmem:[#allocation10_spill] sm:$0xff] }
 0x5dc   : > { %4894 = vst.msk [vmem:[%s8637_s16 + $0x70] sm:$0xff] %vm566_vm0, %v4862_v28  ;;  %4895 = vst.msk [vmem:[%s8637_s16 + $0x78] sm:$0xff] %vm566_vm0, %v4863_v55  ;;  %v4878_v7 = vadd.f32 %v8803_v33, %v4810_v10  ;;  %v4879_v37 = vadd.f32 %v8804_v8, %v4811_v49 }
 0x5dd   : > { %4896 = vst.msk [vmem:[%s8637_s16 + $0x80] sm:$0xff] %vm566_vm0, %v4864_v11  ;;  %4897 = vst.msk [vmem:[%s8637_s16 + $0x88] sm:$0xff] %vm566_vm0, %v4865_v63 }
 0x5de   : > { %4898 = vst.msk [vmem:[%s8637_s16 + $0x90] sm:$0xff] %vm566_vm0, %v4866_v51  ;;  %4899 = vst.msk [vmem:[%s8637_s16 + $0x98] sm:$0xff] %vm566_vm0, %v4867_v61 }
 0x5df   : > { %4900 = vst.msk [vmem:[%s8637_s16 + $0xa0] sm:$0xff] %vm566_vm0, %v4868_v6  ;;  %4901 = vst.msk [vmem:[%s8637_s16 + $0xa8] sm:$0xff] %vm566_vm0, %v4869_v38 }
 0x5e0   : > { %4902 = vst.msk [vmem:[%s8637_s16 + $0xb0] sm:$0xff] %vm566_vm0, %v4870_v4  ;;  %4903 = vst.msk [vmem:[%s8637_s16 + $0xb8] sm:$0xff] %vm566_vm0, %v4871_v26 }
 0x5e1   : > { %4904 = vst.msk [vmem:[%s8637_s16 + $0xc0] sm:$0xff] %vm566_vm0, %v4872_v2  ;;  %4905 = vst.msk [vmem:[%s8637_s16 + $0xc8] sm:$0xff] %vm566_vm0, %v4873_v34 }
 0x5e2   : > { %4906 = vst.msk [vmem:[%s8637_s16 + $0xd0] sm:$0xff] %vm566_vm0, %v4874_v36  ;;  %4907 = vst.msk [vmem:[%s8637_s16 + $0xd8] sm:$0xff] %vm566_vm0, %v4875_v22 }
 0x5e3   : > { %4908 = vst.msk [vmem:[%s8637_s16 + $0xe0] sm:$0xff] %vm566_vm0, %v4876_v1  ;;  %4909 = vst.msk [vmem:[%s8637_s16 + $0xe8] sm:$0xff] %vm566_vm0, %v4877_v20 }
 0x5e4   : > { %4910 = vst.msk [vmem:[%s8637_s16 + $0xf0] sm:$0xff] %vm566_vm0, %v4878_v7  ;;  %4911 = vst.msk [vmem:[%s8637_s16 + $0xf8] sm:$0xff] %vm566_vm0, %v4879_v37 }
 0x5e5   : > { %5597 = shalt.err (!%p5594_p3)
}
 0x5e6   : > { %s5598_s29 = scalar_lea.hbm %s8708_s17, 4096  ;;  %s5602_s26 = scalar_lea.hbm %s8794_s9, 8192 }
 0x5e7   : > { %p5599_p4 = scmp.ne.s32.totalorder %s8708_s17, %s5598_s29  ;;  %p5603_p9 = scmp.lt.u32.totalorder %s8708_s17, %s8794_s9 }
 0x5e8   : > { %p5604_p10 = scmp.lt.u32.totalorder %s5602_s26, %s5598_s29  ;;  %p5606_p12 = scmp.lt.u32.totalorder %s5598_s29, %s8708_s17 }
 0x5e9   : > { %p5600_p7 = pnand %p5599_p4, %p5745_p5 }
 0x5ea   : > { %p5605_p11 = por %p5604_p10, %p5603_p9 }
 0x5eb   : > { %p5601_p8 = pneg %p5600_p7 }
 0x5ec   : > { %p5607_p13 = por %p5606_p12, %p5605_p11 }
 0x5ee   : > { %p5608_p0 = pnand %p5607_p13, %p5601_p8 }
 0x5f0   : > { %5611 = shalt.err (!%p5608_p0)
}
 0x5f1   : > { %s5655_s22 = smov 128   ;;  %s5656_s23 = smov 8  }
 0x5f2   : > { %5527 = dma.vmem_to_hbm [thread:$0]  (%p5745_p5), %s8712_s27, 4096, %s8708_s17, %s8744_s13, %s5655_s22, %s5655_s22, %s5656_s23  }
 0x5f3 PF: > { %p5533_p1 = scmp.ge.s32.totalorder %s5646_s12, 2  ;;  %s4941_s24 = sand.u32 1, %s5634_s30  }
 0x5f4   : > { %s4942_s28 = scalar_lea.sflag [#allocation5], %s4941_s24 }
 0x5f5   : > { %p5530_p2 = pnand %p5533_p1, %p5749_p6 }
 0x5f7   : > { %5629 = dma.done.wait (!%p5530_p2), %s4942_s28, 4096  }
 0x5f8   : > { %5631 = vsyncadd (!%p5530_p2), %s4942_s28, 4294963200  ;;  %p19_p3 = scmp.ge.s32.totalorder %s5732_s15, 4   ;;  %s8805_s30 = smov %s5638_s10 }
 0x5f9   : > { %s8806_s10 = smov %s5642_s11  ;;  %s8807_s11 = smov %s5743_s18 }
 0x5fa   : > { %s8808_s12 = smov %s5732_s15  ;;  %21 = sbr.rel (!%p19_p3) target bundleno = 3 (0x3), region = 94 }
 0x601   :  { %4947 = vsyncpa [#allocation5], 1 }
 0x602   :  { %4949 = vsyncpa [#allocation5 + $0x1], 1 }

</bundles_post_ra>
